<compile_context>
chip_gen: v7x
topology: tpu7x:2x2x1
jax: 0.10.0
libtpu: 0.0.40
codegen_flags: <defaults>
</compile_context>

<pallas_src>
import math
import functools
import numpy as np
import jax
import jax.numpy as jnp
from jax import lax
from jax.experimental import pallas as pl
from jax.experimental.pallas import tpu as pltpu

LANE = 128      # vreg lane width
SUBLANE = 8     # vreg sublane count


def _round_up(x, m):
    return ((x + m - 1) // m) * m


def _cdiv(a, b):
    return (a + b - 1) // b


# ---------------- host-side (glue) table construction ----------------

def indexset(d, p):
    """numpy port of the torch indexset()."""
    if d == 1:
        return np.full((1, 1), p, dtype=np.int64)
    rows = []
    for i in range(p + 1):
        idx_tmp = indexset(d - 1, p - i)
        sz = idx_tmp.shape[0]
        rows.append(np.concatenate(
            [np.full((sz, 1), i, dtype=np.int64), idx_tmp], axis=1))
    return np.concatenate(rows, axis=0)


def normal_basis(p):
    """numpy (float64) port of PCEModel.NormalBasis()."""
    B = np.zeros((p + 1, p + 1), dtype=np.float64)
    B[0, 0] = 1.0
    if p >= 1:
        B[1, 1] = 2.0
    for i in range(1, p):
        B[i + 1, 1:i + 2] = 2.0 * B[i, :i + 1]
        B[i + 1, :i] -= 2.0 * i * B[i - 1, :i]
    return B


def _vmem_capacity_bytes():
    try:
        return int(pltpu.get_tpu_info().vmem_capacity_bytes)
    except Exception:
        return 64 * 1024 * 1024       # conservative fallback (v7x per-TC VMEM)


def pick_group_size(d, p):
    """Largest group size whose (double-buffered) W table fits a VMEM slice."""
    nb_pad = _round_up(math.comb(d + p, p), LANE)
    w_budget = _vmem_capacity_bytes() // 6
    for g in range(d, 0, -1):
        ng = _cdiv(d, g)
        kg_pad = _round_up((p + 1) * g, SUBLANE)
        if 2 * ng * kg_pad * g * nb_pad * 4 <= w_budget:
            return g
    return 1


def build_pce_tables(d, p, mean, var, *, group_size):
    """Block-diagonal, power-major, tile-aligned coefficient table.

    Row   gi*kg_pad + k*g + jj   (power k of local dim jj in group gi)
    Col   jj*nb_pad + b          (basis column b; block-diagonal over jj)
    holds sum_i oneDbasis[idxset[b, j], i] * C(i,k) * a_j^k * b_j^(i-k),
    i.e. the (x - mean)/var normalization binomial-folded into powers of the
    RAW input x (a_j = 1/var_j, b_j = -mean_j/var_j).
    Dummy dims (j >= d, padding d up to ng*g) carry a 1.0 at power 0 so their
    per-dim factor is exactly 1; padded basis lanes stay exactly 0.
    """
    g = group_size
    B = normal_basis(p)                                         # (p+1, p+1)
    idx = np.concatenate([indexset(d, i) for i in range(p + 1)], axis=0)
    nbasis = math.comb(d + p, p)
    assert idx.shape == (nbasis, d)
    pp1 = p + 1
    nb_pad = _round_up(nbasis, LANE)
    ng = _cdiv(d, g)
    d_pad = ng * g
    kg_pad = _round_up(pp1 * g, SUBLANE)

    a = 1.0 / np.asarray(var, dtype=np.float64)
    b = -np.asarray(mean, dtype=np.float64) * a

    W = np.zeros((ng * kg_pad, g * nb_pad), dtype=np.float32)
    for j in range(d_pad):
        gi, jj = divmod(j, g)
        if j < d:
            C = B[idx[:, j]].T                                   # (p+1, nbasis)  [i, b]
            T = np.zeros((pp1, pp1), dtype=np.float64)           # [i, k]
            for i in range(pp1):
                for k in range(i + 1):
                    T[i, k] = math.comb(i, k) * (a[j] ** k) * (b[j] ** (i - k))
            Wp = T.T @ C                                         # (p+1, nbasis)  [k, b]
            for k in range(pp1):
                W[gi * kg_pad + k * g + jj,
                  jj * nb_pad: jj * nb_pad + nbasis] = Wp[k]
        else:                                                    # dummy dim -> factor 1
            W[gi * kg_pad + jj, jj * nb_pad:(jj + 1) * nb_pad] = 1.0

    meta = dict(d=d, p=p, nbasis=nbasis, nb_pad=nb_pad, ng=ng, g=g,
                d_pad=d_pad, kg_pad=kg_pad)
    return W, idx, B, meta


# ---------------- Pallas kernel ----------------

def _tree_prod(slabs):
    """Balanced pairwise product (log2 depth) instead of a serial chain."""
    while len(slabs) > 1:
        nxt = [slabs[i] * slabs[i + 1] for i in range(0, len(slabs) - 1, 2)]
        if len(slabs) % 2:
            nxt.append(slabs[-1])
        slabs = nxt
    return slabs[0]


def pce_kernel(x_ref, w_ref, phi_ref, *, p, g, ng, kg_pad, nb_pad, precision):
    tn = x_ref.shape[0]
    pad_k = kg_pad - (p + 1) * g
    # hoisted broadcasts (not re-emitted per group)
    ones = jnp.ones((tn, g), dtype=jnp.float32)                  # power-0 slab
    zpad = jnp.zeros((tn, pad_k), dtype=jnp.float32) if pad_k else None

    # TODO(synk): for large ng switch this static unroll to lax.fori_loop with
    # pl.ds slices of w_ref + a VMEM scratch accumulator to bound live ranges.
    group_prods = []
    for gi in range(ng):
        xg = x_ref[:, gi * g:(gi + 1) * g]                       # (tn, g)
        # full-width powers x^1 .. x^p (whole (tn, g) VPU multiplies)
        slabs = [ones]
        cur = xg
        for _ in range(1, p + 1):
            slabs.append(cur)
            cur = cur * xg
        if zpad is not None:
            slabs.append(zpad)
        vander = jnp.concatenate(slabs, axis=-1)                 # (tn, kg_pad) power-major
        wg = w_ref[gi * kg_pad:(gi + 1) * kg_pad, :]             # (kg_pad, g*nb_pad)
        vals = jnp.dot(vander, wg, precision=precision,
                       preferred_element_type=jnp.float32)       # one fused MXU matmul
        # tree product over the g lane-aligned (tn, nb_pad) slabs
        group_prods.append(_tree_prod(
            [vals[:, jj * nb_pad:(jj + 1) * nb_pad] for jj in range(g)]))
    phi_ref[...] = _tree_prod(group_prods).astype(phi_ref.dtype)


# ---------------- wrapper ----------------

def pce_forward(x, W, meta, *, tile_n=None, out_dtype=jnp.float32,
                precision=lax.Precision.HIGH):
    n, d_in = x.shape
    p, g, ng = meta["p"], meta["g"], meta["ng"]
    d_pad, nb_pad = meta["d_pad"], meta["nb_pad"]
    kg_pad, nbasis = meta["kg_pad"], meta["nbasis"]
    assert d_in == meta["d"]
    rows, cols = W.shape
    assert rows == ng * kg_pad and cols == g * nb_pad

    out_bytes = np.dtype(out_dtype).itemsize
    cap = _vmem_capacity_bytes()
    budget = (cap * 3) // 4                                       # leave headroom

    def footprint(t):
        f32 = 4
        io = 2 * t * d_pad * f32 + 2 * t * nb_pad * out_bytes     # double-buffered I/O
        w = 2 * rows * cols * f32                                 # W (2 bufs, constant index)
        tmp = t * kg_pad * f32 + 2 * t * g * nb_pad * f32         # vander + vals/tree temps
        return io + w + tmp + (2 << 20)                           # slack

    if tile_n is None:
        if n <= 1024:
            # overhead-bound regime: one big grid step is fastest
            cands = [_round_up(max(n, SUBLANE), SUBLANE)]
            cands += [t for t in (512, 256, 128, 64, 32, 16, 8) if t < cands[0]]
        else:
            # >= ~8 pipelined grid steps at scale (2 v7x TCs x >= 4 steps each)
            pref = min(1024, max(256, _round_up(_cdiv(n, 8), SUBLANE)))
            cands = [t for t in (1024, 768, 512, 384, 256, 128, 64, 32, 16, 8)
                     if t <= pref] or [SUBLANE]
        tile_n = next((t for t in cands if footprint(t) <= budget), cands[-1])
    assert tile_n % SUBLANE == 0

    n_pad = _round_up(n, tile_n)
    x_f = x.astype(jnp.float32)
    if d_pad > d_in or n_pad > n:
        x_f = jnp.pad(x_f, ((0, n_pad - n), (0, d_pad - d_in)))

    vmem_limit = int(min(budget, max(64 << 20, 2 * footprint(tile_n))))
    w_dev = jnp.asarray(W, dtype=jnp.float32)

    def _call(prec):
        kernel = functools.partial(pce_kernel, p=p, g=g, ng=ng, kg_pad=kg_pad,
                                   nb_pad=nb_pad, precision=prec)
        return pl.pallas_call(
            kernel,
            out_shape=jax.ShapeDtypeStruct((n_pad, nb_pad), out_dtype),
            grid=(n_pad // tile_n,),
            in_specs=[
                pl.BlockSpec((tile_n, d_pad), lambda i: (i, 0)),
                # constant index -> DMA'd once, stays resident across grid steps.
                # TODO(synk): pipeline_mode=pl.Buffered(1) would halve W's VMEM
                # footprint for large d/p tables once single-buffering is confirmed.
                pl.BlockSpec((rows, cols), lambda i: (0, 0)),
            ],
            out_specs=pl.BlockSpec((tile_n, nb_pad), lambda i: (i, 0)),
            compiler_params=pltpu.CompilerParams(
                dimension_semantics=("parallel",),
                vmem_limit_bytes=vmem_limit),
        )(x_f, w_dev)

    try:
        phi_pad = _call(precision)
    except Exception:
        # Some Mosaic versions only lower DEFAULT/HIGHEST dot precision.
        phi_pad = _call(lax.Precision.HIGHEST)

    return phi_pad[:n, :nbasis]


# ---------------- demo / correctness check ----------------

if __name__ == "__main__":
    d, p = 8, 2                          # small AS dimension, default poly order
    n = 256                              # batch
    nbasis_expect = math.comb(d + p, p)  # 45

    key = jax.random.PRNGKey(0)
    kx, km, kv = jax.random.split(key, 3)
    x = jax.random.normal(kx, (n, d), dtype=jnp.float32)
    mean = jax.random.normal(km, (d,), dtype=jnp.float32) * 0.1
    var = jax.random.uniform(kv, (d,), dtype=jnp.float32, minval=0.5, maxval=1.5)

    g = pick_group_size(d, p)            # == d here -> single fused matmul
    W, idx, B, meta = build_pce_tables(d, p, np.asarray(mean), np.asarray(var),
                                       group_size=g)
    assert meta["nbasis"] == nbasis_expect

    phi = pce_forward(x, W, meta)
    phi = jax.block_until_ready(phi)

    # pure-numpy reference identical to the torch forward
    xn = (np.asarray(x) - np.asarray(mean)) / np.asarray(var)
    polyval = np.zeros((n, d, p + 1), np.float32)
    for ip in range(p + 1):
        for i in range(ip + 1):
            if B[ip, i] != 0:
                polyval[:, :, ip] += np.float32(B[ip, i]) * xn ** i
    phi_ref = np.ones((n, nbasis_expect), np.float32)
    for j in range(d):
        phi_ref *= polyval[:, j, idx[:, j]]

    assert phi.shape == (n, nbasis_expect)
    err = float(np.max(np.abs(np.asarray(phi) - phi_ref)))
    assert np.allclose(np.asarray(phi), phi_ref, rtol=2e-3, atol=2e-3), err
    print("KERNEL_OK")
</pallas_src>

<mosaic_0001>
module attributes {stable_mosaic.version = 11 : i64} {
  func.func @pce_kernel(%arg0: i32, %arg1: memref<256x8xf32, #tpu.memory_space<vmem>>, %arg2: memref<24x1024xf32, #tpu.memory_space<vmem>>, %arg3: memref<256x128xf32, #tpu.memory_space<vmem>>) attributes {dimension_semantics = [#tpu.dimension_semantics<parallel>], iteration_bounds = array<i64: 1>, scalar_prefetch = 0 : i64, scratch_operands = 0 : i64, tpu.core_type = #tpu.core_type<tc>, window_params = [{transform_indices = @transform_0, window_bounds = array<i64: 256, 8>}, {pipeline_mode = #tpu.pipeline_mode<synchronous>, transform_indices = @transform_1, window_bounds = array<i64: 24, 1024>}, {transform_indices = @transform_2, window_bounds = array<i64: 256, 128>}]} {
    %cst = arith.constant 1.000000e+00 : f32
    %0 = vector.broadcast %cst : f32 to vector<256x8xf32>
    %c0 = arith.constant 0 : index
    %c0_0 = arith.constant 0 : index
    %1 = vector.load %arg1[%c0, %c0_0] : memref<256x8xf32, #tpu.memory_space<vmem>>, vector<256x8xf32>
    %2 = arith.mulf %1, %1 : vector<256x8xf32>
    %3 = tpu.concatenate %0, %1, %2 in 1 : vector<256x8xf32>, vector<256x8xf32>, vector<256x8xf32> -> vector<256x24xf32>
    %c0_1 = arith.constant 0 : index
    %c0_2 = arith.constant 0 : index
    %4 = vector.load %arg2[%c0_1, %c0_2] : memref<24x1024xf32, #tpu.memory_space<vmem>>, vector<24x1024xf32>
    %cst_3 = arith.constant dense<0.000000e+00> : vector<256x1024xf32>
    %5 = tpu.matmul %3, %4, %cst_3 {dimension_numbers = #tpu.dot_dimension_numbers<[1], [0], [0], [1], [0, 0, 1, 1], [], []>, precision = #tpu.contract_precision<fp32>} : vector<256x24xf32>, vector<24x1024xf32>, vector<256x1024xf32> -> vector<256x1024xf32>
    %6 = vector.extract_strided_slice %5 {offsets = [0, 0], sizes = [256, 128], strides = [1, 1]} : vector<256x1024xf32> to vector<256x128xf32>
    %7 = vector.extract_strided_slice %5 {offsets = [0, 128], sizes = [256, 128], strides = [1, 1]} : vector<256x1024xf32> to vector<256x128xf32>
    %8 = vector.extract_strided_slice %5 {offsets = [0, 256], sizes = [256, 128], strides = [1, 1]} : vector<256x1024xf32> to vector<256x128xf32>
    %9 = vector.extract_strided_slice %5 {offsets = [0, 384], sizes = [256, 128], strides = [1, 1]} : vector<256x1024xf32> to vector<256x128xf32>
    %10 = vector.extract_strided_slice %5 {offsets = [0, 512], sizes = [256, 128], strides = [1, 1]} : vector<256x1024xf32> to vector<256x128xf32>
    %11 = vector.extract_strided_slice %5 {offsets = [0, 640], sizes = [256, 128], strides = [1, 1]} : vector<256x1024xf32> to vector<256x128xf32>
    %12 = vector.extract_strided_slice %5 {offsets = [0, 768], sizes = [256, 128], strides = [1, 1]} : vector<256x1024xf32> to vector<256x128xf32>
    %13 = vector.extract_strided_slice %5 {offsets = [0, 896], sizes = [256, 128], strides = [1, 1]} : vector<256x1024xf32> to vector<256x128xf32>
    %14 = arith.mulf %6, %7 : vector<256x128xf32>
    %15 = arith.mulf %8, %9 : vector<256x128xf32>
    %16 = arith.mulf %10, %11 : vector<256x128xf32>
    %17 = arith.mulf %12, %13 : vector<256x128xf32>
    %18 = arith.mulf %14, %15 : vector<256x128xf32>
    %19 = arith.mulf %16, %17 : vector<256x128xf32>
    %20 = arith.mulf %18, %19 : vector<256x128xf32>
    %c0_4 = arith.constant 0 : index
    %c0_5 = arith.constant 0 : index
    %21 = vector.load %arg3[%c0_4, %c0_5] : memref<256x128xf32, #tpu.memory_space<vmem>>, vector<256x128xf32>
    tpu.vector_store %arg3[%c0_4, %c0_5], %20 {strides = array<i32>} : memref<256x128xf32, #tpu.memory_space<vmem>>, vector<256x128xf32>,
    return
  }
  func.func @transform_0(%arg0: i32) -> (i32, i32) {
    %c0_i32 = arith.constant 0 : i32
    %c0_i32_0 = arith.constant 0 : i32
    return %arg0, %c0_i32 : i32, i32
  }
  func.func @transform_1(%arg0: i32) -> (i32, i32) {
    %c0_i32 = arith.constant 0 : i32
    %c0_i32_0 = arith.constant 0 : i32
    %c0_i32_1 = arith.constant 0 : i32
    return %c0_i32, %c0_i32_0 : i32, i32
  }
  func.func @transform_2(%arg0: i32) -> (i32, i32) {
    %c0_i32 = arith.constant 0 : i32
    %c0_i32_0 = arith.constant 0 : i32
    return %arg0, %c0_i32 : i32, i32
  }
}

</mosaic_0001>

<bundles_post_ra>
// kernel: tpu_custom_call.1
= control target key start
LH: loop header
LB: loop body
LE: loop exit
PB: predicated region body
PF: predicated region fallthrough
CT: control target
= control target key end

     0   :  { %s10340_s13 = smov 8   ;;  %v13336_v5 = vmov 0.0   ;;  %s10342_s16 = smov 16   ;;  %s13085_s0 = inlined_call_operand.vmem [shape: f32[256,8], index: 0, kind: input, shape index: {}]   ;;  %s13086_s1 = inlined_call_operand.vmem [shape: f32[24,1024], index: 1, kind: input, shape index: {}]   ;;  %s13087_s2 = inlined_call_operand.hbm [shape: f32[256,128], index: 2, kind: output, shape index: {}]  }
   0x1   :  { %v13_v0 = vld [vmem:[%s13085_s0 + $0x8] sm:$0xff]  ;;  %v12_v1 = vld [vmem:[%s13085_s0] sm:$0xff]  ;;  %v14_v4 = vld [vmem:[%s13085_s0 + $0x10] sm:$0xff]  ;;  %589 = vmatprep.mubr.f32.mxu0 %v13336_v5  ;;  %2625 = vmatprep.mubr.f32.mxu1 %v13336_v5 }
   0x2   :  { %110 = vrot.lane.b32.xlu1 %v13_v0, %s10340_s13  ;;  %v45_v2 = vmul.f32 %v13_v0, %v13_v0  ;;  %108 = vrot.lane.b32.xlu0 %v12_v1, %s10340_s13  ;;  %v44_v3 = vmul.f32 %v12_v1, %v12_v1  ;;  %v46_v6 = vmul.f32 %v14_v4, %v14_v4  ;;  %v15_v7 = vld [vmem:[%s13085_s0 + $0x18] sm:$0xff]  ;;  %v16_v9 = vld [vmem:[%s13085_s0 + $0x20] sm:$0xff] }
   0x3   :  { %v47_v8 = vmul.f32 %v15_v7, %v15_v7  ;;  %v399_v10 = vld [vmem:[%s13086_s1 + $0x8] sm:$0xff]  ;;  %v401_v15 = vld [vmem:[%s13086_s1 + $0x18] sm:$0xff]  ;;  %v48_v17 = vmul.f32 %v16_v9, %v16_v9  ;;  %v398_v20 = vld [vmem:[%s13086_s1] sm:$0xff] }
   0x4   :  { %v407_v11 = vld [vmem:[%s13086_s1 + $0x48] sm:$0xff]  ;;  %v519_v13 = vand.u32 4294901760, %v399_v10  ;;  %v409_v16 = vld [vmem:[%s13086_s1 + $0x58] sm:$0xff]  ;;  %v2555_v18 = vand.u32 4294901760, %v401_v15  ;;  %v406_v21 = vld [vmem:[%s13086_s1 + $0x40] sm:$0xff]  ;;  %v521_v25 = vand.u32 4294901760, %v398_v20 }
   0x5   :  { %v17_v12 = vld [vmem:[%s13085_s0 + $0x28] sm:$0xff]  ;;  %v523_v14 = vand.u32 4294901760, %v407_v11  ;;  %v2559_v19 = vand.u32 4294901760, %v409_v16  ;;  %v400_v26 = vld [vmem:[%s13086_s1 + $0x10] sm:$0xff]  ;;  %v525_v32 = vand.u32 4294901760, %v406_v21  ;;  %v10432_v33 = vld [vmem:[%s13086_s1 + $0x98] sm:$0xff] }
   0x6   :  { %238 = vrot.lane.b32.xlu1 %v45_v2, %s10342_s16  ;;  %236 = vrot.lane.b32.xlu0 %v44_v3, %s10342_s16  ;;  %v10408_v23 = vsub.f32 %v399_v10, %v519_v13  ;;  %v408_v27 = vld [vmem:[%s13086_s1 + $0x50] sm:$0xff]  ;;  %v10421_v28 = vld [vmem:[%s13086_s1 + $0x88] sm:$0xff]  ;;  %v10425_v30 = vsub.f32 %v401_v15, %v2555_v18  ;;  %v10435_v34 = vsub.f32 %v398_v20, %v521_v25  ;;  %v2557_v35 = vand.u32 4294901760, %v400_v26 }
   0x7   :  { %v10406_v22 = vpack.c.bf16 %v523_v14, %v519_v13  ;;  %v10410_v24 = vsub.f32 %v407_v11, %v523_v14  ;;  %v10423_v29 = vpack.c.bf16 %v2559_v19, %v2555_v18  ;;  %v10427_v31 = vsub.f32 %v409_v16, %v2559_v19  ;;  %v10443_v38 = vld [vmem:[%s13086_s1 + $0x80] sm:$0xff] }
   0x8   :  { %v2561_v36 = vand.u32 4294901760, %v408_v27  ;;  %v10438_v37 = vand.u32 4294901760, %v10421_v28 }
   0x9   :  { %8936 = vmatprep.subr.bf16.mxu0 %v10406_v22 }
   0xa   :  { %112 = vrot.lane.b32.xlu0 %v14_v4, %s10340_s13  ;;  %240 = vrot.lane.b32.xlu1 %v46_v6, %s10342_s16 }
   0xe   :  { %114 = vrot.lane.b32.xlu0 %v15_v7, %s10340_s13  ;;  %242 = vrot.lane.b32.xlu1 %v47_v8, %s10342_s16 }
   0xf   :  { %7 = vsyncpa [#allocation3], 0  ;;  %v49_v39 = vmul.f32 %v17_v12, %v17_v12  ;;  %v18_v40 = vld [vmem:[%s13085_s0 + $0x30] sm:$0xff]  ;;  %v10450_v41 = vpack.c.bf16 %v525_v32, %v521_v25  ;;  %v10452_v42 = vsub.f32 %v406_v21, %v525_v32  ;;  %8960 = vmatprep.subr.bf16.mxu1 %v10423_v29  ;;  %v10460_v44 = vpack.c.bf16 %v2561_v36, %v2557_v35  ;;  %v19_v58 = vld [vmem:[%s13085_s0 + $0x38] sm:$0xff] }
  0x10   :  { %v10457_v43 = vld [vmem:[%s13086_s1 + $0x90] sm:$0xff]  ;;  %v10462_v45 = vsub.f32 %v400_v26, %v2557_v35  ;;  %v10464_v46 = vsub.f32 %v408_v27, %v2561_v36  ;;  %v10467_v47 = vand.u32 4294901760, %v10432_v33  ;;  %v10471_v48 = vand.u32 4294901760, %v10443_v38  ;;  %v20_v2 = vld [vmem:[%s13085_s0 + $0x40] sm:$0xff]  ;;  %v21_v6 = vld [vmem:[%s13085_s0 + $0x48] sm:$0xff] }
  0x11   :  { %8938 = vmatpush1.bf16.msra.mxu0 %v10450_v41  ;;  %v13099_v49 = vand.u32 4294901760, %v10408_v23  ;;  %v13098_v50 = vand.u32 4294901760, %v10410_v24  ;;  %v13097_v51 = vand.u32 4294901760, %v10425_v30  ;;  %v50_v52 = vmul.f32 %v18_v40, %v18_v40  ;;  %8962 = vmatpush1.bf16.msra.mxu1 %v10460_v44  ;;  %v22_v8 = vld [vmem:[%s13085_s0 + $0x50] sm:$0xff]  ;;  %v23_v10 = vld [vmem:[%s13085_s0 + $0x58] sm:$0xff]  ;;  %v25_v14 = vld [vmem:[%s13085_s0 + $0x68] sm:$0xff] }
  0x12   :  { %116 = vrot.lane.b32.xlu0 %v16_v9, %s10340_s13  ;;  %244 = vrot.lane.b32.xlu1 %v48_v17, %s10342_s16  ;;  %13377 = vst [vmem:[#allocation5_spill] sm:$0xff] %v10471_v48  ;;  %v10479_v53 = vand.u32 4294901760, %v10457_v43  ;;  %v13096_v54 = vand.u32 4294901760, %v10427_v31  ;;  %v51_v0 = vmul.f32 %v19_v58, %v19_v58  ;;  %v52_v4 = vmul.f32 %v20_v2, %v20_v2  ;;  %v26_v16 = vld [vmem:[%s13085_s0 + $0x70] sm:$0xff]  ;;  %v27_v18 = vld [vmem:[%s13085_s0 + $0x78] sm:$0xff] }
  0x13   :  { %528 = vmatprep.subr.mxu0 %v10438_v37  ;;  %v945_v55 = vsub.f32 %v10408_v23, %v13099_v49  ;;  %v957_v56 = vsub.f32 %v10410_v24, %v13098_v50  ;;  %v2981_v57 = vsub.f32 %v10425_v30, %v13097_v51  ;;  %2564 = vmatprep.subr.mxu1 %v10467_v47  ;;  %v28_v20 = vld [vmem:[%s13085_s0 + $0x80] sm:$0xff]  ;;  %v29_v25 = vld [vmem:[%s13085_s0 + $0x88] sm:$0xff]  ;;  %v30_v27 = vld [vmem:[%s13085_s0 + $0x90] sm:$0xff]  ;;  %vm332_vm0 = vcmask 64512  }
  0x14   :  { %13378 = vst [vmem:[#allocation6_spill] sm:$0xff] %v10479_v53  ;;  %v2993_v59 = vsub.f32 %v10427_v31, %v13096_v54  ;;  %v53_v7 = vmul.f32 %v21_v6, %v21_v6  ;;  %v54_v9 = vmul.f32 %v22_v8, %v22_v8  ;;  %v55_v11 = vmul.f32 %v23_v10, %v23_v10  ;;  %v31_v35 = vld [vmem:[%s13085_s0 + $0x98] sm:$0xff] }
  0x15   :  { %530 = vmatpush1.msra.mxu0 %v10471_v48  ;;  %v946_v60 = vand.u32 4294901760, %v945_v55  ;;  %v958_v61 = vand.u32 4294901760, %v957_v56  ;;  %v2982_v62 = vand.u32 4294901760, %v2981_v57  ;;  %2566 = vmatpush1.msra.mxu1 %v10479_v53  ;;  %v57_v15 = vmul.f32 %v25_v14, %v25_v14  ;;  %v34_v56 = vld [vmem:[%s13085_s0 + $0xb0] sm:$0xff] }
  0x16   :  { %118 = vrot.lane.b32.xlu0 %v17_v12, %s10340_s13  ;;  %246 = vrot.lane.b32.xlu1 %v49_v39, %s10342_s16  ;;  %v2994_v63 = vand.u32 4294901760, %v2993_v59  ;;  %v24_v12 = vld [vmem:[%s13085_s0 + $0x60] sm:$0xff]  ;;  %v58_v17 = vmul.f32 %v26_v16, %v26_v16  ;;  %v59_v19 = vmul.f32 %v27_v18, %v27_v18  ;;  %v60_v21 = vmul.f32 %v28_v20, %v28_v20 }
  0x17   :  { %v8939_v1 = vpack.c.bf16 %v958_v61, %v946_v60  ;;  %v56_v13 = vmul.f32 %v24_v12, %v24_v12  ;;  %v61_v26 = vmul.f32 %v29_v25, %v29_v25  ;;  %v62_v32 = vmul.f32 %v30_v27, %v30_v27  ;;  %v32_v39 = vld [vmem:[%s13085_s0 + $0xa0] sm:$0xff] }
  0x18   :  { %v8963_v3 = vpack.c.bf16 %v2994_v63, %v2982_v62  ;;  %v63_v36 = vmul.f32 %v31_v35, %v31_v35  ;;  %v66_v57 = vmul.f32 %v34_v56, %v34_v56  ;;  %v36_v60 = vld [vmem:[%s13085_s0 + $0xc0] sm:$0xff]  ;;  %v37_v62 = vld [vmem:[%s13085_s0 + $0xc8] sm:$0xff]  ;;  %vm365_vm1 = vcmask 130048  }
  0x19   :  { %8940 = vmatprep.subr.bf16.mxu0 %v8939_v1  ;;  %v68_v61 = vmul.f32 %v36_v60, %v36_v60  ;;  %v69_v63 = vmul.f32 %v37_v62, %v37_v62  ;;  %vm422_vm2 = vcmask 195584  }
  0x1a   :  { %120 = vrot.lane.b32.xlu0 %v18_v40, %s10340_s13  ;;  %248 = vrot.lane.b32.xlu1 %v50_v52, %s10342_s16  ;;  %v64_v40 = vmul.f32 %v32_v39, %v32_v39  ;;  %v33_v52 = vld [vmem:[%s13085_s0 + $0xa8] sm:$0xff] }
  0x1b   :  { %8964 = vmatprep.subr.bf16.mxu1 %v8963_v3  ;;  %v65_v55 = vmul.f32 %v33_v52, %v33_v52 }
  0x1e   :  { %122 = vrot.lane.b32.xlu0 %v19_v58, %s10340_s13  ;;  %250 = vrot.lane.b32.xlu1 %v51_v0, %s10342_s16  ;;  %v35_v58 = vld [vmem:[%s13085_s0 + $0xb8] sm:$0xff]  ;;  %v38_v0 = vld [vmem:[%s13085_s0 + $0xd0] sm:$0xff] }
  0x1f   :  { %v67_v59 = vmul.f32 %v35_v58, %v35_v58  ;;  %v70_v1 = vmul.f32 %v38_v0, %v38_v0 }
  0x22   :  { %124 = vrot.lane.b32.xlu0 %v20_v2, %s10340_s13  ;;  %252 = vrot.lane.b32.xlu1 %v52_v4, %s10342_s16  ;;  %v39_v2 = vld [vmem:[%s13085_s0 + $0xd8] sm:$0xff]  ;;  %v40_v4 = vld [vmem:[%s13085_s0 + $0xe0] sm:$0xff] }
  0x23   :  { %v71_v3 = vmul.f32 %v39_v2, %v39_v2 }
  0x26   :  { %126 = vrot.lane.b32.xlu0 %v21_v6, %s10340_s13  ;;  %254 = vrot.lane.b32.xlu1 %v53_v7, %s10342_s16  ;;  %v72_v6 = vmul.f32 %v40_v4, %v40_v4  ;;  %v41_v7 = vld [vmem:[%s13085_s0 + $0xe8] sm:$0xff] }
  0x2a   :  { %128 = vrot.lane.b32.xlu0 %v22_v8, %s10340_s13  ;;  %256 = vrot.lane.b32.xlu1 %v54_v9, %s10342_s16  ;;  %v73_v8 = vmul.f32 %v41_v7, %v41_v7  ;;  %v42_v9 = vld [vmem:[%s13085_s0 + $0xf0] sm:$0xff] }
  0x2e   :  { %130 = vrot.lane.b32.xlu0 %v23_v10, %s10340_s13  ;;  %258 = vrot.lane.b32.xlu1 %v55_v11, %s10342_s16 }
  0x32   :  { %132 = vrot.lane.b32.xlu0 %v24_v12, %s10340_s13  ;;  %260 = vrot.lane.b32.xlu1 %v56_v13, %s10342_s16  ;;  %v43_v12 = vld [vmem:[%s13085_s0 + $0xf8] sm:$0xff]  ;;  %v13095_v13 = vand.u32 4294901760, %v10435_v34 }
  0x36   :  { %134 = vrot.lane.b32.xlu0 %v25_v14, %s10340_s13  ;;  %262 = vrot.lane.b32.xlu1 %v57_v15, %s10342_s16  ;;  %v13094_v14 = vand.u32 4294901760, %v10452_v42 }
  0x3a   :  { %136 = vrot.lane.b32.xlu0 %v26_v16, %s10340_s13  ;;  %264 = vrot.lane.b32.xlu1 %v58_v17, %s10342_s16  ;;  %v74_v16 = vmul.f32 %v42_v9, %v42_v9  ;;  %v13093_v17 = vand.u32 4294901760, %v10462_v45 }
  0x3e   :  { %138 = vrot.lane.b32.xlu0 %v27_v18, %s10340_s13  ;;  %266 = vrot.lane.b32.xlu1 %v59_v19, %s10342_s16  ;;  %v13092_v18 = vand.u32 4294901760, %v10464_v46  ;;  %v75_v19 = vmul.f32 %v43_v12, %v43_v12 }
  0x42   :  { %140 = vrot.lane.b32.xlu0 %v28_v20, %s10340_s13  ;;  %268 = vrot.lane.b32.xlu1 %v60_v21, %s10342_s16 }
  0x46   :  { %142 = vrot.lane.b32.xlu0 %v29_v25, %s10340_s13  ;;  %270 = vrot.lane.b32.xlu1 %v61_v26, %s10342_s16  ;;  %v951_v26 = vsub.f32 %v10435_v34, %v13095_v13 }
  0x4a   :  { %144 = vrot.lane.b32.xlu0 %v30_v27, %s10340_s13  ;;  %272 = vrot.lane.b32.xlu1 %v62_v32, %s10342_s16  ;;  %v10633_v27 = vsub.f32 %v10421_v28, %v10438_v37  ;;  %v10637_v32 = vsub.f32 %v10432_v33, %v10467_v47  ;;  %v2987_v33 = vsub.f32 %v10462_v45, %v13093_v17 }
  0x4e   :  { %146 = vrot.lane.b32.xlu0 %v31_v35, %s10340_s13  ;;  %274 = vrot.lane.b32.xlu1 %v63_v36, %s10342_s16 }
  0x52   :  { %148 = vrot.lane.b32.xlu0 %v32_v39, %s10340_s13  ;;  %276 = vrot.lane.b32.xlu1 %v64_v40, %s10342_s16  ;;  %v10643_v39 = vsub.f32 %v10443_v38, %v10471_v48  ;;  %v963_v40 = vsub.f32 %v10452_v42, %v13094_v14  ;;  %v2999_v38 = vsub.f32 %v10464_v46, %v13092_v18 }
  0x56   :  { %150 = vrot.lane.b32.xlu0 %v33_v52, %s10340_s13  ;;  %278 = vrot.lane.b32.xlu1 %v65_v55, %s10342_s16 }
  0x5a   :  { %152 = vrot.lane.b32.xlu0 %v34_v56, %s10340_s13  ;;  %280 = vrot.lane.b32.xlu1 %v66_v57, %s10342_s16  ;;  %v10664_v57 = vsub.f32 %v10457_v43, %v10479_v53  ;;  %v2988_v43 = vand.u32 4294901760, %v2987_v33 }
  0x5e   :  { %154 = vrot.lane.b32.xlu0 %v35_v58, %s10340_s13  ;;  %282 = vrot.lane.b32.xlu1 %v67_v59, %s10342_s16 }
  0x62   :  { %156 = vrot.lane.b32.xlu0 %v36_v60, %s10340_s13  ;;  %284 = vrot.lane.b32.xlu1 %v68_v61, %s10342_s16  ;;  %v952_v60 = vand.u32 4294901760, %v951_v26  ;;  %v13091_v61 = vand.u32 4294901760, %v10633_v27 }
  0x66   :  { %158 = vrot.lane.b32.xlu0 %v37_v62, %s10340_s13  ;;  %286 = vrot.lane.b32.xlu1 %v69_v63, %s10342_s16  ;;  %v13090_v62 = vand.u32 4294901760, %v10637_v32 }
  0x6a   :  { %160 = vrot.lane.b32.xlu0 %v38_v0, %s10340_s13  ;;  %288 = vrot.lane.b32.xlu1 %v70_v1, %s10342_s16 }
  0x6e   :  { %162 = vrot.lane.b32.xlu0 %v39_v2, %s10340_s13  ;;  %290 = vrot.lane.b32.xlu1 %v71_v3, %s10342_s16  ;;  %v964_v2 = vand.u32 4294901760, %v963_v40 }
  0x72   :  { %164 = vrot.lane.b32.xlu0 %v40_v4, %s10340_s13  ;;  %292 = vrot.lane.b32.xlu1 %v72_v6, %s10342_s16  ;;  %v3000_v4 = vand.u32 4294901760, %v2999_v38  ;;  %v13089_v6 = vand.u32 4294901760, %v10643_v39 }
  0x74   :  { %v111_v10 = vpop.permute.xlu1 %110  ;;  %v109_v11 = vpop.permute.xlu0 %108  ;;  %v975_v40 = vsub.f32 %v10643_v39, %v13089_v6 }
  0x75   :  { %v334_v15 = vsel %vm332_vm0, 1.0, %v111_v10  ;;  %v333_v20 = vsel %vm332_vm0, 1.0, %v109_v11  ;;  %v13088_v10 = vand.u32 4294901760, %v10664_v57 }
  0x76   :  { %166 = vrot.lane.b32.xlu0 %v41_v7, %s10340_s13  ;;  %294 = vrot.lane.b32.xlu1 %v73_v8, %s10342_s16 }
  0x77   :  { %v3011_v38 = vsub.f32 %v10664_v57, %v13088_v10 }
  0x78   :  { %v239_v21 = vpop.permute.xlu1 %238  ;;  %v237_v25 = vpop.permute.xlu0 %236 }
  0x79   :  { %v367_v35 = vsel %vm365_vm1, %v334_v15, %v239_v21  ;;  %v366_v36 = vsel %vm365_vm1, %v333_v20, %v237_v25  ;;  %v8941_v25 = vpack.c.bf16 %v964_v2, %v952_v60 }
  0x7a   :  { %v427_v52 = vsel %vm422_vm2, %v367_v35, 0  ;;  %v424_v28 = vsel %vm422_vm2, %v366_v36, 0  ;;  %168 = vrot.lane.b32.xlu0 %v42_v9, %s10340_s13  ;;  %296 = vrot.lane.b32.xlu1 %v74_v16, %s10342_s16  ;;  %v969_v16 = vsub.f32 %v10633_v27, %v13091_v61  ;;  %v8965_v36 = vpack.c.bf16 %v3000_v4, %v2988_v43 }
  0x7b   :  { %v10658_v55 = vand.u32 4294901760, %v427_v52  ;;  %v10660_v56 = vand.u32 4294901760, %v424_v28 }
  0x7c   :  { %v113_v58 = vpop.permute.xlu0 %112  ;;  %v241_v59 = vpop.permute.xlu1 %240  ;;  %v970_v2 = vand.u32 4294901760, %v969_v16 }
  0x7d   :  { %v10669_v63 = vsub.f32 %v427_v52, %v10658_v55  ;;  %v10672_v0 = vsub.f32 %v424_v28, %v10660_v56  ;;  %v335_v1 = vsel %vm332_vm0, 1.0, %v113_v58 }
  0x7e   :  { %v368_v3 = vsel %vm365_vm1, %v335_v1, %v241_v59  ;;  %170 = vrot.lane.b32.xlu0 %v43_v12, %s10340_s13  ;;  %298 = vrot.lane.b32.xlu1 %v75_v19, %s10342_s16  ;;  %v3005_v19 = vsub.f32 %v10637_v32, %v13090_v62 }
  0x7f   :  { %13379 = vst [vmem:[#allocation7_spill] sm:$0xff] %v10669_v63  ;;  %13380 = vst [vmem:[#allocation8_spill] sm:$0xff] %v10672_v0  ;;  %v430_v7 = vsel %vm422_vm2, %v368_v3, 0  ;;  %v10681_v8 = vand.u32 4294901760, %v10672_v0  ;;  %v10684_v9 = vand.u32 4294901760, %v10669_v63 }
  0x80   :  { %v10687_v11 = vand.u32 4294901760, %v430_v7  ;;  %v115_v15 = vpop.permute.xlu0 %114  ;;  %v243_v12 = vpop.permute.xlu1 %242  ;;  %v3006_v3 = vand.u32 4294901760, %v3005_v19 }
  0x81   :  { %13381 = vst [vmem:[#allocation9_spill] sm:$0xff] %v10681_v8  ;;  %13382 = vst [vmem:[#allocation10_spill] sm:$0xff] %v10684_v9  ;;  %v336_v20 = vsel %vm332_vm0, 1.0, %v115_v15  ;;  %v593_v21 = vsub.f32 %v10672_v0, %v10681_v8  ;;  %v604_v33 = vsub.f32 %v10669_v63, %v10684_v9  ;;  %v976_v15 = vand.u32 4294901760, %v975_v40 }
  0x82   :  { %v10699_v26 = vsub.f32 %v430_v7, %v10687_v11  ;;  %v369_v35 = vsel %vm365_vm1, %v336_v20, %v243_v12  ;;  %v3012_v20 = vand.u32 4294901760, %v3011_v38  ;;  %v8967_v40 = vpack.c.bf16 %v10427_v31, %v10425_v30 }
  0x83   :  { %v433_v52 = vsel %vm422_vm2, %v369_v35, 0  ;;  %v10706_v28 = vand.u32 4294901760, %v593_v21  ;;  %v10728_v16 = vand.u32 4294901760, %v604_v33 }
  0x84   :  { %13383 = vst [vmem:[#allocation11_spill] sm:$0xff] %v10699_v26  ;;  %v10713_v58 = vand.u32 4294901760, %v433_v52  ;;  %v117_v59 = vpop.permute.xlu0 %116  ;;  %v245_v60 = vpop.permute.xlu1 %244  ;;  %v10716_v1 = vand.u32 4294901760, %v10699_v26 }
  0x85   :  { %13384 = vst [vmem:[#allocation12_spill] sm:$0xff] %v10706_v28  ;;  %v337_v43 = vsel %vm332_vm0, 1.0, %v117_v59  ;;  %595 = vmatmul.mubr.f32.vlgmr.msra.gmra.mrb[0].mxu0 %v10706_v28  ;;  %2631 = vmatmul.mubr.f32.vlgmr.msra.gmra.mrb[0].mxu1 %v10706_v28  ;;  %13387 = vst [vmem:[#allocation15_spill] sm:$0xff] %v10728_v16 }
  0x86   :  { %13385 = vst [vmem:[#allocation13_spill] sm:$0xff] %v10716_v1  ;;  %v10722_v4 = vsub.f32 %v433_v52, %v10713_v58  ;;  %v370_v7 = vsel %vm365_vm1, %v337_v43, %v245_v60  ;;  %8942 = vmatpush1.bf16.msra.mxu0 %v8941_v25  ;;  %8966 = vmatpush1.bf16.msra.mxu1 %v8965_v36 }
  0x87   :  { %v436_v12 = vsel %vm422_vm2, %v370_v7, 0  ;;  %600 = vmatprep.mubr.f32.mxu0 %v13336_v5  ;;  %2636 = vmatprep.mubr.f32.mxu1 %v13336_v5  ;;  %v615_v19 = vsub.f32 %v10699_v26, %v10716_v1  ;;  %v8943_v36 = vpack.c.bf16 %v10410_v24, %v10408_v23 }
  0x88   :  { %13386 = vst [vmem:[#allocation14_spill] sm:$0xff] %v10722_v4  ;;  %v10732_v21 = vand.u32 4294901760, %v436_v12  ;;  %v119_v35 = vpop.permute.xlu0 %118  ;;  %v247_v52 = vpop.permute.xlu1 %246  ;;  %v10735_v25 = vand.u32 4294901760, %v10722_v4  ;;  %971 = vmatprep.subr.mxu0 %v970_v2  ;;  %3007 = vmatprep.subr.mxu1 %v3006_v3 }
  0x89   :  { %v338_v33 = vsel %vm332_vm0, 1.0, %v119_v35  ;;  %606 = vmatmul.mubr.f32.gmra.mrb[2].mxu0 %v10728_v16  ;;  %2642 = vmatmul.mubr.f32.gmra.mrb[2].mxu1 %v10728_v16  ;;  %v10751_v2 = vand.u32 4294901760, %v615_v19 }
  0x8a   :  { %13388 = vst [vmem:[#allocation16_spill] sm:$0xff] %v10735_v25  ;;  %v10745_v38 = vsub.f32 %v436_v12, %v10732_v21  ;;  %v371_v59 = vsel %vm365_vm1, %v338_v33, %v247_v52  ;;  %611 = vmatprep.mubr.f32.mxu0 %v13336_v5  ;;  %2647 = vmatprep.mubr.f32.mxu1 %v13336_v5 }
  0x8b   :  { %v439_v60 = vsel %vm422_vm2, %v371_v59, 0  ;;  %13390 = vst [vmem:[#allocation18_spill] sm:$0xff] %v10751_v2  ;;  %v626_v3 = vsub.f32 %v10722_v4, %v10735_v25  ;;  %977 = vmatpush1.msra.mxu0 %v976_v15  ;;  %3013 = vmatpush1.msra.mxu1 %v3012_v20 }
  0x8c   :  { %13389 = vst [vmem:[#allocation17_spill] sm:$0xff] %v10745_v38  ;;  %v10755_v43 = vand.u32 4294901760, %v439_v60  ;;  %v121_v7 = vpop.permute.xlu0 %120  ;;  %v249_v12 = vpop.permute.xlu1 %248  ;;  %v10758_v35 = vand.u32 4294901760, %v10745_v38  ;;  %8944 = vmatprep.subr.bf16.mxu0 %v8943_v36  ;;  %8968 = vmatprep.subr.bf16.mxu1 %v8967_v40 }
  0x8d   :  { %v339_v52 = vsel %vm332_vm0, 1.0, %v121_v7  ;;  %617 = vmatmul.mubr.f32.gmra.mrb[4].mxu0 %v10751_v2  ;;  %2653 = vmatmul.mubr.f32.gmra.mrb[4].mxu1 %v10751_v2  ;;  %v10770_v33 = vand.u32 4294901760, %v626_v3 }
  0x8e   :  { %13391 = vst [vmem:[#allocation19_spill] sm:$0xff] %v10758_v35  ;;  %v10764_v19 = vsub.f32 %v439_v60, %v10755_v43  ;;  %v372_v15 = vsel %vm365_vm1, %v339_v52, %v249_v12  ;;  %622 = vmatprep.mubr.f32.mxu0 %v13336_v5  ;;  %2658 = vmatprep.mubr.f32.mxu1 %v13336_v5 }
  0x8f   :  { %v442_v20 = vsel %vm422_vm2, %v372_v15, 0  ;;  %13393 = vst [vmem:[#allocation21_spill] sm:$0xff] %v10770_v33  ;;  %v637_v36 = vsub.f32 %v10745_v38, %v10758_v35 }
  0x90   :  { %13392 = vst [vmem:[#allocation20_spill] sm:$0xff] %v10764_v19  ;;  %v10774_v40 = vand.u32 4294901760, %v442_v20  ;;  %v123_v59 = vpop.permute.xlu0 %122  ;;  %v251_v7 = vpop.permute.xlu1 %250  ;;  %v10777_v60 = vand.u32 4294901760, %v10764_v19 }
  0x91   :  { %v340_v12 = vsel %vm332_vm0, 1.0, %v123_v59  ;;  %628 = vmatmul.mubr.f32.gmra.mrb[6].mxu0 %v10770_v33  ;;  %2664 = vmatmul.mubr.f32.gmra.mrb[6].mxu1 %v10770_v33  ;;  %v10789_v10 = vand.u32 4294901760, %v637_v36 }
  0x92   :  { %13394 = vst [vmem:[#allocation22_spill] sm:$0xff] %v10777_v60  ;;  %v10783_v52 = vsub.f32 %v442_v20, %v10774_v40  ;;  %v373_v3 = vsel %vm365_vm1, %v340_v12, %v251_v7  ;;  %633 = vmatprep.mubr.f32.mxu0 %v13336_v5  ;;  %2669 = vmatprep.mubr.f32.mxu1 %v13336_v5 }
  0x93   :  { %v445_v15 = vsel %vm422_vm2, %v373_v3, 0  ;;  %13396 = vst [vmem:[#allocation24_spill] sm:$0xff] %v10789_v10  ;;  %v648_v59 = vsub.f32 %v10764_v19, %v10777_v60 }
  0x94   :  { %13395 = vst [vmem:[#allocation23_spill] sm:$0xff] %v10783_v52  ;;  %v10793_v6 = vand.u32 4294901760, %v445_v15  ;;  %v125_v62 = vpop.permute.xlu0 %124  ;;  %v253_v61 = vpop.permute.xlu1 %252  ;;  %v10796_v20 = vand.u32 4294901760, %v10783_v52 }
  0x95   :  { %v341_v7 = vsel %vm332_vm0, 1.0, %v125_v62  ;;  %639 = vmatmul.mubr.f32.gmra.mrb[8].mxu0 %v10789_v10  ;;  %2675 = vmatmul.mubr.f32.gmra.mrb[8].mxu1 %v10789_v10  ;;  %v10808_v18 = vand.u32 4294901760, %v648_v59 }
  0x96   :  { %13397 = vst [vmem:[#allocation25_spill] sm:$0xff] %v10796_v20  ;;  %v10802_v12 = vsub.f32 %v445_v15, %v10793_v6  ;;  %v374_v36 = vsel %vm365_vm1, %v341_v7, %v253_v61  ;;  %644 = vmatprep.mubr.f32.mxu0 %v13336_v5  ;;  %2680 = vmatprep.mubr.f32.mxu1 %v13336_v5 }
  0x97   :  { %v448_v3 = vsel %vm422_vm2, %v374_v36, 0  ;;  %13399 = vst [vmem:[#allocation27_spill] sm:$0xff] %v10808_v18  ;;  %v659_v62 = vsub.f32 %v10783_v52, %v10796_v20 }
  0x98   :  { %13398 = vst [vmem:[#allocation26_spill] sm:$0xff] %v10802_v12  ;;  %v10812_v17 = vand.u32 4294901760, %v448_v3  ;;  %v127_v14 = vpop.permute.xlu0 %126  ;;  %v255_v13 = vpop.permute.xlu1 %254  ;;  %v10815_v15 = vand.u32 4294901760, %v10802_v12 }
  0x99   :  { %v342_v61 = vsel %vm332_vm0, 1.0, %v127_v14  ;;  %650 = vmatmul.mubr.f32.gmra.mrb[10].mxu0 %v10808_v18  ;;  %2686 = vmatmul.mubr.f32.gmra.mrb[10].mxu1 %v10808_v18  ;;  %v10827_v54 = vand.u32 4294901760, %v659_v62 }
  0x9a   :  { %13400 = vst [vmem:[#allocation28_spill] sm:$0xff] %v10815_v15  ;;  %v10821_v7 = vsub.f32 %v448_v3, %v10812_v17  ;;  %v375_v59 = vsel %vm365_vm1, %v342_v61, %v255_v13  ;;  %655 = vmatprep.mubr.f32.mxu0 %v13336_v5  ;;  %2691 = vmatprep.mubr.f32.mxu1 %v13336_v5 }
  0x9b   :  { %v451_v36 = vsel %vm422_vm2, %v375_v59, 0  ;;  %13402 = vst [vmem:[#allocation30_spill] sm:$0xff] %v10827_v54  ;;  %v670_v14 = vsub.f32 %v10802_v12, %v10815_v15 }
  0x9c   :  { %13401 = vst [vmem:[#allocation29_spill] sm:$0xff] %v10821_v7  ;;  %v10831_v51 = vand.u32 4294901760, %v451_v36  ;;  %v129_v50 = vpop.permute.xlu0 %128  ;;  %v257_v49 = vpop.permute.xlu1 %256  ;;  %v10834_v3 = vand.u32 4294901760, %v10821_v7 }
  0x9d   :  { %v343_v13 = vsel %vm332_vm0, 1.0, %v129_v50  ;;  %661 = vmatmul.mubr.f32.gmra.mrb[12].mxu0 %v10827_v54  ;;  %2697 = vmatmul.mubr.f32.gmra.mrb[12].mxu1 %v10827_v54  ;;  %v10846_v18 = vand.u32 4294901760, %v670_v14 }
  0x9e   :  { %13403 = vst [vmem:[#allocation31_spill] sm:$0xff] %v10834_v3  ;;  %v10840_v61 = vsub.f32 %v451_v36, %v10831_v51  ;;  %v376_v62 = vsel %vm365_vm1, %v343_v13, %v257_v49  ;;  %666 = vmatprep.mubr.f32.mxu0 %v13336_v5  ;;  %2702 = vmatprep.mubr.f32.mxu1 %v13336_v5 }
  0x9f   :  { %v454_v59 = vsel %vm422_vm2, %v376_v62, 0  ;;  %13405 = vst [vmem:[#allocation33_spill] sm:$0xff] %v10846_v18  ;;  %v681_v50 = vsub.f32 %v10821_v7, %v10834_v3 }
  0xa0   :  { %13404 = vst [vmem:[#allocation32_spill] sm:$0xff] %v10840_v61  ;;  %v10850_v10 = vand.u32 4294901760, %v454_v59  ;;  %v131_v33 = vpop.permute.xlu0 %130  ;;  %v259_v54 = vpop.permute.xlu1 %258  ;;  %v10853_v36 = vand.u32 4294901760, %v10840_v61 }
  0xa1   :  { %v344_v49 = vsel %vm332_vm0, 1.0, %v131_v33  ;;  %672 = vmatmul.mubr.f32.gmra.mrb[14].mxu0 %v10846_v18  ;;  %2708 = vmatmul.mubr.f32.gmra.mrb[14].mxu1 %v10846_v18  ;;  %v10865_v2 = vand.u32 4294901760, %v681_v50 }
  0xa2   :  { %13406 = vst [vmem:[#allocation34_spill] sm:$0xff] %v10853_v36  ;;  %v10859_v13 = vsub.f32 %v454_v59, %v10850_v10  ;;  %v377_v14 = vsel %vm365_vm1, %v344_v49, %v259_v54  ;;  %677 = vmatprep.mubr.f32.mxu0 %v13336_v5  ;;  %2713 = vmatprep.mubr.f32.mxu1 %v13336_v5 }
  0xa3   :  { %v457_v62 = vsel %vm422_vm2, %v377_v14, 0  ;;  %13408 = vst [vmem:[#allocation36_spill] sm:$0xff] %v10865_v2  ;;  %v692_v33 = vsub.f32 %v10840_v61, %v10853_v36 }
  0xa4   :  { %13407 = vst [vmem:[#allocation35_spill] sm:$0xff] %v10859_v13  ;;  %v10869_v16 = vand.u32 4294901760, %v457_v62  ;;  %v133_v28 = vpop.permute.xlu0 %132  ;;  %v261_v18 = vpop.permute.xlu1 %260  ;;  %v10872_v59 = vand.u32 4294901760, %v10859_v13 }
  0xa5   :  { %v345_v54 = vsel %vm332_vm0, 1.0, %v133_v28  ;;  %683 = vmatmul.mubr.f32.gmra.mrb[16].mxu0 %v10865_v2  ;;  %2719 = vmatmul.mubr.f32.gmra.mrb[16].mxu1 %v10865_v2  ;;  %v10884_v36 = vand.u32 4294901760, %v692_v33 }
  0xa6   :  { %13409 = vst [vmem:[#allocation37_spill] sm:$0xff] %v10872_v59  ;;  %v10878_v49 = vsub.f32 %v457_v62, %v10869_v16  ;;  %v378_v50 = vsel %vm365_vm1, %v345_v54, %v261_v18  ;;  %688 = vmatprep.mubr.f32.mxu0 %v13336_v5  ;;  %2724 = vmatprep.mubr.f32.mxu1 %v13336_v5 }
  0xa7   :  { %v460_v14 = vsel %vm422_vm2, %v378_v50, 0  ;;  %13411 = vst [vmem:[#allocation39_spill] sm:$0xff] %v10884_v36  ;;  %v703_v28 = vsub.f32 %v10859_v13, %v10872_v59 }
  0xa8   :  { %13410 = vst [vmem:[#allocation38_spill] sm:$0xff] %v10878_v49  ;;  %v10888_v3 = vand.u32 4294901760, %v460_v14  ;;  %v135_v15 = vpop.permute.xlu0 %134  ;;  %v263_v2 = vpop.permute.xlu1 %262  ;;  %v10891_v62 = vand.u32 4294901760, %v10878_v49 }
  0xa9   :  { %v346_v18 = vsel %vm332_vm0, 1.0, %v135_v15  ;;  %694 = vmatmul.mubr.f32.gmra.mrb[18].mxu0 %v10884_v36  ;;  %2730 = vmatmul.mubr.f32.gmra.mrb[18].mxu1 %v10884_v36  ;;  %v10903_v59 = vand.u32 4294901760, %v703_v28 }
  0xaa   :  { %13412 = vst [vmem:[#allocation40_spill] sm:$0xff] %v10891_v62  ;;  %v10897_v54 = vsub.f32 %v460_v14, %v10888_v3  ;;  %v379_v33 = vsel %vm365_vm1, %v346_v18, %v263_v2  ;;  %699 = vmatprep.mubr.f32.mxu0 %v13336_v5  ;;  %2735 = vmatprep.mubr.f32.mxu1 %v13336_v5 }
  0xab   :  { %v463_v50 = vsel %vm422_vm2, %v379_v33, 0  ;;  %13414 = vst [vmem:[#allocation42_spill] sm:$0xff] %v10903_v59  ;;  %v714_v15 = vsub.f32 %v10878_v49, %v10891_v62 }
  0xac   :  { %13413 = vst [vmem:[#allocation41_spill] sm:$0xff] %v10897_v54  ;;  %v10907_v20 = vand.u32 4294901760, %v463_v50  ;;  %v137_v60 = vpop.permute.xlu0 %136  ;;  %v265_v36 = vpop.permute.xlu1 %264  ;;  %v10910_v14 = vand.u32 4294901760, %v10897_v54 }
  0xad   :  { %v347_v2 = vsel %vm332_vm0, 1.0, %v137_v60  ;;  %705 = vmatmul.mubr.f32.gmra.mrb[20].mxu0 %v10903_v59  ;;  %2741 = vmatmul.mubr.f32.gmra.mrb[20].mxu1 %v10903_v59  ;;  %v10922_v62 = vand.u32 4294901760, %v714_v15 }
  0xae   :  { %13415 = vst [vmem:[#allocation43_spill] sm:$0xff] %v10910_v14  ;;  %v10916_v18 = vsub.f32 %v463_v50, %v10907_v20  ;;  %v380_v28 = vsel %vm365_vm1, %v347_v2, %v265_v36  ;;  %710 = vmatprep.mubr.f32.mxu0 %v13336_v5  ;;  %2746 = vmatprep.mubr.f32.mxu1 %v13336_v5 }
  0xaf   :  { %v466_v33 = vsel %vm422_vm2, %v380_v28, 0  ;;  %13417 = vst [vmem:[#allocation45_spill] sm:$0xff] %v10922_v62  ;;  %v725_v60 = vsub.f32 %v10897_v54, %v10910_v14 }
  0xb0   :  { %13416 = vst [vmem:[#allocation44_spill] sm:$0xff] %v10916_v18  ;;  %v10926_v35 = vand.u32 4294901760, %v466_v33  ;;  %v139_v25 = vpop.permute.xlu0 %138  ;;  %v267_v59 = vpop.permute.xlu1 %266  ;;  %v10929_v50 = vand.u32 4294901760, %v10916_v18 }
  0xb1   :  { %v348_v36 = vsel %vm332_vm0, 1.0, %v139_v25  ;;  %716 = vmatmul.mubr.f32.gmra.mrb[22].mxu0 %v10922_v62  ;;  %2752 = vmatmul.mubr.f32.gmra.mrb[22].mxu1 %v10922_v62  ;;  %v10941_v14 = vand.u32 4294901760, %v725_v60 }
  0xb2   :  { %13418 = vst [vmem:[#allocation46_spill] sm:$0xff] %v10929_v50  ;;  %v10935_v2 = vsub.f32 %v466_v33, %v10926_v35  ;;  %v381_v15 = vsel %vm365_vm1, %v348_v36, %v267_v59  ;;  %721 = vmatprep.mubr.f32.mxu0 %v13336_v5  ;;  %2757 = vmatprep.mubr.f32.mxu1 %v13336_v5 }
  0xb3   :  { %v469_v28 = vsel %vm422_vm2, %v381_v15, 0  ;;  %13420 = vst [vmem:[#allocation48_spill] sm:$0xff] %v10941_v14  ;;  %v736_v25 = vsub.f32 %v10916_v18, %v10929_v50 }
  0xb4   :  { %13419 = vst [vmem:[#allocation47_spill] sm:$0xff] %v10935_v2  ;;  %v10945_v1 = vand.u32 4294901760, %v469_v28  ;;  %v141_v9 = vpop.permute.xlu0 %140  ;;  %v269_v62 = vpop.permute.xlu1 %268  ;;  %v10948_v33 = vand.u32 4294901760, %v10935_v2 }
  0xb5   :  { %v349_v59 = vsel %vm332_vm0, 1.0, %v141_v9  ;;  %727 = vmatmul.mubr.f32.gmra.mrb[24].mxu0 %v10941_v14  ;;  %2763 = vmatmul.mubr.f32.gmra.mrb[24].mxu1 %v10941_v14  ;;  %v10960_v50 = vand.u32 4294901760, %v736_v25 }
  0xb6   :  { %13421 = vst [vmem:[#allocation49_spill] sm:$0xff] %v10948_v33  ;;  %v10954_v36 = vsub.f32 %v469_v28, %v10945_v1  ;;  %v382_v60 = vsel %vm365_vm1, %v349_v59, %v269_v62  ;;  %732 = vmatprep.mubr.f32.mxu0 %v13336_v5  ;;  %2768 = vmatprep.mubr.f32.mxu1 %v13336_v5 }
  0xb7   :  { %v472_v15 = vsel %vm422_vm2, %v382_v60, 0  ;;  %13423 = vst [vmem:[#allocation51_spill] sm:$0xff] %v10960_v50  ;;  %v747_v9 = vsub.f32 %v10935_v2, %v10948_v33 }
  0xb8   :  { %13422 = vst [vmem:[#allocation50_spill] sm:$0xff] %v10954_v36  ;;  %v10964_v8 = vand.u32 4294901760, %v472_v15  ;;  %v143_v18 = vpop.permute.xlu0 %142  ;;  %v271_v14 = vpop.permute.xlu1 %270  ;;  %v10967_v28 = vand.u32 4294901760, %v10954_v36 }
  0xb9   :  { %v350_v62 = vsel %vm332_vm0, 1.0, %v143_v18  ;;  %738 = vmatmul.mubr.f32.gmra.mrb[26].mxu0 %v10960_v50  ;;  %2774 = vmatmul.mubr.f32.gmra.mrb[26].mxu1 %v10960_v50  ;;  %v10979_v33 = vand.u32 4294901760, %v747_v9 }
  0xba   :  { %13424 = vst [vmem:[#allocation52_spill] sm:$0xff] %v10967_v28  ;;  %v10973_v59 = vsub.f32 %v472_v15, %v10964_v8  ;;  %v383_v25 = vsel %vm365_vm1, %v350_v62, %v271_v14  ;;  %743 = vmatprep.mubr.f32.mxu0 %v13336_v5  ;;  %2779 = vmatprep.mubr.f32.mxu1 %v13336_v5 }
  0xbb   :  { %v475_v60 = vsel %vm422_vm2, %v383_v25, 0  ;;  %13426 = vst [vmem:[#allocation54_spill] sm:$0xff] %v10979_v33  ;;  %v758_v18 = vsub.f32 %v10954_v36, %v10967_v28 }
  0xbc   :  { %13425 = vst [vmem:[#allocation53_spill] sm:$0xff] %v10973_v59  ;;  %v10983_v2 = vand.u32 4294901760, %v475_v60  ;;  %v145_v54 = vpop.permute.xlu0 %144  ;;  %v273_v50 = vpop.permute.xlu1 %272  ;;  %v10986_v15 = vand.u32 4294901760, %v10973_v59 }
  0xbd   :  { %v351_v14 = vsel %vm332_vm0, 1.0, %v145_v54  ;;  %749 = vmatmul.mubr.f32.gmra.mrb[28].mxu0 %v10979_v33  ;;  %2785 = vmatmul.mubr.f32.gmra.mrb[28].mxu1 %v10979_v33  ;;  %v10998_v28 = vand.u32 4294901760, %v758_v18 }
  0xbe   :  { %13427 = vst [vmem:[#allocation55_spill] sm:$0xff] %v10986_v15  ;;  %v10992_v62 = vsub.f32 %v475_v60, %v10983_v2  ;;  %v384_v9 = vsel %vm365_vm1, %v351_v14, %v273_v50  ;;  %754 = vmatprep.mubr.f32.mxu0 %v13336_v5  ;;  %2790 = vmatprep.mubr.f32.mxu1 %v13336_v5 }
  0xbf   :  { %v478_v25 = vsel %vm422_vm2, %v384_v9, 0  ;;  %13429 = vst [vmem:[#allocation57_spill] sm:$0xff] %v10998_v28  ;;  %v769_v54 = vsub.f32 %v10973_v59, %v10986_v15 }
  0xc0   :  { %13428 = vst [vmem:[#allocation56_spill] sm:$0xff] %v10992_v62  ;;  %v11002_v36 = vand.u32 4294901760, %v478_v25  ;;  %v147_v49 = vpop.permute.xlu0 %146  ;;  %v275_v33 = vpop.permute.xlu1 %274  ;;  %v11005_v60 = vand.u32 4294901760, %v10992_v62 }
  0xc1   :  { %v352_v50 = vsel %vm332_vm0, 1.0, %v147_v49  ;;  %760 = vmatmul.mubr.f32.gmra.mrb[30].mxu0 %v10998_v28  ;;  %2796 = vmatmul.mubr.f32.gmra.mrb[30].mxu1 %v10998_v28  ;;  %v11017_v15 = vand.u32 4294901760, %v769_v54 }
  0xc2   :  { %13430 = vst [vmem:[#allocation58_spill] sm:$0xff] %v11005_v60  ;;  %v11011_v14 = vsub.f32 %v478_v25, %v11002_v36  ;;  %v385_v18 = vsel %vm365_vm1, %v352_v50, %v275_v33  ;;  %765 = vmatprep.mubr.f32.mxu0 %v13336_v5  ;;  %2801 = vmatprep.mubr.f32.mxu1 %v13336_v5 }
  0xc3   :  { %v481_v9 = vsel %vm422_vm2, %v385_v18, 0  ;;  %13432 = vst [vmem:[#allocation60_spill] sm:$0xff] %v11017_v15  ;;  %v780_v49 = vsub.f32 %v10992_v62, %v11005_v60 }
  0xc4   :  { %13431 = vst [vmem:[#allocation59_spill] sm:$0xff] %v11011_v14  ;;  %v11021_v59 = vand.u32 4294901760, %v481_v9  ;;  %v149_v13 = vpop.permute.xlu0 %148  ;;  %v277_v28 = vpop.permute.xlu1 %276  ;;  %v11024_v25 = vand.u32 4294901760, %v11011_v14 }
  0xc5   :  { %v353_v33 = vsel %vm332_vm0, 1.0, %v149_v13  ;;  %771 = vmatmul.mubr.f32.gmra.mrb[32].mxu0 %v11017_v15  ;;  %2807 = vmatmul.mubr.f32.gmra.mrb[32].mxu1 %v11017_v15  ;;  %v11036_v60 = vand.u32 4294901760, %v780_v49 }
  0xc6   :  { %13433 = vst [vmem:[#allocation61_spill] sm:$0xff] %v11024_v25  ;;  %v11030_v50 = vsub.f32 %v481_v9, %v11021_v59  ;;  %v386_v54 = vsel %vm365_vm1, %v353_v33, %v277_v28  ;;  %776 = vmatprep.mubr.f32.mxu0 %v13336_v5  ;;  %2812 = vmatprep.mubr.f32.mxu1 %v13336_v5 }
  0xc7   :  { %v484_v18 = vsel %vm422_vm2, %v386_v54, 0  ;;  %13435 = vst [vmem:[#allocation63_spill] sm:$0xff] %v11036_v60  ;;  %v791_v13 = vsub.f32 %v11011_v14, %v11024_v25 }
  0xc8   :  { %13434 = vst [vmem:[#allocation62_spill] sm:$0xff] %v11030_v50  ;;  %v11040_v62 = vand.u32 4294901760, %v484_v18  ;;  %v151_v61 = vpop.permute.xlu0 %150  ;;  %v279_v15 = vpop.permute.xlu1 %278  ;;  %v11043_v9 = vand.u32 4294901760, %v11030_v50 }
  0xc9   :  { %v354_v28 = vsel %vm332_vm0, 1.0, %v151_v61  ;;  %782 = vmatmul.mubr.f32.gmra.mrb[34].mxu0 %v11036_v60  ;;  %2818 = vmatmul.mubr.f32.gmra.mrb[34].mxu1 %v11036_v60  ;;  %v11055_v25 = vand.u32 4294901760, %v791_v13 }
  0xca   :  { %13436 = vst [vmem:[#allocation64_spill] sm:$0xff] %v11043_v9  ;;  %v11049_v33 = vsub.f32 %v484_v18, %v11040_v62  ;;  %v387_v49 = vsel %vm365_vm1, %v354_v28, %v279_v15  ;;  %787 = vmatprep.mubr.f32.mxu0 %v13336_v5  ;;  %2823 = vmatprep.mubr.f32.mxu1 %v13336_v5 }
  0xcb   :  { %v487_v54 = vsel %vm422_vm2, %v387_v49, 0  ;;  %13438 = vst [vmem:[#allocation66_spill] sm:$0xff] %v11055_v25  ;;  %v802_v61 = vsub.f32 %v11030_v50, %v11043_v9 }
  0xcc   :  { %13437 = vst [vmem:[#allocation65_spill] sm:$0xff] %v11049_v33  ;;  %v11059_v14 = vand.u32 4294901760, %v487_v54  ;;  %v153_v7 = vpop.permute.xlu0 %152  ;;  %v281_v60 = vpop.permute.xlu1 %280  ;;  %v11062_v18 = vand.u32 4294901760, %v11049_v33 }
  0xcd   :  { %v355_v15 = vsel %vm332_vm0, 1.0, %v153_v7  ;;  %793 = vmatmul.mubr.f32.gmra.mrb[36].mxu0 %v11055_v25  ;;  %2829 = vmatmul.mubr.f32.gmra.mrb[36].mxu1 %v11055_v25  ;;  %v11074_v9 = vand.u32 4294901760, %v802_v61 }
  0xce   :  { %13439 = vst [vmem:[#allocation67_spill] sm:$0xff] %v11062_v18  ;;  %v11068_v28 = vsub.f32 %v487_v54, %v11059_v14  ;;  %v388_v13 = vsel %vm365_vm1, %v355_v15, %v281_v60  ;;  %798 = vmatprep.mubr.f32.mxu0 %v13336_v5  ;;  %2834 = vmatprep.mubr.f32.mxu1 %v13336_v5 }
  0xcf   :  { %v490_v49 = vsel %vm422_vm2, %v388_v13, 0  ;;  %13441 = vst [vmem:[#allocation69_spill] sm:$0xff] %v11074_v9  ;;  %v813_v7 = vsub.f32 %v11049_v33, %v11062_v18 }
  0xd0   :  { %13440 = vst [vmem:[#allocation68_spill] sm:$0xff] %v11068_v28  ;;  %v11078_v50 = vand.u32 4294901760, %v490_v49  ;;  %v155_v12 = vpop.permute.xlu0 %154  ;;  %v283_v25 = vpop.permute.xlu1 %282  ;;  %v11081_v54 = vand.u32 4294901760, %v11068_v28 }
  0xd1   :  { %v356_v60 = vsel %vm332_vm0, 1.0, %v155_v12  ;;  %804 = vmatmul.mubr.f32.gmra.mrb[38].mxu0 %v11074_v9  ;;  %2840 = vmatmul.mubr.f32.gmra.mrb[38].mxu1 %v11074_v9  ;;  %v11093_v18 = vand.u32 4294901760, %v813_v7 }
  0xd2   :  { %13442 = vst [vmem:[#allocation70_spill] sm:$0xff] %v11081_v54  ;;  %v11087_v15 = vsub.f32 %v490_v49, %v11078_v50  ;;  %v389_v61 = vsel %vm365_vm1, %v356_v60, %v283_v25  ;;  %809 = vmatprep.mubr.f32.mxu0 %v13336_v5  ;;  %2845 = vmatprep.mubr.f32.mxu1 %v13336_v5 }
  0xd3   :  { %v493_v13 = vsel %vm422_vm2, %v389_v61, 0  ;;  %13444 = vst [vmem:[#allocation72_spill] sm:$0xff] %v11093_v18  ;;  %v824_v12 = vsub.f32 %v11068_v28, %v11081_v54 }
  0xd4   :  { %13443 = vst [vmem:[#allocation71_spill] sm:$0xff] %v11087_v15  ;;  %v11097_v33 = vand.u32 4294901760, %v493_v13  ;;  %v157_v52 = vpop.permute.xlu0 %156  ;;  %v285_v9 = vpop.permute.xlu1 %284  ;;  %v11100_v49 = vand.u32 4294901760, %v11087_v15 }
  0xd5   :  { %v357_v25 = vsel %vm332_vm0, 1.0, %v157_v52  ;;  %815 = vmatmul.mubr.f32.gmra.mrb[40].mxu0 %v11093_v18  ;;  %2851 = vmatmul.mubr.f32.gmra.mrb[40].mxu1 %v11093_v18  ;;  %v11112_v54 = vand.u32 4294901760, %v824_v12 }
  0xd6   :  { %13445 = vst [vmem:[#allocation73_spill] sm:$0xff] %v11100_v49  ;;  %v11106_v60 = vsub.f32 %v493_v13, %v11097_v33  ;;  %v390_v7 = vsel %vm365_vm1, %v357_v25, %v285_v9  ;;  %820 = vmatprep.mubr.f32.mxu0 %v13336_v5  ;;  %2856 = vmatprep.mubr.f32.mxu1 %v13336_v5 }
  0xd7   :  { %v496_v61 = vsel %vm422_vm2, %v390_v7, 0  ;;  %13447 = vst [vmem:[#allocation75_spill] sm:$0xff] %v11112_v54  ;;  %v835_v52 = vsub.f32 %v11087_v15, %v11100_v49 }
  0xd8   :  { %13446 = vst [vmem:[#allocation74_spill] sm:$0xff] %v11106_v60  ;;  %v11116_v28 = vand.u32 4294901760, %v496_v61  ;;  %v159_v19 = vpop.permute.xlu0 %158  ;;  %v287_v18 = vpop.permute.xlu1 %286  ;;  %v11119_v13 = vand.u32 4294901760, %v11106_v60 }
  0xd9   :  { %v358_v9 = vsel %vm332_vm0, 1.0, %v159_v19  ;;  %826 = vmatmul.mubr.f32.gmra.mrb[42].mxu0 %v11112_v54  ;;  %2862 = vmatmul.mubr.f32.gmra.mrb[42].mxu1 %v11112_v54  ;;  %v11131_v49 = vand.u32 4294901760, %v835_v52 }
  0xda   :  { %13448 = vst [vmem:[#allocation76_spill] sm:$0xff] %v11119_v13  ;;  %v11125_v25 = vsub.f32 %v496_v61, %v11116_v28  ;;  %v391_v12 = vsel %vm365_vm1, %v358_v9, %v287_v18  ;;  %831 = vmatprep.mubr.f32.mxu0 %v13336_v5  ;;  %2867 = vmatprep.mubr.f32.mxu1 %v13336_v5 }
  0xdb   :  { %v499_v7 = vsel %vm422_vm2, %v391_v12, 0  ;;  %13450 = vst [vmem:[#allocation78_spill] sm:$0xff] %v11131_v49  ;;  %v846_v19 = vsub.f32 %v11106_v60, %v11119_v13 }
  0xdc   :  { %13449 = vst [vmem:[#allocation77_spill] sm:$0xff] %v11125_v25  ;;  %v11135_v15 = vand.u32 4294901760, %v499_v7  ;;  %v161_v38 = vpop.permute.xlu0 %160  ;;  %v289_v54 = vpop.permute.xlu1 %288  ;;  %v11138_v61 = vand.u32 4294901760, %v11125_v25 }
  0xdd   :  { %v359_v18 = vsel %vm332_vm0, 1.0, %v161_v38  ;;  %837 = vmatmul.mubr.f32.gmra.mrb[44].mxu0 %v11131_v49  ;;  %2873 = vmatmul.mubr.f32.gmra.mrb[44].mxu1 %v11131_v49  ;;  %v11150_v13 = vand.u32 4294901760, %v846_v19 }
  0xde   :  { %13451 = vst [vmem:[#allocation79_spill] sm:$0xff] %v11138_v61  ;;  %v11144_v9 = vsub.f32 %v499_v7, %v11135_v15  ;;  %v392_v52 = vsel %vm365_vm1, %v359_v18, %v289_v54  ;;  %842 = vmatprep.mubr.f32.mxu0 %v13336_v5  ;;  %2878 = vmatprep.mubr.f32.mxu1 %v13336_v5 }
  0xdf   :  { %v502_v12 = vsel %vm422_vm2, %v392_v52, 0  ;;  %13453 = vst [vmem:[#allocation81_spill] sm:$0xff] %v11150_v13  ;;  %v857_v38 = vsub.f32 %v11125_v25, %v11138_v61 }
  0xe0   :  { %13452 = vst [vmem:[#allocation80_spill] sm:$0xff] %v11144_v9  ;;  %v11154_v60 = vand.u32 4294901760, %v502_v12  ;;  %v163_v4 = vpop.permute.xlu0 %162  ;;  %v291_v49 = vpop.permute.xlu1 %290  ;;  %v11157_v7 = vand.u32 4294901760, %v11144_v9 }
  0xe1   :  { %v360_v54 = vsel %vm332_vm0, 1.0, %v163_v4  ;;  %848 = vmatmul.mubr.f32.gmra.mrb[46].mxu0 %v11150_v13  ;;  %2884 = vmatmul.mubr.f32.gmra.mrb[46].mxu1 %v11150_v13  ;;  %v11169_v61 = vand.u32 4294901760, %v857_v38 }
  0xe2   :  { %13454 = vst [vmem:[#allocation82_spill] sm:$0xff] %v11157_v7  ;;  %v11163_v18 = vsub.f32 %v502_v12, %v11154_v60  ;;  %v393_v19 = vsel %vm365_vm1, %v360_v54, %v291_v49  ;;  %853 = vmatprep.mubr.f32.mxu0 %v13336_v5  ;;  %2889 = vmatprep.mubr.f32.mxu1 %v13336_v5 }
  0xe3   :  { %v505_v52 = vsel %vm422_vm2, %v393_v19, 0  ;;  %13456 = vst [vmem:[#allocation84_spill] sm:$0xff] %v11169_v61  ;;  %v868_v4 = vsub.f32 %v11144_v9, %v11157_v7 }
  0xe4   :  { %13455 = vst [vmem:[#allocation83_spill] sm:$0xff] %v11163_v18  ;;  %v11173_v25 = vand.u32 4294901760, %v505_v52  ;;  %v165_v26 = vpop.permute.xlu0 %164  ;;  %v293_v13 = vpop.permute.xlu1 %292  ;;  %v11176_v12 = vand.u32 4294901760, %v11163_v18 }
  0xe5   :  { %v361_v49 = vsel %vm332_vm0, 1.0, %v165_v26  ;;  %859 = vmatmul.mubr.f32.gmra.mrb[48].mxu0 %v11169_v61  ;;  %2895 = vmatmul.mubr.f32.gmra.mrb[48].mxu1 %v11169_v61  ;;  %v11188_v7 = vand.u32 4294901760, %v868_v4 }
  0xe6   :  { %13457 = vst [vmem:[#allocation85_spill] sm:$0xff] %v11176_v12  ;;  %v11182_v54 = vsub.f32 %v505_v52, %v11173_v25  ;;  %v394_v38 = vsel %vm365_vm1, %v361_v49, %v293_v13  ;;  %864 = vmatprep.mubr.f32.mxu0 %v13336_v5  ;;  %2900 = vmatprep.mubr.f32.mxu1 %v13336_v5 }
  0xe7   :  { %v508_v19 = vsel %vm422_vm2, %v394_v38, 0  ;;  %13459 = vst [vmem:[#allocation87_spill] sm:$0xff] %v11188_v7  ;;  %v879_v26 = vsub.f32 %v11163_v18, %v11176_v12 }
  0xe8   :  { %13458 = vst [vmem:[#allocation86_spill] sm:$0xff] %v11182_v54  ;;  %v11192_v9 = vand.u32 4294901760, %v508_v19  ;;  %v167_v53 = vpop.permute.xlu0 %166  ;;  %v295_v61 = vpop.permute.xlu1 %294  ;;  %v11195_v52 = vand.u32 4294901760, %v11182_v54 }
  0xe9   :  { %v362_v13 = vsel %vm332_vm0, 1.0, %v167_v53  ;;  %870 = vmatmul.mubr.f32.gmra.mrb[50].mxu0 %v11188_v7  ;;  %2906 = vmatmul.mubr.f32.gmra.mrb[50].mxu1 %v11188_v7  ;;  %v11207_v12 = vand.u32 4294901760, %v879_v26 }
  0xea   :  { %13460 = vst [vmem:[#allocation88_spill] sm:$0xff] %v11195_v52  ;;  %v11201_v49 = vsub.f32 %v508_v19, %v11192_v9  ;;  %v395_v4 = vsel %vm365_vm1, %v362_v13, %v295_v61  ;;  %875 = vmatprep.mubr.f32.mxu0 %v13336_v5  ;;  %2911 = vmatprep.mubr.f32.mxu1 %v13336_v5 }
  0xeb   :  { %v511_v38 = vsel %vm422_vm2, %v395_v4, 0  ;;  %13462 = vst [vmem:[#allocation90_spill] sm:$0xff] %v11207_v12  ;;  %v890_v53 = vsub.f32 %v11182_v54, %v11195_v52 }
  0xec   :  { %13461 = vst [vmem:[#allocation89_spill] sm:$0xff] %v11201_v49  ;;  %v11211_v18 = vand.u32 4294901760, %v511_v38  ;;  %v169_v48 = vpop.permute.xlu0 %168  ;;  %v297_v7 = vpop.permute.xlu1 %296  ;;  %v11214_v19 = vand.u32 4294901760, %v11201_v49 }
  0xed   :  { %v363_v61 = vsel %vm332_vm0, 1.0, %v169_v48  ;;  %881 = vmatmul.mubr.f32.gmra.mrb[52].mxu0 %v11207_v12  ;;  %2917 = vmatmul.mubr.f32.gmra.mrb[52].mxu1 %v11207_v12  ;;  %v11226_v52 = vand.u32 4294901760, %v890_v53 }
  0xee   :  { %13463 = vst [vmem:[#allocation91_spill] sm:$0xff] %v11214_v19  ;;  %v11220_v13 = vsub.f32 %v511_v38, %v11211_v18  ;;  %v396_v26 = vsel %vm365_vm1, %v363_v61, %v297_v7  ;;  %886 = vmatprep.mubr.f32.mxu0 %v13336_v5  ;;  %2922 = vmatprep.mubr.f32.mxu1 %v13336_v5 }
  0xef   :  { %v514_v4 = vsel %vm422_vm2, %v396_v26, 0  ;;  %13465 = vst [vmem:[#allocation93_spill] sm:$0xff] %v11226_v52  ;;  %v901_v48 = vsub.f32 %v11201_v49, %v11214_v19 }
  0xf0   :  { %13464 = vst [vmem:[#allocation92_spill] sm:$0xff] %v11220_v13  ;;  %v11230_v54 = vand.u32 4294901760, %v514_v4  ;;  %v171_v63 = vpop.permute.xlu0 %170  ;;  %v299_v12 = vpop.permute.xlu1 %298  ;;  %v11233_v38 = vand.u32 4294901760, %v11220_v13 }
  0xf1   :  { %v364_v7 = vsel %vm332_vm0, 1.0, %v171_v63  ;;  %892 = vmatmul.mubr.f32.gmra.mrb[54].mxu0 %v11226_v52  ;;  %2928 = vmatmul.mubr.f32.gmra.mrb[54].mxu1 %v11226_v52  ;;  %v11245_v19 = vand.u32 4294901760, %v901_v48 }
  0xf2   :  { %13466 = vst [vmem:[#allocation94_spill] sm:$0xff] %v11230_v54  ;;  %13467 = vst [vmem:[#allocation95_spill] sm:$0xff] %v11233_v38  ;;  %v11239_v61 = vsub.f32 %v514_v4, %v11230_v54  ;;  %v397_v53 = vsel %vm365_vm1, %v364_v7, %v299_v12  ;;  %897 = vmatprep.mubr.f32.mxu0 %v13336_v5  ;;  %2933 = vmatprep.mubr.f32.mxu1 %v13336_v5 }
  0xf3   :  { %v517_v26 = vsel %vm422_vm2, %v397_v53, 0  ;;  %13469 = vst [vmem:[#allocation97_spill] sm:$0xff] %v11245_v19  ;;  %v912_v63 = vsub.f32 %v11220_v13, %v11233_v38 }
  0xf4   :  { %13468 = vst [vmem:[#allocation96_spill] sm:$0xff] %v11239_v61  ;;  %v11249_v49 = vand.u32 4294901760, %v517_v26  ;;  %v11252_v52 = vand.u32 4294901760, %v11239_v61 }
  0xf5   :  { %903 = vmatmul.mubr.f32.gmra.mrb[56].mxu0 %v11245_v19  ;;  %2939 = vmatmul.mubr.f32.gmra.mrb[56].mxu1 %v11245_v19  ;;  %v11261_v4 = vand.u32 4294901760, %v912_v63  ;;  %v13481_v19 = vld [vmem:[#allocation7_spill] sm:$0xff] }
  0xf6   :  { %13470 = vst [vmem:[#allocation98_spill] sm:$0xff] %v11249_v49  ;;  %13471 = vst [vmem:[#allocation99_spill] sm:$0xff] %v11252_v52  ;;  %v11257_v12 = vsub.f32 %v517_v26, %v11249_v49  ;;  %908 = vmatprep.mubr.f32.mxu0 %v13336_v5  ;;  %2944 = vmatprep.mubr.f32.mxu1 %v13336_v5  ;;  %v923_v48 = vsub.f32 %v11239_v61, %v11252_v52 }
  0xf7   :  { %13473 = vst [vmem:[#allocation101_spill] sm:$0xff] %v11261_v4 }
  0xf8   :  { %13472 = vst [vmem:[#allocation100_spill] sm:$0xff] %v11257_v12  ;;  %v11266_v7 = vand.u32 4294901760, %v11257_v12  ;;  %v11272_v53 = vand.u32 4294901760, %v923_v48  ;;  %v8945_v48 = vpack.c.bf16 %v10452_v42, %v10435_v34 }
  0xf9   :  { %914 = vmatmul.mubr.f32.gmra.mrb[58].mxu0 %v11261_v4  ;;  %2950 = vmatmul.mubr.f32.gmra.mrb[58].mxu1 %v11261_v4 }
  0xfa   :  { %13474 = vst [vmem:[#allocation102_spill] sm:$0xff] %v11266_v7  ;;  %919 = vmatprep.mubr.f32.mxu0 %v13336_v5  ;;  %2955 = vmatprep.mubr.f32.mxu1 %v13336_v5  ;;  %13475 = vst [vmem:[#allocation103_spill] sm:$0xff] %v11272_v53  ;;  %v934_v26 = vsub.f32 %v11257_v12, %v11266_v7 }
  0xfc   :  { %v11280_v63 = vand.u32 4294901760, %v934_v26  ;;  %v13478_v26 = vand.u32 4294901760, %v10410_v24  ;;  %v13485_v24 = vld [vmem:[#allocation14_spill] sm:$0xff] }
  0xfd   :  { %925 = vmatmul.mubr.f32.gmra.mrb[60].mxu0 %v11272_v53  ;;  %2961 = vmatmul.mubr.f32.gmra.mrb[60].mxu1 %v11272_v53  ;;  %v8969_v53 = vpack.c.bf16 %v10464_v46, %v10462_v45 }
  0xfe   :  { %930 = vmatprep.mubr.f32.mxu0 %v13336_v5  ;;  %2966 = vmatprep.mubr.f32.mxu1 %v13336_v5  ;;  %13476 = vst [vmem:[#allocation104_spill] sm:$0xff] %v11280_v63 }
 0x101   :  { %936 = vmatmul.mubr.f32.gmra.mrb[62].mxu0 %v11280_v63  ;;  %2972 = vmatmul.mubr.f32.gmra.mrb[62].mxu1 %v11280_v63  ;;  %v13479_v63 = vand.u32 4294901760, %v10425_v30  ;;  %v13486_v30 = vld [vmem:[#allocation17_spill] sm:$0xff] }
 0x102   :  { %1036 = vmatprep.mubr.f32.mxu0 %v13336_v5  ;;  %3072 = vmatprep.mubr.f32.mxu1 %v13336_v5 }
 0x105   :  { %1038 = vmatmul.mubr.f32.vlgmr.msra.gmra.mrb[0].mxu0 %v10660_v56  ;;  %3074 = vmatmul.mubr.f32.vlgmr.msra.gmra.mrb[0].mxu1 %v10660_v56 }
 0x106   :  { %8946 = vmatpush1.bf16.msra.mxu0 %v8945_v48  ;;  %8970 = vmatpush1.bf16.msra.mxu1 %v8969_v53  ;;  %v13477_v53 = vand.u32 4294901760, %v10408_v23  ;;  %v13484_v23 = vld [vmem:[#allocation11_spill] sm:$0xff] }
 0x107   :  { %1043 = vmatprep.mubr.f32.mxu0 %v13336_v5  ;;  %3079 = vmatprep.mubr.f32.mxu1 %v13336_v5 }
 0x108   :  { %1275 = vmatprep.subr.mxu0 %v10633_v27  ;;  %3311 = vmatprep.subr.mxu1 %v10637_v32  ;;  %v8951_v48 = vpack.c.bf16 %v13478_v26, %v13477_v53  ;;  %v13491_v53 = vld [vmem:[#allocation32_spill] sm:$0xff]  ;;  %v13492_v26 = vld [vmem:[#allocation35_spill] sm:$0xff] }
 0x109   :  { %1045 = vmatmul.mubr.f32.gmra.mrb[2].mxu0 %v10658_v55  ;;  %3081 = vmatmul.mubr.f32.gmra.mrb[2].mxu1 %v10658_v55 }
 0x10a   :  { %1050 = vmatprep.mubr.f32.mxu0 %v13336_v5  ;;  %3086 = vmatprep.mubr.f32.mxu1 %v13336_v5 }
 0x10b   :  { %1278 = vmatpush1.msra.mxu0 %v10643_v39  ;;  %3314 = vmatpush1.msra.mxu1 %v10664_v57 }
 0x10c   :  { %8948 = vmatprep.subr.bf16.mxu0 %v10406_v22  ;;  %8972 = vmatprep.subr.bf16.mxu1 %v10423_v29 }
 0x10d   :  { %1052 = vmatmul.mubr.f32.gmra.mrb[4].mxu0 %v10687_v11  ;;  %3088 = vmatmul.mubr.f32.gmra.mrb[4].mxu1 %v10687_v11 }
 0x10e   :  { %1057 = vmatprep.mubr.f32.mxu0 %v13336_v5  ;;  %3093 = vmatprep.mubr.f32.mxu1 %v13336_v5 }
 0x111   :  { %1059 = vmatmul.mubr.f32.gmra.mrb[6].mxu0 %v10713_v58  ;;  %3095 = vmatmul.mubr.f32.gmra.mrb[6].mxu1 %v10713_v58 }
 0x112   :  { %1064 = vmatprep.mubr.f32.mxu0 %v13336_v5  ;;  %3100 = vmatprep.mubr.f32.mxu1 %v13336_v5 }
 0x115   :  { %1066 = vmatmul.mubr.f32.gmra.mrb[8].mxu0 %v10732_v21  ;;  %3102 = vmatmul.mubr.f32.gmra.mrb[8].mxu1 %v10732_v21 }
 0x116   :  { %1071 = vmatprep.mubr.f32.mxu0 %v13336_v5  ;;  %3107 = vmatprep.mubr.f32.mxu1 %v13336_v5 }
 0x119   :  { %1073 = vmatmul.mubr.f32.gmra.mrb[10].mxu0 %v10755_v43  ;;  %3109 = vmatmul.mubr.f32.gmra.mrb[10].mxu1 %v10755_v43 }
 0x11a   :  { %1078 = vmatprep.mubr.f32.mxu0 %v13336_v5  ;;  %3114 = vmatprep.mubr.f32.mxu1 %v13336_v5 }
 0x11d   :  { %1080 = vmatmul.mubr.f32.gmra.mrb[12].mxu0 %v10774_v40  ;;  %3116 = vmatmul.mubr.f32.gmra.mrb[12].mxu1 %v10774_v40 }
 0x11e   :  { %1085 = vmatprep.mubr.f32.mxu0 %v13336_v5  ;;  %3121 = vmatprep.mubr.f32.mxu1 %v13336_v5 }
 0x121   :  { %1087 = vmatmul.mubr.f32.gmra.mrb[14].mxu0 %v10793_v6  ;;  %3123 = vmatmul.mubr.f32.gmra.mrb[14].mxu1 %v10793_v6 }
 0x122   :  { %1092 = vmatprep.mubr.f32.mxu0 %v13336_v5  ;;  %3128 = vmatprep.mubr.f32.mxu1 %v13336_v5 }
 0x125   :  { %1094 = vmatmul.mubr.f32.gmra.mrb[16].mxu0 %v10812_v17  ;;  %3130 = vmatmul.mubr.f32.gmra.mrb[16].mxu1 %v10812_v17 }
 0x126   :  { %1099 = vmatprep.mubr.f32.mxu0 %v13336_v5  ;;  %3135 = vmatprep.mubr.f32.mxu1 %v13336_v5 }
 0x129   :  { %1101 = vmatmul.mubr.f32.gmra.mrb[18].mxu0 %v10831_v51  ;;  %3137 = vmatmul.mubr.f32.gmra.mrb[18].mxu1 %v10831_v51 }
 0x12a   :  { %1106 = vmatprep.mubr.f32.mxu0 %v13336_v5  ;;  %3142 = vmatprep.mubr.f32.mxu1 %v13336_v5 }
 0x12d   :  { %1108 = vmatmul.mubr.f32.gmra.mrb[20].mxu0 %v10850_v10  ;;  %3144 = vmatmul.mubr.f32.gmra.mrb[20].mxu1 %v10850_v10 }
 0x12e   :  { %1113 = vmatprep.mubr.f32.mxu0 %v13336_v5  ;;  %3149 = vmatprep.mubr.f32.mxu1 %v13336_v5 }
 0x131   :  { %1115 = vmatmul.mubr.f32.gmra.mrb[22].mxu0 %v10869_v16  ;;  %3151 = vmatmul.mubr.f32.gmra.mrb[22].mxu1 %v10869_v16 }
 0x132   :  { %1120 = vmatprep.mubr.f32.mxu0 %v13336_v5  ;;  %3156 = vmatprep.mubr.f32.mxu1 %v13336_v5 }
 0x135   :  { %1122 = vmatmul.mubr.f32.gmra.mrb[24].mxu0 %v10888_v3  ;;  %3158 = vmatmul.mubr.f32.gmra.mrb[24].mxu1 %v10888_v3 }
 0x136   :  { %1127 = vmatprep.mubr.f32.mxu0 %v13336_v5  ;;  %3163 = vmatprep.mubr.f32.mxu1 %v13336_v5 }
 0x139   :  { %1129 = vmatmul.mubr.f32.gmra.mrb[26].mxu0 %v10907_v20  ;;  %3165 = vmatmul.mubr.f32.gmra.mrb[26].mxu1 %v10907_v20 }
 0x13a   :  { %1134 = vmatprep.mubr.f32.mxu0 %v13336_v5  ;;  %3170 = vmatprep.mubr.f32.mxu1 %v13336_v5 }
 0x13d   :  { %1136 = vmatmul.mubr.f32.gmra.mrb[28].mxu0 %v10926_v35  ;;  %3172 = vmatmul.mubr.f32.gmra.mrb[28].mxu1 %v10926_v35 }
 0x13e   :  { %1141 = vmatprep.mubr.f32.mxu0 %v13336_v5  ;;  %3177 = vmatprep.mubr.f32.mxu1 %v13336_v5 }
 0x141   :  { %1143 = vmatmul.mubr.f32.gmra.mrb[30].mxu0 %v10945_v1  ;;  %3179 = vmatmul.mubr.f32.gmra.mrb[30].mxu1 %v10945_v1 }
 0x142   :  { %1148 = vmatprep.mubr.f32.mxu0 %v13336_v5  ;;  %3184 = vmatprep.mubr.f32.mxu1 %v13336_v5 }
 0x145   :  { %1150 = vmatmul.mubr.f32.gmra.mrb[32].mxu0 %v10964_v8  ;;  %3186 = vmatmul.mubr.f32.gmra.mrb[32].mxu1 %v10964_v8 }
 0x146   :  { %1155 = vmatprep.mubr.f32.mxu0 %v13336_v5  ;;  %3191 = vmatprep.mubr.f32.mxu1 %v13336_v5 }
 0x149   :  { %1157 = vmatmul.mubr.f32.gmra.mrb[34].mxu0 %v10983_v2  ;;  %3193 = vmatmul.mubr.f32.gmra.mrb[34].mxu1 %v10983_v2 }
 0x14a   :  { %1162 = vmatprep.mubr.f32.mxu0 %v13336_v5  ;;  %3198 = vmatprep.mubr.f32.mxu1 %v13336_v5 }
 0x14d   :  { %1164 = vmatmul.mubr.f32.gmra.mrb[36].mxu0 %v11002_v36  ;;  %3200 = vmatmul.mubr.f32.gmra.mrb[36].mxu1 %v11002_v36 }
 0x14e   :  { %1169 = vmatprep.mubr.f32.mxu0 %v13336_v5  ;;  %3205 = vmatprep.mubr.f32.mxu1 %v13336_v5 }
 0x151   :  { %1171 = vmatmul.mubr.f32.gmra.mrb[38].mxu0 %v11021_v59  ;;  %3207 = vmatmul.mubr.f32.gmra.mrb[38].mxu1 %v11021_v59 }
 0x152   :  { %1176 = vmatprep.mubr.f32.mxu0 %v13336_v5  ;;  %3212 = vmatprep.mubr.f32.mxu1 %v13336_v5 }
 0x155   :  { %1178 = vmatmul.mubr.f32.gmra.mrb[40].mxu0 %v11040_v62  ;;  %3214 = vmatmul.mubr.f32.gmra.mrb[40].mxu1 %v11040_v62 }
 0x156   :  { %1183 = vmatprep.mubr.f32.mxu0 %v13336_v5  ;;  %3219 = vmatprep.mubr.f32.mxu1 %v13336_v5 }
 0x159   :  { %1185 = vmatmul.mubr.f32.gmra.mrb[42].mxu0 %v11059_v14  ;;  %3221 = vmatmul.mubr.f32.gmra.mrb[42].mxu1 %v11059_v14 }
 0x15a   :  { %1190 = vmatprep.mubr.f32.mxu0 %v13336_v5  ;;  %3226 = vmatprep.mubr.f32.mxu1 %v13336_v5 }
 0x15d   :  { %1192 = vmatmul.mubr.f32.gmra.mrb[44].mxu0 %v11078_v50  ;;  %3228 = vmatmul.mubr.f32.gmra.mrb[44].mxu1 %v11078_v50 }
 0x15e   :  { %1197 = vmatprep.mubr.f32.mxu0 %v13336_v5  ;;  %3233 = vmatprep.mubr.f32.mxu1 %v13336_v5 }
 0x161   :  { %1199 = vmatmul.mubr.f32.gmra.mrb[46].mxu0 %v11097_v33  ;;  %3235 = vmatmul.mubr.f32.gmra.mrb[46].mxu1 %v11097_v33 }
 0x162   :  { %1204 = vmatprep.mubr.f32.mxu0 %v13336_v5  ;;  %3240 = vmatprep.mubr.f32.mxu1 %v13336_v5 }
 0x165   :  { %1206 = vmatmul.mubr.f32.gmra.mrb[48].mxu0 %v11116_v28  ;;  %3242 = vmatmul.mubr.f32.gmra.mrb[48].mxu1 %v11116_v28 }
 0x166   :  { %1211 = vmatprep.mubr.f32.mxu0 %v13336_v5  ;;  %3247 = vmatprep.mubr.f32.mxu1 %v13336_v5 }
 0x169   :  { %1213 = vmatmul.mubr.f32.gmra.mrb[50].mxu0 %v11135_v15  ;;  %3249 = vmatmul.mubr.f32.gmra.mrb[50].mxu1 %v11135_v15 }
 0x16a   :  { %1218 = vmatprep.mubr.f32.mxu0 %v13336_v5  ;;  %3254 = vmatprep.mubr.f32.mxu1 %v13336_v5 }
 0x16d   :  { %1220 = vmatmul.mubr.f32.gmra.mrb[52].mxu0 %v11154_v60  ;;  %3256 = vmatmul.mubr.f32.gmra.mrb[52].mxu1 %v11154_v60 }
 0x16e   :  { %1225 = vmatprep.mubr.f32.mxu0 %v13336_v5  ;;  %3261 = vmatprep.mubr.f32.mxu1 %v13336_v5 }
 0x171   :  { %1227 = vmatmul.mubr.f32.gmra.mrb[54].mxu0 %v11173_v25  ;;  %3263 = vmatmul.mubr.f32.gmra.mrb[54].mxu1 %v11173_v25 }
 0x172   :  { %1232 = vmatprep.mubr.f32.mxu0 %v13336_v5  ;;  %3268 = vmatprep.mubr.f32.mxu1 %v13336_v5 }
 0x175   :  { %1234 = vmatmul.mubr.f32.gmra.mrb[56].mxu0 %v11192_v9  ;;  %3270 = vmatmul.mubr.f32.gmra.mrb[56].mxu1 %v11192_v9 }
 0x176   :  { %1239 = vmatprep.mubr.f32.mxu0 %v13336_v5  ;;  %3275 = vmatprep.mubr.f32.mxu1 %v13336_v5 }
 0x179   :  { %1241 = vmatmul.mubr.f32.gmra.mrb[58].mxu0 %v11211_v18  ;;  %3277 = vmatmul.mubr.f32.gmra.mrb[58].mxu1 %v11211_v18 }
 0x17a   :  { %1246 = vmatprep.mubr.f32.mxu0 %v13336_v5  ;;  %3282 = vmatprep.mubr.f32.mxu1 %v13336_v5 }
 0x17d   :  { %1248 = vmatmul.mubr.f32.gmra.mrb[60].mxu0 %v11230_v54  ;;  %3284 = vmatmul.mubr.f32.gmra.mrb[60].mxu1 %v11230_v54  ;;  %v13483_v54 = vld [vmem:[#allocation6_spill] sm:$0xff] }
 0x17e   :  { %1253 = vmatprep.mubr.f32.mxu0 %v13336_v5  ;;  %3289 = vmatprep.mubr.f32.mxu1 %v13336_v5 }
 0x181   :  { %1255 = vmatmul.mubr.f32.gmra.mrb[62].mxu0 %v11249_v49  ;;  %3291 = vmatmul.mubr.f32.gmra.mrb[62].mxu1 %v11249_v49  ;;  %v13482_v49 = vld [vmem:[#allocation5_spill] sm:$0xff] }
 0x182   :  { %1337 = vmatprep.mubr.f32.mxu0 %v13336_v5  ;;  %3373 = vmatprep.mubr.f32.mxu1 %v13336_v5 }
 0x185   :  { %1340 = vmatmul.mubr.f32.vlgmr.msra.gmra.mrb[0].mxu0 %v10672_v0  ;;  %3376 = vmatmul.mubr.f32.vlgmr.msra.gmra.mrb[0].mxu1 %v10672_v0  ;;  %v13480_v0 = vand.u32 4294901760, %v10427_v31  ;;  %v13487_v31 = vld [vmem:[#allocation20_spill] sm:$0xff] }
 0x186   :  { %8950 = vmatpush1.bf16.msra.mxu0 %v10450_v41  ;;  %8974 = vmatpush1.bf16.msra.mxu1 %v10460_v44 }
 0x187   :  { %1345 = vmatprep.mubr.f32.mxu0 %v13336_v5  ;;  %3381 = vmatprep.mubr.f32.mxu1 %v13336_v5  ;;  %v8975_v4 = vpack.c.bf16 %v13480_v0, %v13479_v63  ;;  %v13488_v0 = vld [vmem:[#allocation23_spill] sm:$0xff]  ;;  %v13490_v63 = vld [vmem:[#allocation29_spill] sm:$0xff] }
 0x188   :  { %1603 = vmatprep.subr.mxu0 %v10438_v37  ;;  %3639 = vmatprep.subr.mxu1 %v10467_v47 }
 0x189   :  { %1348 = vmatmul.mubr.f32.gmra.mrb[2].mxu0 %v13481_v19  ;;  %3384 = vmatmul.mubr.f32.gmra.mrb[2].mxu1 %v13481_v19 }
 0x18a   :  { %1353 = vmatprep.mubr.f32.mxu0 %v13336_v5  ;;  %3389 = vmatprep.mubr.f32.mxu1 %v13336_v5 }
 0x18b   :  { %1605 = vmatpush1.msra.mxu0 %v13482_v49  ;;  %3641 = vmatpush1.msra.mxu1 %v13483_v54 }
 0x18c   :  { %8952 = vmatprep.subr.bf16.mxu0 %v8951_v48  ;;  %8976 = vmatprep.subr.bf16.mxu1 %v8975_v4  ;;  %v13489_v4 = vld [vmem:[#allocation26_spill] sm:$0xff] }
 0x18d   :  { %1356 = vmatmul.mubr.f32.gmra.mrb[4].mxu0 %v13484_v23  ;;  %3392 = vmatmul.mubr.f32.gmra.mrb[4].mxu1 %v13484_v23  ;;  %v13493_v48 = vld [vmem:[#allocation38_spill] sm:$0xff] }
 0x18e   :  { %1361 = vmatprep.mubr.f32.mxu0 %v13336_v5  ;;  %3397 = vmatprep.mubr.f32.mxu1 %v13336_v5 }
 0x191   :  { %1364 = vmatmul.mubr.f32.gmra.mrb[6].mxu0 %v13485_v24  ;;  %3400 = vmatmul.mubr.f32.gmra.mrb[6].mxu1 %v13485_v24 }
 0x192   :  { %1369 = vmatprep.mubr.f32.mxu0 %v13336_v5  ;;  %3405 = vmatprep.mubr.f32.mxu1 %v13336_v5 }
 0x195   :  { %1372 = vmatmul.mubr.f32.gmra.mrb[8].mxu0 %v13486_v30  ;;  %3408 = vmatmul.mubr.f32.gmra.mrb[8].mxu1 %v13486_v30 }
 0x196   :  { %1377 = vmatprep.mubr.f32.mxu0 %v13336_v5  ;;  %3413 = vmatprep.mubr.f32.mxu1 %v13336_v5 }
 0x199   :  { %1380 = vmatmul.mubr.f32.gmra.mrb[10].mxu0 %v13487_v31  ;;  %3416 = vmatmul.mubr.f32.gmra.mrb[10].mxu1 %v13487_v31 }
 0x19a   :  { %1385 = vmatprep.mubr.f32.mxu0 %v13336_v5  ;;  %3421 = vmatprep.mubr.f32.mxu1 %v13336_v5 }
 0x19d   :  { %1388 = vmatmul.mubr.f32.gmra.mrb[12].mxu0 %v13488_v0  ;;  %3424 = vmatmul.mubr.f32.gmra.mrb[12].mxu1 %v13488_v0 }
 0x19e   :  { %1393 = vmatprep.mubr.f32.mxu0 %v13336_v5  ;;  %3429 = vmatprep.mubr.f32.mxu1 %v13336_v5 }
 0x1a1   :  { %1396 = vmatmul.mubr.f32.gmra.mrb[14].mxu0 %v13489_v4  ;;  %3432 = vmatmul.mubr.f32.gmra.mrb[14].mxu1 %v13489_v4  ;;  %v13515_v4 = vld [vmem:[#allocation9_spill] sm:$0xff] }
 0x1a2   :  { %1401 = vmatprep.mubr.f32.mxu0 %v13336_v5  ;;  %3437 = vmatprep.mubr.f32.mxu1 %v13336_v5 }
 0x1a5   :  { %1404 = vmatmul.mubr.f32.gmra.mrb[16].mxu0 %v13490_v63  ;;  %3440 = vmatmul.mubr.f32.gmra.mrb[16].mxu1 %v13490_v63 }
 0x1a6   :  { %1409 = vmatprep.mubr.f32.mxu0 %v13336_v5  ;;  %3445 = vmatprep.mubr.f32.mxu1 %v13336_v5 }
 0x1a9   :  { %1412 = vmatmul.mubr.f32.gmra.mrb[18].mxu0 %v13491_v53  ;;  %3448 = vmatmul.mubr.f32.gmra.mrb[18].mxu1 %v13491_v53  ;;  %v13494_v53 = vld [vmem:[#allocation41_spill] sm:$0xff] }
 0x1aa   :  { %1417 = vmatprep.mubr.f32.mxu0 %v13336_v5  ;;  %3453 = vmatprep.mubr.f32.mxu1 %v13336_v5 }
 0x1ad   :  { %1420 = vmatmul.mubr.f32.gmra.mrb[20].mxu0 %v13492_v26  ;;  %3456 = vmatmul.mubr.f32.gmra.mrb[20].mxu1 %v13492_v26  ;;  %v13495_v26 = vld [vmem:[#allocation44_spill] sm:$0xff] }
 0x1ae   :  { %1425 = vmatprep.mubr.f32.mxu0 %v13336_v5  ;;  %3461 = vmatprep.mubr.f32.mxu1 %v13336_v5 }
 0x1b1   :  { %1428 = vmatmul.mubr.f32.gmra.mrb[22].mxu0 %v13493_v48  ;;  %3464 = vmatmul.mubr.f32.gmra.mrb[22].mxu1 %v13493_v48  ;;  %v13496_v48 = vld [vmem:[#allocation47_spill] sm:$0xff] }
 0x1b2   :  { %1433 = vmatprep.mubr.f32.mxu0 %v13336_v5  ;;  %3469 = vmatprep.mubr.f32.mxu1 %v13336_v5 }
 0x1b5   :  { %1436 = vmatmul.mubr.f32.gmra.mrb[24].mxu0 %v13494_v53  ;;  %3472 = vmatmul.mubr.f32.gmra.mrb[24].mxu1 %v13494_v53  ;;  %v13497_v53 = vld [vmem:[#allocation50_spill] sm:$0xff] }
 0x1b6   :  { %1441 = vmatprep.mubr.f32.mxu0 %v13336_v5  ;;  %3477 = vmatprep.mubr.f32.mxu1 %v13336_v5 }
 0x1b9   :  { %1444 = vmatmul.mubr.f32.gmra.mrb[26].mxu0 %v13495_v26  ;;  %3480 = vmatmul.mubr.f32.gmra.mrb[26].mxu1 %v13495_v26  ;;  %v13498_v26 = vld [vmem:[#allocation53_spill] sm:$0xff] }
 0x1ba   :  { %1449 = vmatprep.mubr.f32.mxu0 %v13336_v5  ;;  %3485 = vmatprep.mubr.f32.mxu1 %v13336_v5 }
 0x1bd   :  { %1452 = vmatmul.mubr.f32.gmra.mrb[28].mxu0 %v13496_v48  ;;  %3488 = vmatmul.mubr.f32.gmra.mrb[28].mxu1 %v13496_v48  ;;  %v13499_v48 = vld [vmem:[#allocation56_spill] sm:$0xff] }
 0x1be   :  { %1457 = vmatprep.mubr.f32.mxu0 %v13336_v5  ;;  %3493 = vmatprep.mubr.f32.mxu1 %v13336_v5 }
 0x1c1   :  { %1460 = vmatmul.mubr.f32.gmra.mrb[30].mxu0 %v13497_v53  ;;  %3496 = vmatmul.mubr.f32.gmra.mrb[30].mxu1 %v13497_v53  ;;  %v13500_v53 = vld [vmem:[#allocation59_spill] sm:$0xff] }
 0x1c2   :  { %1465 = vmatprep.mubr.f32.mxu0 %v13336_v5  ;;  %3501 = vmatprep.mubr.f32.mxu1 %v13336_v5 }
 0x1c5   :  { %1468 = vmatmul.mubr.f32.gmra.mrb[32].mxu0 %v13498_v26  ;;  %3504 = vmatmul.mubr.f32.gmra.mrb[32].mxu1 %v13498_v26  ;;  %v13501_v26 = vld [vmem:[#allocation62_spill] sm:$0xff] }
 0x1c6   :  { %1473 = vmatprep.mubr.f32.mxu0 %v13336_v5  ;;  %3509 = vmatprep.mubr.f32.mxu1 %v13336_v5 }
 0x1c9   :  { %1476 = vmatmul.mubr.f32.gmra.mrb[34].mxu0 %v13499_v48  ;;  %3512 = vmatmul.mubr.f32.gmra.mrb[34].mxu1 %v13499_v48  ;;  %v13502_v48 = vld [vmem:[#allocation65_spill] sm:$0xff] }
 0x1ca   :  { %1481 = vmatprep.mubr.f32.mxu0 %v13336_v5  ;;  %3517 = vmatprep.mubr.f32.mxu1 %v13336_v5 }
 0x1cd   :  { %1484 = vmatmul.mubr.f32.gmra.mrb[36].mxu0 %v13500_v53  ;;  %3520 = vmatmul.mubr.f32.gmra.mrb[36].mxu1 %v13500_v53  ;;  %v13503_v53 = vld [vmem:[#allocation68_spill] sm:$0xff] }
 0x1ce   :  { %1489 = vmatprep.mubr.f32.mxu0 %v13336_v5  ;;  %3525 = vmatprep.mubr.f32.mxu1 %v13336_v5 }
 0x1d1   :  { %1492 = vmatmul.mubr.f32.gmra.mrb[38].mxu0 %v13501_v26  ;;  %3528 = vmatmul.mubr.f32.gmra.mrb[38].mxu1 %v13501_v26  ;;  %v13504_v26 = vld [vmem:[#allocation71_spill] sm:$0xff] }
 0x1d2   :  { %1497 = vmatprep.mubr.f32.mxu0 %v13336_v5  ;;  %3533 = vmatprep.mubr.f32.mxu1 %v13336_v5 }
 0x1d5   :  { %1500 = vmatmul.mubr.f32.gmra.mrb[40].mxu0 %v13502_v48  ;;  %3536 = vmatmul.mubr.f32.gmra.mrb[40].mxu1 %v13502_v48  ;;  %v13505_v48 = vld [vmem:[#allocation74_spill] sm:$0xff] }
 0x1d6   :  { %1505 = vmatprep.mubr.f32.mxu0 %v13336_v5  ;;  %3541 = vmatprep.mubr.f32.mxu1 %v13336_v5 }
 0x1d9   :  { %1508 = vmatmul.mubr.f32.gmra.mrb[42].mxu0 %v13503_v53  ;;  %3544 = vmatmul.mubr.f32.gmra.mrb[42].mxu1 %v13503_v53  ;;  %v13506_v53 = vld [vmem:[#allocation77_spill] sm:$0xff] }
 0x1da   :  { %1513 = vmatprep.mubr.f32.mxu0 %v13336_v5  ;;  %3549 = vmatprep.mubr.f32.mxu1 %v13336_v5 }
 0x1dd   :  { %1516 = vmatmul.mubr.f32.gmra.mrb[44].mxu0 %v13504_v26  ;;  %3552 = vmatmul.mubr.f32.gmra.mrb[44].mxu1 %v13504_v26  ;;  %v13507_v26 = vld [vmem:[#allocation80_spill] sm:$0xff] }
 0x1de   :  { %1521 = vmatprep.mubr.f32.mxu0 %v13336_v5  ;;  %3557 = vmatprep.mubr.f32.mxu1 %v13336_v5 }
 0x1e1   :  { %1524 = vmatmul.mubr.f32.gmra.mrb[46].mxu0 %v13505_v48  ;;  %3560 = vmatmul.mubr.f32.gmra.mrb[46].mxu1 %v13505_v48  ;;  %v13508_v48 = vld [vmem:[#allocation83_spill] sm:$0xff] }
 0x1e2   :  { %1529 = vmatprep.mubr.f32.mxu0 %v13336_v5  ;;  %3565 = vmatprep.mubr.f32.mxu1 %v13336_v5 }
 0x1e5   :  { %1532 = vmatmul.mubr.f32.gmra.mrb[48].mxu0 %v13506_v53  ;;  %3568 = vmatmul.mubr.f32.gmra.mrb[48].mxu1 %v13506_v53  ;;  %v13509_v53 = vld [vmem:[#allocation86_spill] sm:$0xff] }
 0x1e6   :  { %1537 = vmatprep.mubr.f32.mxu0 %v13336_v5  ;;  %3573 = vmatprep.mubr.f32.mxu1 %v13336_v5 }
 0x1e9   :  { %1540 = vmatmul.mubr.f32.gmra.mrb[50].mxu0 %v13507_v26  ;;  %3576 = vmatmul.mubr.f32.gmra.mrb[50].mxu1 %v13507_v26  ;;  %v13510_v26 = vld [vmem:[#allocation89_spill] sm:$0xff] }
 0x1ea   :  { %1545 = vmatprep.mubr.f32.mxu0 %v13336_v5  ;;  %3581 = vmatprep.mubr.f32.mxu1 %v13336_v5 }
 0x1ed   :  { %1548 = vmatmul.mubr.f32.gmra.mrb[52].mxu0 %v13508_v48  ;;  %3584 = vmatmul.mubr.f32.gmra.mrb[52].mxu1 %v13508_v48  ;;  %v13513_v48 = vand.u32 4294901760, %v10462_v45  ;;  %v13518_v45 = vld [vmem:[#allocation10_spill] sm:$0xff] }
 0x1ee   :  { %1553 = vmatprep.mubr.f32.mxu0 %v13336_v5  ;;  %3589 = vmatprep.mubr.f32.mxu1 %v13336_v5 }
 0x1f1   :  { %1556 = vmatmul.mubr.f32.gmra.mrb[54].mxu0 %v13509_v53  ;;  %3592 = vmatmul.mubr.f32.gmra.mrb[54].mxu1 %v13509_v53 }
 0x1f2   :  { %1561 = vmatprep.mubr.f32.mxu0 %v13336_v5  ;;  %3597 = vmatprep.mubr.f32.mxu1 %v13336_v5 }
 0x1f5   :  { %1564 = vmatmul.mubr.f32.gmra.mrb[56].mxu0 %v13510_v26  ;;  %3600 = vmatmul.mubr.f32.gmra.mrb[56].mxu1 %v13510_v26  ;;  %v13512_v26 = vand.u32 4294901760, %v10452_v42  ;;  %v13517_v42 = vand.u32 4294901760, %v10637_v32  ;;  %v13522_v32 = vld [vmem:[#allocation16_spill] sm:$0xff] }
 0x1f6   :  { %1569 = vmatprep.mubr.f32.mxu0 %v13336_v5  ;;  %3605 = vmatprep.mubr.f32.mxu1 %v13336_v5 }
 0x1f9   :  { %1572 = vmatmul.mubr.f32.gmra.mrb[58].mxu0 %v11220_v13  ;;  %3608 = vmatmul.mubr.f32.gmra.mrb[58].mxu1 %v11220_v13  ;;  %v13511_v13 = vand.u32 4294901760, %v10435_v34  ;;  %v13516_v34 = vand.u32 4294901760, %v10633_v27  ;;  %v13521_v27 = vld [vmem:[#allocation13_spill] sm:$0xff] }
 0x1fa   :  { %1577 = vmatprep.mubr.f32.mxu0 %v13336_v5  ;;  %3613 = vmatprep.mubr.f32.mxu1 %v13336_v5 }
 0x1fb   :  { %v8953_v53 = vpack.c.bf16 %v13512_v26, %v13511_v13  ;;  %v13520_v13 = vand.u32 4294901760, %v10664_v57  ;;  %v13526_v57 = vld [vmem:[#allocation28_spill] sm:$0xff] }
 0x1fc   :  { %v13530_v26 = vld [vmem:[#allocation40_spill] sm:$0xff] }
 0x1fd   :  { %1580 = vmatmul.mubr.f32.gmra.mrb[60].mxu0 %v11239_v61  ;;  %3616 = vmatmul.mubr.f32.gmra.mrb[60].mxu1 %v11239_v61  ;;  %v13514_v61 = vand.u32 4294901760, %v10464_v46  ;;  %v13519_v46 = vand.u32 4294901760, %v10643_v39  ;;  %v13523_v39 = vld [vmem:[#allocation19_spill] sm:$0xff] }
 0x1fe   :  { %1585 = vmatprep.mubr.f32.mxu0 %v13336_v5  ;;  %3621 = vmatprep.mubr.f32.mxu1 %v13336_v5 }
 0x1ff   :  { %v8977_v63 = vpack.c.bf16 %v13514_v61, %v13513_v48  ;;  %v13527_v61 = vld [vmem:[#allocation31_spill] sm:$0xff] }
 0x200   :  { %v13531_v48 = vld [vmem:[#allocation43_spill] sm:$0xff] }
 0x201   :  { %1588 = vmatmul.mubr.f32.gmra.mrb[62].mxu0 %v11257_v12  ;;  %3624 = vmatmul.mubr.f32.gmra.mrb[62].mxu1 %v11257_v12 }
 0x202   :  { %1664 = vmatprep.mubr.f32.mxu0 %v13336_v5  ;;  %3700 = vmatprep.mubr.f32.mxu1 %v13336_v5 }
 0x205   :  { %1668 = vmatmul.mubr.f32.vlgmr.msra.gmra.mrb[0].mxu0 %v13515_v4  ;;  %3704 = vmatmul.mubr.f32.vlgmr.msra.gmra.mrb[0].mxu1 %v13515_v4 }
 0x206   :  { %8954 = vmatpush1.bf16.msra.mxu0 %v8953_v53  ;;  %8978 = vmatpush1.bf16.msra.mxu1 %v8977_v63  ;;  %v13528_v63 = vld [vmem:[#allocation34_spill] sm:$0xff]  ;;  %v13529_v53 = vld [vmem:[#allocation37_spill] sm:$0xff] }
 0x207   :  { %1673 = vmatprep.mubr.f32.mxu0 %v13336_v5  ;;  %3709 = vmatprep.mubr.f32.mxu1 %v13336_v5 }
 0x208   :  { %1972 = vmatprep.subr.mxu0 %v13516_v34  ;;  %4008 = vmatprep.subr.mxu1 %v13517_v42  ;;  %v13532_v34 = vld [vmem:[#allocation46_spill] sm:$0xff]  ;;  %v13533_v42 = vld [vmem:[#allocation49_spill] sm:$0xff] }
 0x209   :  { %1677 = vmatmul.mubr.f32.gmra.mrb[2].mxu0 %v13518_v45  ;;  %3713 = vmatmul.mubr.f32.gmra.mrb[2].mxu1 %v13518_v45 }
 0x20a   :  { %1682 = vmatprep.mubr.f32.mxu0 %v13336_v5  ;;  %3718 = vmatprep.mubr.f32.mxu1 %v13336_v5 }
 0x20b   :  { %1976 = vmatpush1.msra.mxu0 %v13519_v46  ;;  %4012 = vmatpush1.msra.mxu1 %v13520_v13  ;;  %v13534_v46 = vld [vmem:[#allocation52_spill] sm:$0xff]  ;;  %v13535_v13 = vld [vmem:[#allocation55_spill] sm:$0xff] }
 0x20c   :  { %8956 = vmatprep.subr.bf16.mxu0 %v10406_v22  ;;  %8980 = vmatprep.subr.bf16.mxu1 %v10423_v29  ;;  %v13524_v22 = vld [vmem:[#allocation22_spill] sm:$0xff]  ;;  %v13525_v29 = vld [vmem:[#allocation25_spill] sm:$0xff] }
 0x20d   :  { %1686 = vmatmul.mubr.f32.gmra.mrb[4].mxu0 %v13521_v27  ;;  %3722 = vmatmul.mubr.f32.gmra.mrb[4].mxu1 %v13521_v27 }
 0x20e   :  { %1691 = vmatprep.mubr.f32.mxu0 %v13336_v5  ;;  %3727 = vmatprep.mubr.f32.mxu1 %v13336_v5 }
 0x211   :  { %1695 = vmatmul.mubr.f32.gmra.mrb[6].mxu0 %v13522_v32  ;;  %3731 = vmatmul.mubr.f32.gmra.mrb[6].mxu1 %v13522_v32 }
 0x212   :  { %1700 = vmatprep.mubr.f32.mxu0 %v13336_v5  ;;  %3736 = vmatprep.mubr.f32.mxu1 %v13336_v5 }
 0x215   :  { %1704 = vmatmul.mubr.f32.gmra.mrb[8].mxu0 %v13523_v39  ;;  %3740 = vmatmul.mubr.f32.gmra.mrb[8].mxu1 %v13523_v39 }
 0x216   :  { %1709 = vmatprep.mubr.f32.mxu0 %v13336_v5  ;;  %3745 = vmatprep.mubr.f32.mxu1 %v13336_v5 }
 0x219   :  { %1713 = vmatmul.mubr.f32.gmra.mrb[10].mxu0 %v13524_v22  ;;  %3749 = vmatmul.mubr.f32.gmra.mrb[10].mxu1 %v13524_v22  ;;  %v13548_v22 = vmov 0.0  }
 0x21a   :  { %1718 = vmatprep.mubr.f32.mxu0 %v13336_v5  ;;  %3754 = vmatprep.mubr.f32.mxu1 %v13336_v5 }
 0x21d   :  { %1722 = vmatmul.mubr.f32.gmra.mrb[12].mxu0 %v13525_v29  ;;  %3758 = vmatmul.mubr.f32.gmra.mrb[12].mxu1 %v13525_v29  ;;  %v11755_v29 = vld [vmem:[%s13086_s1 + $0x70] sm:$0xff] }
 0x21e   :  { %1727 = vmatprep.mubr.f32.mxu0 %v13336_v5  ;;  %3763 = vmatprep.mubr.f32.mxu1 %v13336_v5  ;;  %v6633_v32 = vand.u32 4294901760, %v11755_v29 }
 0x221   :  { %1731 = vmatmul.mubr.f32.gmra.mrb[14].mxu0 %v13526_v57  ;;  %3767 = vmatmul.mubr.f32.gmra.mrb[14].mxu1 %v13526_v57  ;;  %v11750_v57 = vld [vmem:[%s13086_s1 + $0x30] sm:$0xff] }
 0x222   :  { %1736 = vmatprep.mubr.f32.mxu0 %v13336_v5  ;;  %3772 = vmatprep.mubr.f32.mxu1 %v13336_v5  ;;  %v6629_v39 = vand.u32 4294901760, %v11750_v57 }
 0x224   :  { %v11934_v27 = vpack.c.bf16 %v6633_v32, %v6629_v39 }
 0x225   :  { %1740 = vmatmul.mubr.f32.gmra.mrb[16].mxu0 %v13527_v61  ;;  %3776 = vmatmul.mubr.f32.gmra.mrb[16].mxu1 %v13527_v61 }
 0x226   :  { %1745 = vmatprep.mubr.f32.mxu0 %v13336_v5  ;;  %3781 = vmatprep.mubr.f32.mxu1 %v13336_v5 }
 0x229   :  { %1749 = vmatmul.mubr.f32.gmra.mrb[18].mxu0 %v13528_v63  ;;  %3785 = vmatmul.mubr.f32.gmra.mrb[18].mxu1 %v13528_v63  ;;  %v11738_v63 = vld [vmem:[%s13086_s1 + $0x60] sm:$0xff] }
 0x22a   :  { %1754 = vmatprep.mubr.f32.mxu0 %v13336_v5  ;;  %3790 = vmatprep.mubr.f32.mxu1 %v13336_v5 }
 0x22d   :  { %1758 = vmatmul.mubr.f32.gmra.mrb[20].mxu0 %v13529_v53  ;;  %3794 = vmatmul.mubr.f32.gmra.mrb[20].mxu1 %v13529_v53  ;;  %v11733_v53 = vld [vmem:[%s13086_s1 + $0x20] sm:$0xff] }
 0x22e   :  { %1763 = vmatprep.mubr.f32.mxu0 %v13336_v5  ;;  %3799 = vmatprep.mubr.f32.mxu1 %v13336_v5 }
 0x231   :  { %1767 = vmatmul.mubr.f32.gmra.mrb[22].mxu0 %v13530_v26  ;;  %3803 = vmatmul.mubr.f32.gmra.mrb[22].mxu1 %v13530_v26 }
 0x232   :  { %1772 = vmatprep.mubr.f32.mxu0 %v13336_v5  ;;  %3808 = vmatprep.mubr.f32.mxu1 %v13336_v5 }
 0x235   :  { %1776 = vmatmul.mubr.f32.gmra.mrb[24].mxu0 %v13531_v48  ;;  %3812 = vmatmul.mubr.f32.gmra.mrb[24].mxu1 %v13531_v48 }
 0x236   :  { %1781 = vmatprep.mubr.f32.mxu0 %v13336_v5  ;;  %3817 = vmatprep.mubr.f32.mxu1 %v13336_v5 }
 0x239   :  { %1785 = vmatmul.mubr.f32.gmra.mrb[26].mxu0 %v13532_v34  ;;  %3821 = vmatmul.mubr.f32.gmra.mrb[26].mxu1 %v13532_v34 }
 0x23a   :  { %1790 = vmatprep.mubr.f32.mxu0 %v13336_v5  ;;  %3826 = vmatprep.mubr.f32.mxu1 %v13336_v5 }
 0x23d   :  { %1794 = vmatmul.mubr.f32.gmra.mrb[28].mxu0 %v13533_v42  ;;  %3830 = vmatmul.mubr.f32.gmra.mrb[28].mxu1 %v13533_v42  ;;  %v13536_v42 = vld [vmem:[#allocation58_spill] sm:$0xff] }
 0x23e   :  { %1799 = vmatprep.mubr.f32.mxu0 %v13336_v5  ;;  %3835 = vmatprep.mubr.f32.mxu1 %v13336_v5 }
 0x241   :  { %1803 = vmatmul.mubr.f32.gmra.mrb[30].mxu0 %v13534_v46  ;;  %3839 = vmatmul.mubr.f32.gmra.mrb[30].mxu1 %v13534_v46  ;;  %v13537_v46 = vld [vmem:[#allocation61_spill] sm:$0xff] }
 0x242   :  { %1808 = vmatprep.mubr.f32.mxu0 %v13336_v5  ;;  %3844 = vmatprep.mubr.f32.mxu1 %v13336_v5 }
 0x245   :  { %1812 = vmatmul.mubr.f32.gmra.mrb[32].mxu0 %v13535_v13  ;;  %3848 = vmatmul.mubr.f32.gmra.mrb[32].mxu1 %v13535_v13  ;;  %v13538_v13 = vld [vmem:[#allocation64_spill] sm:$0xff] }
 0x246   :  { %1817 = vmatprep.mubr.f32.mxu0 %v13336_v5  ;;  %3853 = vmatprep.mubr.f32.mxu1 %v13336_v5 }
 0x249   :  { %1821 = vmatmul.mubr.f32.gmra.mrb[34].mxu0 %v13536_v42  ;;  %3857 = vmatmul.mubr.f32.gmra.mrb[34].mxu1 %v13536_v42  ;;  %v13539_v42 = vld [vmem:[#allocation67_spill] sm:$0xff] }
 0x24a   :  { %1826 = vmatprep.mubr.f32.mxu0 %v13336_v5  ;;  %3862 = vmatprep.mubr.f32.mxu1 %v13336_v5 }
 0x24d   :  { %1830 = vmatmul.mubr.f32.gmra.mrb[36].mxu0 %v13537_v46  ;;  %3866 = vmatmul.mubr.f32.gmra.mrb[36].mxu1 %v13537_v46  ;;  %v13540_v46 = vld [vmem:[#allocation70_spill] sm:$0xff] }
 0x24e   :  { %1835 = vmatprep.mubr.f32.mxu0 %v13336_v5  ;;  %3871 = vmatprep.mubr.f32.mxu1 %v13336_v5 }
 0x251   :  { %1839 = vmatmul.mubr.f32.gmra.mrb[38].mxu0 %v13538_v13  ;;  %3875 = vmatmul.mubr.f32.gmra.mrb[38].mxu1 %v13538_v13  ;;  %v13541_v13 = vld [vmem:[#allocation73_spill] sm:$0xff] }
 0x252   :  { %1844 = vmatprep.mubr.f32.mxu0 %v13336_v5  ;;  %3880 = vmatprep.mubr.f32.mxu1 %v13336_v5 }
 0x255   :  { %1848 = vmatmul.mubr.f32.gmra.mrb[40].mxu0 %v13539_v42  ;;  %3884 = vmatmul.mubr.f32.gmra.mrb[40].mxu1 %v13539_v42  ;;  %v13542_v42 = vld [vmem:[#allocation76_spill] sm:$0xff] }
 0x256   :  { %1853 = vmatprep.mubr.f32.mxu0 %v13336_v5  ;;  %3889 = vmatprep.mubr.f32.mxu1 %v13336_v5 }
 0x259   :  { %1857 = vmatmul.mubr.f32.gmra.mrb[42].mxu0 %v13540_v46  ;;  %3893 = vmatmul.mubr.f32.gmra.mrb[42].mxu1 %v13540_v46  ;;  %v13543_v46 = vld [vmem:[#allocation79_spill] sm:$0xff] }
 0x25a   :  { %1862 = vmatprep.mubr.f32.mxu0 %v13336_v5  ;;  %3898 = vmatprep.mubr.f32.mxu1 %v13336_v5 }
 0x25d   :  { %1866 = vmatmul.mubr.f32.gmra.mrb[44].mxu0 %v13541_v13  ;;  %3902 = vmatmul.mubr.f32.gmra.mrb[44].mxu1 %v13541_v13  ;;  %v13544_v13 = vld [vmem:[#allocation82_spill] sm:$0xff] }
 0x25e   :  { %1871 = vmatprep.mubr.f32.mxu0 %v13336_v5  ;;  %3907 = vmatprep.mubr.f32.mxu1 %v13336_v5 }
 0x261   :  { %1875 = vmatmul.mubr.f32.gmra.mrb[46].mxu0 %v13542_v42  ;;  %3911 = vmatmul.mubr.f32.gmra.mrb[46].mxu1 %v13542_v42  ;;  %v13545_v42 = vld [vmem:[#allocation85_spill] sm:$0xff] }
 0x262   :  { %1880 = vmatprep.mubr.f32.mxu0 %v13336_v5  ;;  %3916 = vmatprep.mubr.f32.mxu1 %v13336_v5 }
 0x265   :  { %1884 = vmatmul.mubr.f32.gmra.mrb[48].mxu0 %v13543_v46  ;;  %3920 = vmatmul.mubr.f32.gmra.mrb[48].mxu1 %v13543_v46  ;;  %v13546_v46 = vld [vmem:[#allocation88_spill] sm:$0xff] }
 0x266   :  { %1889 = vmatprep.mubr.f32.mxu0 %v13336_v5  ;;  %3925 = vmatprep.mubr.f32.mxu1 %v13336_v5 }
 0x269   :  { %1893 = vmatmul.mubr.f32.gmra.mrb[50].mxu0 %v13544_v13  ;;  %3929 = vmatmul.mubr.f32.gmra.mrb[50].mxu1 %v13544_v13  ;;  %v13547_v13 = vld [vmem:[#allocation91_spill] sm:$0xff] }
 0x26a   :  { %1898 = vmatprep.mubr.f32.mxu0 %v13336_v5  ;;  %3934 = vmatprep.mubr.f32.mxu1 %v13336_v5 }
 0x26d   :  { %1902 = vmatmul.mubr.f32.gmra.mrb[52].mxu0 %v13545_v42  ;;  %3938 = vmatmul.mubr.f32.gmra.mrb[52].mxu1 %v13545_v42 }
 0x26e   :  { %1907 = vmatprep.mubr.f32.mxu0 %v13336_v5  ;;  %3943 = vmatprep.mubr.f32.mxu1 %v13336_v5 }
 0x271   :  { %1911 = vmatmul.mubr.f32.gmra.mrb[54].mxu0 %v13546_v46  ;;  %3947 = vmatmul.mubr.f32.gmra.mrb[54].mxu1 %v13546_v46 }
 0x272   :  { %1916 = vmatprep.mubr.f32.mxu0 %v13336_v5  ;;  %3952 = vmatprep.mubr.f32.mxu1 %v13336_v5 }
 0x275   :  { %1920 = vmatmul.mubr.f32.gmra.mrb[56].mxu0 %v13547_v13  ;;  %3956 = vmatmul.mubr.f32.gmra.mrb[56].mxu1 %v13547_v13  ;;  %v405_v13 = vld [vmem:[%s13086_s1 + $0x38] sm:$0xff] }
 0x276   :  { %1925 = vmatprep.mubr.f32.mxu0 %v13336_v5  ;;  %3961 = vmatprep.mubr.f32.mxu1 %v13336_v5  ;;  %v6627_v34 = vand.u32 4294901760, %v405_v13 }
 0x278   :  { %v11742_v61 = vsub.f32 %v405_v13, %v6627_v34 }
 0x279   :  { %1929 = vmatmul.mubr.f32.gmra.mrb[58].mxu0 %v11233_v38  ;;  %3965 = vmatmul.mubr.f32.gmra.mrb[58].mxu1 %v11233_v38  ;;  %v403_v38 = vld [vmem:[%s13086_s1 + $0x28] sm:$0xff] }
 0x27a   :  { %1934 = vmatprep.mubr.f32.mxu0 %v13336_v5  ;;  %3970 = vmatprep.mubr.f32.mxu1 %v13336_v5  ;;  %v4591_v46 = vand.u32 4294901760, %v403_v38 }
 0x27c   :  { %v11726_v48 = vsub.f32 %v403_v38, %v4591_v46 }
 0x27d   :  { %1938 = vmatmul.mubr.f32.gmra.mrb[60].mxu0 %v11252_v52  ;;  %3974 = vmatmul.mubr.f32.gmra.mrb[60].mxu1 %v11252_v52  ;;  %v411_v52 = vld [vmem:[%s13086_s1 + $0x68] sm:$0xff] }
 0x27e   :  { %1943 = vmatprep.mubr.f32.mxu0 %v13336_v5  ;;  %3979 = vmatprep.mubr.f32.mxu1 %v13336_v5  ;;  %v4595_v42 = vand.u32 4294901760, %v411_v52  ;;  %v13354_v45 = vand.u32 4294901760, %v11726_v48 }
 0x280   :  { %v11728_v26 = vsub.f32 %v411_v52, %v4595_v42  ;;  %v4593_v52 = vand.u32 4294901760, %v11733_v53 }
 0x281   :  { %1947 = vmatmul.mubr.f32.gmra.mrb[62].mxu0 %v11266_v7  ;;  %3983 = vmatmul.mubr.f32.gmra.mrb[62].mxu1 %v11266_v7  ;;  %v413_v7 = vld [vmem:[%s13086_s1 + $0x78] sm:$0xff] }
 0x282   :  { %2035 = vmatprep.mubr.f32.mxu0 %v13336_v5  ;;  %4071 = vmatprep.mubr.f32.mxu1 %v13336_v5  ;;  %v6631_v5 = vand.u32 4294901760, %v413_v7  ;;  %v11769_v13 = vsub.f32 %v11733_v53, %v4593_v52  ;;  %v13357_v4 = vand.u32 4294901760, %v11728_v26  ;;  %v13358_v53 = vand.u32 4294901760, %v11742_v61 }
 0x284   :  { %v11744_v38 = vsub.f32 %v413_v7, %v6631_v5  ;;  %v11764_v7 = vpack.c.bf16 %v6631_v5, %v6627_v34  ;;  %v11785_v5 = vsub.f32 %v11750_v57, %v6629_v39  ;;  %v11920_v34 = vld [vmem:[%s13086_s1 + $0xb8] sm:$0xff]  ;;  %v11956_v39 = vld [vmem:[%s13086_s1 + $0xb0] sm:$0xff] }
 0x285   :  { %2037 = vmatmul.mubr.f32.vlgmr.msra.gmra.mrb[0].mxu0 %v10660_v56  ;;  %4073 = vmatmul.mubr.f32.vlgmr.msra.gmra.mrb[0].mxu1 %v10660_v56  ;;  %v11946_v57 = vand.u32 4294901760, %v11920_v34 }
 0x286   :  { %8958 = vmatpush1.bf16.msra.mxu0 %v10450_v41  ;;  %8982 = vmatpush1.bf16.msra.mxu1 %v10460_v44  ;;  %v11759_v41 = vpack.c.bf16 %v4595_v42, %v4591_v46  ;;  %v4597_v44 = vand.u32 4294901760, %v11738_v63  ;;  %v13550_v42 = vld [vmem:[#allocation98_spill] sm:$0xff]  ;;  %v13553_v12 = vand.u32 4294901760, %v11744_v38 }
 0x287   :  { %2042 = vmatprep.mubr.f32.mxu0 %v13548_v22  ;;  %4078 = vmatprep.mubr.f32.mxu1 %v13548_v22  ;;  %13552 = vst [vmem:[#allocation6_spill] sm:$0xff] %v11946_v57 }
 0x288   :  { %2269 = vmatprep.subr.mxu0 %v10438_v37  ;;  %4305 = vmatprep.subr.mxu1 %v10467_v47  ;;  %v11778_v37 = vsub.f32 %v11738_v63, %v4597_v44  ;;  %v11790_v47 = vsub.f32 %v11755_v29, %v6633_v32  ;;  %v11928_v46 = vpack.c.bf16 %v4597_v44, %v4593_v52  ;;  %v11951_v32 = vld [vmem:[%s13086_s1 + $0xa0] sm:$0xff] }
 0x289   :  { %2044 = vmatmul.mubr.f32.gmra.mrb[2].mxu0 %v10658_v55  ;;  %4080 = vmatmul.mubr.f32.gmra.mrb[2].mxu1 %v10658_v55  ;;  %v5017_v29 = vsub.f32 %v11726_v48, %v13354_v45  ;;  %v5029_v44 = vsub.f32 %v11728_v26, %v13357_v4  ;;  %v7053_v63 = vsub.f32 %v11742_v61, %v13358_v53  ;;  %v11977_v53 = vand.u32 4294901760, %v11951_v32 }
 0x28a   :  { %2049 = vmatprep.mubr.f32.mxu0 %v13548_v22  ;;  %4085 = vmatprep.mubr.f32.mxu1 %v13548_v22  ;;  %v7065_v0 = vsub.f32 %v11744_v38, %v13553_v12  ;;  %v11980_v12 = vand.u32 4294901760, %v11956_v39 }
 0x28b   :  { %2271 = vmatpush1.msra.mxu0 %v13482_v49  ;;  %4307 = vmatpush1.msra.mxu1 %v13483_v54  ;;  %v13549_v54 = vld [vmem:[#allocation94_spill] sm:$0xff]  ;;  %v5018_v45 = vand.u32 4294901760, %v5017_v29  ;;  %v5030_v31 = vand.u32 4294901760, %v5029_v44  ;;  %v7054_v30 = vand.u32 4294901760, %v7053_v63  ;;  %v12128_v29 = vsub.f32 %v11951_v32, %v11977_v53 }
 0x28c   :  { %8984 = vmatprep.subr.bf16.mxu0 %v11759_v41  ;;  %9008 = vmatprep.subr.bf16.mxu1 %v11764_v7  ;;  %v11915_v49 = vld [vmem:[%s13086_s1 + $0xa8] sm:$0xff]  ;;  %v7066_v4 = vand.u32 4294901760, %v7065_v0  ;;  %13554 = vst [vmem:[#allocation94_spill] sm:$0xff] %v11977_v53  ;;  %13555 = vst [vmem:[#allocation98_spill] sm:$0xff] %v11980_v12  ;;  %v12132_v44 = vsub.f32 %v11956_v39, %v11980_v12  ;;  %s10343_s1 = smov [#allocation2]  }
 0x28d   :  { %2051 = vmatmul.mubr.f32.gmra.mrb[4].mxu0 %v10687_v11  ;;  %4087 = vmatmul.mubr.f32.gmra.mrb[4].mxu1 %v10687_v11  ;;  %v11943_v52 = vand.u32 4294901760, %v11915_v49  ;;  %v8987_v24 = vpack.c.bf16 %v5030_v31, %v5018_v45  ;;  %v13363_v31 = vand.u32 4294901760, %v11790_v47  ;;  %v13376_v19 = vand.u32 4294901760, %v12128_v29  ;;  %s8924_s17 = sshll.u32 %s10343_s1, 4  ;;  %s8925_s17 = int_to_ptr.vmem [resolvable:$true] %s8924_s17 }
 0x28e   :  { %2056 = vmatprep.mubr.f32.mxu0 %v13548_v22  ;;  %4092 = vmatprep.mubr.f32.mxu1 %v13548_v22  ;;  %v9011_v23 = vpack.c.bf16 %v7066_v4, %v7054_v30  ;;  %v13364_v30 = vand.u32 4294901760, %v11785_v5  ;;  %v12108_v4 = vsub.f32 %v11920_v34, %v11946_v57  ;;  %v13375_v39 = vand.u32 4294901760, %v12132_v44  ;;  %s10316_s18 = scalar_lea.vmem %s8925_s17, 4096  ;;  %p10321_p1 = scmp.lt.s32.totalorder %s8925_s17, %s8925_s17 }
 0x28f   :  { %13551 = vst [vmem:[#allocation5_spill] sm:$0xff] %v11943_v52  ;;  %v12104_v0 = vsub.f32 %v11915_v49, %v11943_v52  ;;  %v7071_v63 = vsub.f32 %v11790_v47, %v13363_v31  ;;  %p10317_p0 = scmp.ne.s32.totalorder %s8925_s17, %s10316_s18  ;;  %p10322_p2 = scmp.lt.s32.totalorder %s10316_s18, %s10316_s18 }
 0x290   :  { %v7059_v34 = vsub.f32 %v11785_v5, %v13364_v30 }
 0x291   :  { %2058 = vmatmul.mubr.f32.gmra.mrb[6].mxu0 %v10713_v58  ;;  %4094 = vmatmul.mubr.f32.gmra.mrb[6].mxu1 %v10713_v58  ;;  %p10323_p3 = por %p10322_p2, %p10321_p1 }
 0x292   :  { %2063 = vmatprep.mubr.f32.mxu0 %v13548_v22  ;;  %4099 = vmatprep.mubr.f32.mxu1 %v13548_v22  ;;  %v7060_v32 = vand.u32 4294901760, %v7059_v34  ;;  %v5047_v34 = vsub.f32 %v12128_v29, %v13376_v19 }
 0x293   :  { %p10324_p4 = pnand %p10323_p3, %p10317_p0 }
 0x295   :  { %2065 = vmatmul.mubr.f32.gmra.mrb[8].mxu0 %v10732_v21  ;;  %4101 = vmatmul.mubr.f32.gmra.mrb[8].mxu1 %v10732_v21 }
 0x296   :  { %2070 = vmatprep.mubr.f32.mxu0 %v13548_v22  ;;  %4106 = vmatprep.mubr.f32.mxu1 %v13548_v22 }
 0x299   :  { %2072 = vmatmul.mubr.f32.gmra.mrb[10].mxu0 %v10755_v43  ;;  %4108 = vmatmul.mubr.f32.gmra.mrb[10].mxu1 %v10755_v43 }
 0x29a   :  { %2077 = vmatprep.mubr.f32.mxu0 %v13548_v22  ;;  %4113 = vmatprep.mubr.f32.mxu1 %v13548_v22 }
 0x29d   :  { %2079 = vmatmul.mubr.f32.gmra.mrb[12].mxu0 %v10774_v40  ;;  %4115 = vmatmul.mubr.f32.gmra.mrb[12].mxu1 %v10774_v40 }
 0x29e   :  { %2084 = vmatprep.mubr.f32.mxu0 %v13548_v22  ;;  %4120 = vmatprep.mubr.f32.mxu1 %v13548_v22 }
 0x2a1   :  { %2086 = vmatmul.mubr.f32.gmra.mrb[14].mxu0 %v10793_v6  ;;  %4122 = vmatmul.mubr.f32.gmra.mrb[14].mxu1 %v10793_v6 }
 0x2a2   :  { %2091 = vmatprep.mubr.f32.mxu0 %v13548_v22  ;;  %4127 = vmatprep.mubr.f32.mxu1 %v13548_v22 }
 0x2a5   :  { %2093 = vmatmul.mubr.f32.gmra.mrb[16].mxu0 %v10812_v17  ;;  %4129 = vmatmul.mubr.f32.gmra.mrb[16].mxu1 %v10812_v17 }
 0x2a6   :  { %2098 = vmatprep.mubr.f32.mxu0 %v13548_v22  ;;  %4134 = vmatprep.mubr.f32.mxu1 %v13548_v22 }
 0x2a9   :  { %2100 = vmatmul.mubr.f32.gmra.mrb[18].mxu0 %v10831_v51  ;;  %4136 = vmatmul.mubr.f32.gmra.mrb[18].mxu1 %v10831_v51 }
 0x2aa   :  { %2105 = vmatprep.mubr.f32.mxu0 %v13548_v22  ;;  %4141 = vmatprep.mubr.f32.mxu1 %v13548_v22 }
 0x2ad   :  { %2107 = vmatmul.mubr.f32.gmra.mrb[20].mxu0 %v10850_v10  ;;  %4143 = vmatmul.mubr.f32.gmra.mrb[20].mxu1 %v10850_v10 }
 0x2ae   :  { %2112 = vmatprep.mubr.f32.mxu0 %v13548_v22  ;;  %4148 = vmatprep.mubr.f32.mxu1 %v13548_v22 }
 0x2b1   :  { %2114 = vmatmul.mubr.f32.gmra.mrb[22].mxu0 %v10869_v16  ;;  %4150 = vmatmul.mubr.f32.gmra.mrb[22].mxu1 %v10869_v16 }
 0x2b2   :  { %2119 = vmatprep.mubr.f32.mxu0 %v13548_v22  ;;  %4155 = vmatprep.mubr.f32.mxu1 %v13548_v22 }
 0x2b5   :  { %2121 = vmatmul.mubr.f32.gmra.mrb[24].mxu0 %v10888_v3  ;;  %4157 = vmatmul.mubr.f32.gmra.mrb[24].mxu1 %v10888_v3 }
 0x2b6   :  { %2126 = vmatprep.mubr.f32.mxu0 %v13548_v22  ;;  %4162 = vmatprep.mubr.f32.mxu1 %v13548_v22 }
 0x2b9   :  { %2128 = vmatmul.mubr.f32.gmra.mrb[26].mxu0 %v10907_v20  ;;  %4164 = vmatmul.mubr.f32.gmra.mrb[26].mxu1 %v10907_v20 }
 0x2ba   :  { %2133 = vmatprep.mubr.f32.mxu0 %v13548_v22  ;;  %4169 = vmatprep.mubr.f32.mxu1 %v13548_v22 }
 0x2bd   :  { %2135 = vmatmul.mubr.f32.gmra.mrb[28].mxu0 %v10926_v35  ;;  %4171 = vmatmul.mubr.f32.gmra.mrb[28].mxu1 %v10926_v35 }
 0x2be   :  { %2140 = vmatprep.mubr.f32.mxu0 %v13548_v22  ;;  %4176 = vmatprep.mubr.f32.mxu1 %v13548_v22 }
 0x2c1   :  { %2142 = vmatmul.mubr.f32.gmra.mrb[30].mxu0 %v10945_v1  ;;  %4178 = vmatmul.mubr.f32.gmra.mrb[30].mxu1 %v10945_v1 }
 0x2c2   :  { %2147 = vmatprep.mubr.f32.mxu0 %v13548_v22  ;;  %4183 = vmatprep.mubr.f32.mxu1 %v13548_v22 }
 0x2c5   :  { %2149 = vmatmul.mubr.f32.gmra.mrb[32].mxu0 %v10964_v8  ;;  %4185 = vmatmul.mubr.f32.gmra.mrb[32].mxu1 %v10964_v8 }
 0x2c6   :  { %2154 = vmatprep.mubr.f32.mxu0 %v13548_v22  ;;  %4190 = vmatprep.mubr.f32.mxu1 %v13548_v22 }
 0x2c9   :  { %2156 = vmatmul.mubr.f32.gmra.mrb[34].mxu0 %v10983_v2  ;;  %4192 = vmatmul.mubr.f32.gmra.mrb[34].mxu1 %v10983_v2 }
 0x2ca   :  { %2161 = vmatprep.mubr.f32.mxu0 %v13548_v22  ;;  %4197 = vmatprep.mubr.f32.mxu1 %v13548_v22 }
 0x2cd   :  { %2163 = vmatmul.mubr.f32.gmra.mrb[36].mxu0 %v11002_v36  ;;  %4199 = vmatmul.mubr.f32.gmra.mrb[36].mxu1 %v11002_v36 }
 0x2ce   :  { %2168 = vmatprep.mubr.f32.mxu0 %v13548_v22  ;;  %4204 = vmatprep.mubr.f32.mxu1 %v13548_v22 }
 0x2d1   :  { %2170 = vmatmul.mubr.f32.gmra.mrb[38].mxu0 %v11021_v59  ;;  %4206 = vmatmul.mubr.f32.gmra.mrb[38].mxu1 %v11021_v59 }
 0x2d2   :  { %2175 = vmatprep.mubr.f32.mxu0 %v13548_v22  ;;  %4211 = vmatprep.mubr.f32.mxu1 %v13548_v22 }
 0x2d5   :  { %2177 = vmatmul.mubr.f32.gmra.mrb[40].mxu0 %v11040_v62  ;;  %4213 = vmatmul.mubr.f32.gmra.mrb[40].mxu1 %v11040_v62 }
 0x2d6   :  { %2182 = vmatprep.mubr.f32.mxu0 %v13548_v22  ;;  %4218 = vmatprep.mubr.f32.mxu1 %v13548_v22 }
 0x2d9   :  { %2184 = vmatmul.mubr.f32.gmra.mrb[42].mxu0 %v11059_v14  ;;  %4220 = vmatmul.mubr.f32.gmra.mrb[42].mxu1 %v11059_v14 }
 0x2da   :  { %2189 = vmatprep.mubr.f32.mxu0 %v13548_v22  ;;  %4225 = vmatprep.mubr.f32.mxu1 %v13548_v22 }
 0x2dd   :  { %2191 = vmatmul.mubr.f32.gmra.mrb[44].mxu0 %v11078_v50  ;;  %4227 = vmatmul.mubr.f32.gmra.mrb[44].mxu1 %v11078_v50 }
 0x2de   :  { %2196 = vmatprep.mubr.f32.mxu0 %v13548_v22  ;;  %4232 = vmatprep.mubr.f32.mxu1 %v13548_v22 }
 0x2e1   :  { %2198 = vmatmul.mubr.f32.gmra.mrb[46].mxu0 %v11097_v33  ;;  %4234 = vmatmul.mubr.f32.gmra.mrb[46].mxu1 %v11097_v33 }
 0x2e2   :  { %2203 = vmatprep.mubr.f32.mxu0 %v13548_v22  ;;  %4239 = vmatprep.mubr.f32.mxu1 %v13548_v22 }
 0x2e5   :  { %2205 = vmatmul.mubr.f32.gmra.mrb[48].mxu0 %v11116_v28  ;;  %4241 = vmatmul.mubr.f32.gmra.mrb[48].mxu1 %v11116_v28 }
 0x2e6   :  { %2210 = vmatprep.mubr.f32.mxu0 %v13548_v22  ;;  %4246 = vmatprep.mubr.f32.mxu1 %v13548_v22 }
 0x2e9   :  { %2212 = vmatmul.mubr.f32.gmra.mrb[50].mxu0 %v11135_v15  ;;  %4248 = vmatmul.mubr.f32.gmra.mrb[50].mxu1 %v11135_v15 }
 0x2ea   :  { %2217 = vmatprep.mubr.f32.mxu0 %v13548_v22  ;;  %4253 = vmatprep.mubr.f32.mxu1 %v13548_v22 }
 0x2ed   :  { %2219 = vmatmul.mubr.f32.gmra.mrb[52].mxu0 %v11154_v60  ;;  %4255 = vmatmul.mubr.f32.gmra.mrb[52].mxu1 %v11154_v60 }
 0x2ee   :  { %2224 = vmatprep.mubr.f32.mxu0 %v13548_v22  ;;  %4260 = vmatprep.mubr.f32.mxu1 %v13548_v22 }
 0x2f1   :  { %2226 = vmatmul.mubr.f32.gmra.mrb[54].mxu0 %v11173_v25  ;;  %4262 = vmatmul.mubr.f32.gmra.mrb[54].mxu1 %v11173_v25 }
 0x2f2   :  { %2231 = vmatprep.mubr.f32.mxu0 %v13548_v22  ;;  %4267 = vmatprep.mubr.f32.mxu1 %v13548_v22 }
 0x2f5   :  { %2233 = vmatmul.mubr.f32.gmra.mrb[56].mxu0 %v11192_v9  ;;  %4269 = vmatmul.mubr.f32.gmra.mrb[56].mxu1 %v11192_v9 }
 0x2f6   :  { %2238 = vmatprep.mubr.f32.mxu0 %v13548_v22  ;;  %4274 = vmatprep.mubr.f32.mxu1 %v13548_v22 }
 0x2f9   :  { %2240 = vmatmul.mubr.f32.gmra.mrb[58].mxu0 %v11211_v18  ;;  %4276 = vmatmul.mubr.f32.gmra.mrb[58].mxu1 %v11211_v18 }
 0x2fa   :  { %2245 = vmatprep.mubr.f32.mxu0 %v13548_v22  ;;  %4281 = vmatprep.mubr.f32.mxu1 %v13548_v22 }
 0x2fd   :  { %2247 = vmatmul.mubr.f32.gmra.mrb[60].mxu0 %v13549_v54  ;;  %4283 = vmatmul.mubr.f32.gmra.mrb[60].mxu1 %v13549_v54 }
 0x2fe   :  { %2252 = vmatprep.mubr.f32.mxu0 %v13548_v22  ;;  %4288 = vmatprep.mubr.f32.mxu1 %v13548_v22 }
 0x301   :  { %2254 = vmatmul.mubr.f32.gmra.mrb[62].mxu0 %v13550_v42  ;;  %4290 = vmatmul.mubr.f32.gmra.mrb[62].mxu1 %v13550_v42 }
 0x302   :  { %2330 = vmatprep.mubr.f32.mxu0 %v13548_v22  ;;  %4366 = vmatprep.mubr.f32.mxu1 %v13548_v22 }
 0x305   :  { %2332 = vmatmul.mubr.f32.vlgmr.msra.gmra.mrb[0].mxu0 %v10660_v56  ;;  %4368 = vmatmul.mubr.f32.vlgmr.msra.gmra.mrb[0].mxu1 %v10660_v56 }
 0x306   :  { %8986 = vmatpush1.bf16.msra.mxu0 %v11928_v46  ;;  %9010 = vmatpush1.bf16.msra.mxu1 %v11934_v27 }
 0x307   :  { %2337 = vmatprep.mubr.f32.mxu0 %v13548_v22  ;;  %4373 = vmatprep.mubr.f32.mxu1 %v13548_v22 }
 0x308   :  { %4600 = vmatprep.subr.mxu0 %v11943_v52  ;;  %6636 = vmatprep.subr.mxu1 %v11946_v57  ;;  %v13557_v52 = vld [vmem:[#allocation12_spill] sm:$0xff] }
 0x309   :  { %2339 = vmatmul.mubr.f32.gmra.mrb[2].mxu0 %v10658_v55  ;;  %4375 = vmatmul.mubr.f32.gmra.mrb[2].mxu1 %v10658_v55 }
 0x30a   :  { %2344 = vmatprep.mubr.f32.mxu0 %v13548_v22  ;;  %4380 = vmatprep.mubr.f32.mxu1 %v13548_v22 }
 0x30b   :  { %4602 = vmatpush1.msra.mxu0 %v11977_v53  ;;  %6638 = vmatpush1.msra.mxu1 %v11980_v12  ;;  %v7072_v53 = vand.u32 4294901760, %v7071_v63  ;;  %v13556_v12 = vand.u32 4294901760, %v12108_v4  ;;  %v7083_v63 = vsub.f32 %v12132_v44, %v13375_v39 }
 0x30c   :  { %8988 = vmatprep.subr.bf16.mxu0 %v8987_v24  ;;  %9012 = vmatprep.subr.bf16.mxu1 %v9011_v23  ;;  %v13361_v23 = vand.u32 4294901760, %v11769_v13  ;;  %v13362_v24 = vand.u32 4294901760, %v11778_v37 }
 0x30d   :  { %2346 = vmatmul.mubr.f32.gmra.mrb[4].mxu0 %v10687_v11  ;;  %4382 = vmatmul.mubr.f32.gmra.mrb[4].mxu1 %v10687_v11  ;;  %v7077_v57 = vsub.f32 %v12108_v4, %v13556_v12 }
 0x30e   :  { %2351 = vmatprep.mubr.f32.mxu0 %v13548_v22  ;;  %4387 = vmatprep.mubr.f32.mxu1 %v13548_v22  ;;  %v5023_v45 = vsub.f32 %v11769_v13, %v13361_v23  ;;  %v5035_v49 = vsub.f32 %v11778_v37, %v13362_v24  ;;  %v13372_v23 = vand.u32 4294901760, %v12104_v0 }
 0x30f   :  { %v7078_v12 = vand.u32 4294901760, %v7077_v57  ;;  %v9015_v57 = vpack.c.bf16 %v11744_v38, %v11742_v61 }
 0x310   :  { %v5024_v31 = vand.u32 4294901760, %v5023_v45  ;;  %v5036_v30 = vand.u32 4294901760, %v5035_v49  ;;  %v5041_v24 = vsub.f32 %v12104_v0, %v13372_v23  ;;  %v9013_v49 = vpack.c.bf16 %v7072_v53, %v7060_v32  ;;  %v13561_v32 = vld [vmem:[#allocation24_spill] sm:$0xff] }
 0x311   :  { %2353 = vmatmul.mubr.f32.gmra.mrb[6].mxu0 %v10713_v58  ;;  %4389 = vmatmul.mubr.f32.gmra.mrb[6].mxu1 %v10713_v58  ;;  %v5048_v53 = vand.u32 4294901760, %v5047_v34  ;;  %v13564_v34 = vld [vmem:[#allocation33_spill] sm:$0xff] }
 0x312   :  { %2358 = vmatprep.mubr.f32.mxu0 %v13548_v22  ;;  %4394 = vmatprep.mubr.f32.mxu1 %v13548_v22  ;;  %v8989_v45 = vpack.c.bf16 %v5036_v30, %v5024_v31  ;;  %v5042_v23 = vand.u32 4294901760, %v5041_v24  ;;  %v7084_v30 = vand.u32 4294901760, %v7083_v63  ;;  %v8991_v31 = vpack.c.bf16 %v11728_v26, %v11726_v48  ;;  %v13558_v24 = vld [vmem:[#allocation15_spill] sm:$0xff]  ;;  %v13565_v63 = vld [vmem:[#allocation36_spill] sm:$0xff] }
 0x315   :  { %2360 = vmatmul.mubr.f32.gmra.mrb[8].mxu0 %v10732_v21  ;;  %4396 = vmatmul.mubr.f32.gmra.mrb[8].mxu1 %v10732_v21 }
 0x316   :  { %2365 = vmatprep.mubr.f32.mxu0 %v13548_v22  ;;  %4401 = vmatprep.mubr.f32.mxu1 %v13548_v22 }
 0x319   :  { %2367 = vmatmul.mubr.f32.gmra.mrb[10].mxu0 %v10755_v43  ;;  %4403 = vmatmul.mubr.f32.gmra.mrb[10].mxu1 %v10755_v43 }
 0x31a   :  { %2372 = vmatprep.mubr.f32.mxu0 %v13548_v22  ;;  %4408 = vmatprep.mubr.f32.mxu1 %v13548_v22 }
 0x31d   :  { %2374 = vmatmul.mubr.f32.gmra.mrb[12].mxu0 %v10774_v40  ;;  %4410 = vmatmul.mubr.f32.gmra.mrb[12].mxu1 %v10774_v40 }
 0x31e   :  { %2379 = vmatprep.mubr.f32.mxu0 %v13548_v22  ;;  %4415 = vmatprep.mubr.f32.mxu1 %v13548_v22 }
 0x321   :  { %2381 = vmatmul.mubr.f32.gmra.mrb[14].mxu0 %v10793_v6  ;;  %4417 = vmatmul.mubr.f32.gmra.mrb[14].mxu1 %v10793_v6 }
 0x322   :  { %2386 = vmatprep.mubr.f32.mxu0 %v13548_v22  ;;  %4422 = vmatprep.mubr.f32.mxu1 %v13548_v22 }
 0x325   :  { %2388 = vmatmul.mubr.f32.gmra.mrb[16].mxu0 %v10812_v17  ;;  %4424 = vmatmul.mubr.f32.gmra.mrb[16].mxu1 %v10812_v17 }
 0x326   :  { %2393 = vmatprep.mubr.f32.mxu0 %v13548_v22  ;;  %4429 = vmatprep.mubr.f32.mxu1 %v13548_v22 }
 0x329   :  { %2395 = vmatmul.mubr.f32.gmra.mrb[18].mxu0 %v10831_v51  ;;  %4431 = vmatmul.mubr.f32.gmra.mrb[18].mxu1 %v10831_v51 }
 0x32a   :  { %2400 = vmatprep.mubr.f32.mxu0 %v13548_v22  ;;  %4436 = vmatprep.mubr.f32.mxu1 %v13548_v22 }
 0x32d   :  { %2402 = vmatmul.mubr.f32.gmra.mrb[20].mxu0 %v10850_v10  ;;  %4438 = vmatmul.mubr.f32.gmra.mrb[20].mxu1 %v10850_v10 }
 0x32e   :  { %2407 = vmatprep.mubr.f32.mxu0 %v13548_v22  ;;  %4443 = vmatprep.mubr.f32.mxu1 %v13548_v22 }
 0x331   :  { %2409 = vmatmul.mubr.f32.gmra.mrb[22].mxu0 %v10869_v16  ;;  %4445 = vmatmul.mubr.f32.gmra.mrb[22].mxu1 %v10869_v16 }
 0x332   :  { %2414 = vmatprep.mubr.f32.mxu0 %v13548_v22  ;;  %4450 = vmatprep.mubr.f32.mxu1 %v13548_v22 }
 0x335   :  { %2416 = vmatmul.mubr.f32.gmra.mrb[24].mxu0 %v10888_v3  ;;  %4452 = vmatmul.mubr.f32.gmra.mrb[24].mxu1 %v10888_v3 }
 0x336   :  { %2421 = vmatprep.mubr.f32.mxu0 %v13548_v22  ;;  %4457 = vmatprep.mubr.f32.mxu1 %v13548_v22 }
 0x339   :  { %2423 = vmatmul.mubr.f32.gmra.mrb[26].mxu0 %v10907_v20  ;;  %4459 = vmatmul.mubr.f32.gmra.mrb[26].mxu1 %v10907_v20 }
 0x33a   :  { %2428 = vmatprep.mubr.f32.mxu0 %v13548_v22  ;;  %4464 = vmatprep.mubr.f32.mxu1 %v13548_v22 }
 0x33d   :  { %2430 = vmatmul.mubr.f32.gmra.mrb[28].mxu0 %v10926_v35  ;;  %4466 = vmatmul.mubr.f32.gmra.mrb[28].mxu1 %v10926_v35 }
 0x33e   :  { %2435 = vmatprep.mubr.f32.mxu0 %v13548_v22  ;;  %4471 = vmatprep.mubr.f32.mxu1 %v13548_v22 }
 0x341   :  { %2437 = vmatmul.mubr.f32.gmra.mrb[30].mxu0 %v10945_v1  ;;  %4473 = vmatmul.mubr.f32.gmra.mrb[30].mxu1 %v10945_v1 }
 0x342   :  { %2442 = vmatprep.mubr.f32.mxu0 %v13548_v22  ;;  %4478 = vmatprep.mubr.f32.mxu1 %v13548_v22 }
 0x345   :  { %2444 = vmatmul.mubr.f32.gmra.mrb[32].mxu0 %v10964_v8  ;;  %4480 = vmatmul.mubr.f32.gmra.mrb[32].mxu1 %v10964_v8 }
 0x346   :  { %2449 = vmatprep.mubr.f32.mxu0 %v13548_v22  ;;  %4485 = vmatprep.mubr.f32.mxu1 %v13548_v22 }
 0x349   :  { %2451 = vmatmul.mubr.f32.gmra.mrb[34].mxu0 %v10983_v2  ;;  %4487 = vmatmul.mubr.f32.gmra.mrb[34].mxu1 %v10983_v2 }
 0x34a   :  { %2456 = vmatprep.mubr.f32.mxu0 %v13548_v22  ;;  %4492 = vmatprep.mubr.f32.mxu1 %v13548_v22 }
 0x34d   :  { %2458 = vmatmul.mubr.f32.gmra.mrb[36].mxu0 %v11002_v36  ;;  %4494 = vmatmul.mubr.f32.gmra.mrb[36].mxu1 %v11002_v36 }
 0x34e   :  { %2463 = vmatprep.mubr.f32.mxu0 %v13548_v22  ;;  %4499 = vmatprep.mubr.f32.mxu1 %v13548_v22 }
 0x351   :  { %2465 = vmatmul.mubr.f32.gmra.mrb[38].mxu0 %v11021_v59  ;;  %4501 = vmatmul.mubr.f32.gmra.mrb[38].mxu1 %v11021_v59 }
 0x352   :  { %2470 = vmatprep.mubr.f32.mxu0 %v13548_v22  ;;  %4506 = vmatprep.mubr.f32.mxu1 %v13548_v22 }
 0x355   :  { %2472 = vmatmul.mubr.f32.gmra.mrb[40].mxu0 %v11040_v62  ;;  %4508 = vmatmul.mubr.f32.gmra.mrb[40].mxu1 %v11040_v62 }
 0x356   :  { %2477 = vmatprep.mubr.f32.mxu0 %v13548_v22  ;;  %4513 = vmatprep.mubr.f32.mxu1 %v13548_v22 }
 0x359   :  { %2479 = vmatmul.mubr.f32.gmra.mrb[42].mxu0 %v11059_v14  ;;  %4515 = vmatmul.mubr.f32.gmra.mrb[42].mxu1 %v11059_v14 }
 0x35a   :  { %2484 = vmatprep.mubr.f32.mxu0 %v13548_v22  ;;  %4520 = vmatprep.mubr.f32.mxu1 %v13548_v22 }
 0x35d   :  { %2486 = vmatmul.mubr.f32.gmra.mrb[44].mxu0 %v11078_v50  ;;  %4522 = vmatmul.mubr.f32.gmra.mrb[44].mxu1 %v11078_v50 }
 0x35e   :  { %2491 = vmatprep.mubr.f32.mxu0 %v13548_v22  ;;  %4527 = vmatprep.mubr.f32.mxu1 %v13548_v22 }
 0x361   :  { %2493 = vmatmul.mubr.f32.gmra.mrb[46].mxu0 %v11097_v33  ;;  %4529 = vmatmul.mubr.f32.gmra.mrb[46].mxu1 %v11097_v33 }
 0x362   :  { %2498 = vmatprep.mubr.f32.mxu0 %v13548_v22  ;;  %4534 = vmatprep.mubr.f32.mxu1 %v13548_v22 }
 0x365   :  { %2500 = vmatmul.mubr.f32.gmra.mrb[48].mxu0 %v11116_v28  ;;  %4536 = vmatmul.mubr.f32.gmra.mrb[48].mxu1 %v11116_v28 }
 0x366   :  { %2505 = vmatprep.mubr.f32.mxu0 %v13548_v22  ;;  %4541 = vmatprep.mubr.f32.mxu1 %v13548_v22 }
 0x369   :  { %2507 = vmatmul.mubr.f32.gmra.mrb[50].mxu0 %v11135_v15  ;;  %4543 = vmatmul.mubr.f32.gmra.mrb[50].mxu1 %v11135_v15 }
 0x36a   :  { %2512 = vmatprep.mubr.f32.mxu0 %v13548_v22  ;;  %4548 = vmatprep.mubr.f32.mxu1 %v13548_v22 }
 0x36d   :  { %2514 = vmatmul.mubr.f32.gmra.mrb[52].mxu0 %v11154_v60  ;;  %4550 = vmatmul.mubr.f32.gmra.mrb[52].mxu1 %v11154_v60 }
 0x36e   :  { %2519 = vmatprep.mubr.f32.mxu0 %v13548_v22  ;;  %4555 = vmatprep.mubr.f32.mxu1 %v13548_v22 }
 0x371   :  { %2521 = vmatmul.mubr.f32.gmra.mrb[54].mxu0 %v11173_v25  ;;  %4557 = vmatmul.mubr.f32.gmra.mrb[54].mxu1 %v11173_v25 }
 0x372   :  { %2526 = vmatprep.mubr.f32.mxu0 %v13548_v22  ;;  %4562 = vmatprep.mubr.f32.mxu1 %v13548_v22 }
 0x375   :  { %2528 = vmatmul.mubr.f32.gmra.mrb[56].mxu0 %v11192_v9  ;;  %4564 = vmatmul.mubr.f32.gmra.mrb[56].mxu1 %v11192_v9 }
 0x376   :  { %2533 = vmatprep.mubr.f32.mxu0 %v13548_v22  ;;  %4569 = vmatprep.mubr.f32.mxu1 %v13548_v22 }
 0x379   :  { %2535 = vmatmul.mubr.f32.gmra.mrb[58].mxu0 %v11211_v18  ;;  %4571 = vmatmul.mubr.f32.gmra.mrb[58].mxu1 %v11211_v18 }
 0x37a   :  { %2540 = vmatprep.mubr.f32.mxu0 %v13548_v22  ;;  %4576 = vmatprep.mubr.f32.mxu1 %v13548_v22 }
 0x37d   :  { %2542 = vmatmul.mubr.f32.gmra.mrb[60].mxu0 %v13549_v54  ;;  %4578 = vmatmul.mubr.f32.gmra.mrb[60].mxu1 %v13549_v54 }
 0x37e   :  { %2547 = vmatprep.mubr.f32.mxu0 %v13548_v22  ;;  %4583 = vmatprep.mubr.f32.mxu1 %v13548_v22 }
 0x381   :  { %2549 = vmatmul.mubr.f32.gmra.mrb[62].mxu0 %v13550_v42  ;;  %4585 = vmatmul.mubr.f32.gmra.mrb[62].mxu1 %v13550_v42 }
 0x382   :  { %4661 = vmatprep.mubr.f32.mxu0 %v13548_v22  ;;  %6697 = vmatprep.mubr.f32.mxu1 %v13548_v22 }
 0x385   :  { %4667 = vmatmul.mubr.f32.vlgmr.msra.gmra.mrb[64].mxu0 %v13557_v52  ;;  %6703 = vmatmul.mubr.f32.vlgmr.msra.gmra.mrb[64].mxu1 %v13557_v52  ;;  %v13559_v52 = vld [vmem:[#allocation18_spill] sm:$0xff] }
 0x386   :  { %8990 = vmatpush1.bf16.msra.mxu0 %v8989_v45  ;;  %9014 = vmatpush1.bf16.msra.mxu1 %v9013_v49  ;;  %v13562_v45 = vld [vmem:[#allocation27_spill] sm:$0xff]  ;;  %v13563_v49 = vld [vmem:[#allocation30_spill] sm:$0xff] }
 0x387   :  { %4672 = vmatprep.mubr.f32.mxu0 %v13548_v22  ;;  %6708 = vmatprep.mubr.f32.mxu1 %v13548_v22 }
 0x388   :  { %5043 = vmatprep.subr.mxu0 %v5042_v23  ;;  %7079 = vmatprep.subr.mxu1 %v7078_v12  ;;  %v13560_v23 = vld [vmem:[#allocation21_spill] sm:$0xff]  ;;  %v13566_v12 = vld [vmem:[#allocation39_spill] sm:$0xff] }
 0x389   :  { %4678 = vmatmul.mubr.f32.gmra.mrb[66].mxu0 %v13558_v24  ;;  %6714 = vmatmul.mubr.f32.gmra.mrb[66].mxu1 %v13558_v24  ;;  %v13571_v24 = vld [vmem:[#allocation54_spill] sm:$0xff] }
 0x38a   :  { %4683 = vmatprep.mubr.f32.mxu0 %v13548_v22  ;;  %6719 = vmatprep.mubr.f32.mxu1 %v13548_v22 }
 0x38b   :  { %5049 = vmatpush1.msra.mxu0 %v5048_v53  ;;  %7085 = vmatpush1.msra.mxu1 %v7084_v30  ;;  %v13567_v53 = vld [vmem:[#allocation42_spill] sm:$0xff]  ;;  %v13568_v30 = vld [vmem:[#allocation45_spill] sm:$0xff] }
 0x38c   :  { %8992 = vmatprep.subr.bf16.mxu0 %v8991_v31  ;;  %9016 = vmatprep.subr.bf16.mxu1 %v9015_v57  ;;  %v13569_v31 = vld [vmem:[#allocation48_spill] sm:$0xff]  ;;  %v13570_v57 = vld [vmem:[#allocation51_spill] sm:$0xff] }
 0x38d   :  { %4689 = vmatmul.mubr.f32.gmra.mrb[68].mxu0 %v13559_v52  ;;  %6725 = vmatmul.mubr.f32.gmra.mrb[68].mxu1 %v13559_v52  ;;  %v13572_v52 = vld [vmem:[#allocation57_spill] sm:$0xff] }
 0x38e   :  { %4694 = vmatprep.mubr.f32.mxu0 %v13548_v22  ;;  %6730 = vmatprep.mubr.f32.mxu1 %v13548_v22 }
 0x391   :  { %4700 = vmatmul.mubr.f32.gmra.mrb[70].mxu0 %v13560_v23  ;;  %6736 = vmatmul.mubr.f32.gmra.mrb[70].mxu1 %v13560_v23  ;;  %v13573_v23 = vld [vmem:[#allocation60_spill] sm:$0xff] }
 0x392   :  { %4705 = vmatprep.mubr.f32.mxu0 %v13548_v22  ;;  %6741 = vmatprep.mubr.f32.mxu1 %v13548_v22 }
 0x395   :  { %4711 = vmatmul.mubr.f32.gmra.mrb[72].mxu0 %v13561_v32  ;;  %6747 = vmatmul.mubr.f32.gmra.mrb[72].mxu1 %v13561_v32  ;;  %v13574_v32 = vld [vmem:[#allocation63_spill] sm:$0xff] }
 0x396   :  { %4716 = vmatprep.mubr.f32.mxu0 %v13548_v22  ;;  %6752 = vmatprep.mubr.f32.mxu1 %v13548_v22 }
 0x399   :  { %4722 = vmatmul.mubr.f32.gmra.mrb[74].mxu0 %v13562_v45  ;;  %6758 = vmatmul.mubr.f32.gmra.mrb[74].mxu1 %v13562_v45  ;;  %v13575_v45 = vld [vmem:[#allocation66_spill] sm:$0xff] }
 0x39a   :  { %4727 = vmatprep.mubr.f32.mxu0 %v13548_v22  ;;  %6763 = vmatprep.mubr.f32.mxu1 %v13548_v22 }
 0x39d   :  { %4733 = vmatmul.mubr.f32.gmra.mrb[76].mxu0 %v13563_v49  ;;  %6769 = vmatmul.mubr.f32.gmra.mrb[76].mxu1 %v13563_v49  ;;  %v13576_v49 = vld [vmem:[#allocation69_spill] sm:$0xff] }
 0x39e   :  { %4738 = vmatprep.mubr.f32.mxu0 %v13548_v22  ;;  %6774 = vmatprep.mubr.f32.mxu1 %v13548_v22 }
 0x3a1   :  { %4744 = vmatmul.mubr.f32.gmra.mrb[78].mxu0 %v13564_v34  ;;  %6780 = vmatmul.mubr.f32.gmra.mrb[78].mxu1 %v13564_v34  ;;  %v13577_v34 = vld [vmem:[#allocation72_spill] sm:$0xff] }
 0x3a2   :  { %4749 = vmatprep.mubr.f32.mxu0 %v13548_v22  ;;  %6785 = vmatprep.mubr.f32.mxu1 %v13548_v22 }
 0x3a5   :  { %4755 = vmatmul.mubr.f32.gmra.mrb[80].mxu0 %v13565_v63  ;;  %6791 = vmatmul.mubr.f32.gmra.mrb[80].mxu1 %v13565_v63 }
 0x3a6   :  { %4760 = vmatprep.mubr.f32.mxu0 %v13548_v22  ;;  %6796 = vmatprep.mubr.f32.mxu1 %v13548_v22 }
 0x3a9   :  { %4766 = vmatmul.mubr.f32.gmra.mrb[82].mxu0 %v13566_v12  ;;  %6802 = vmatmul.mubr.f32.gmra.mrb[82].mxu1 %v13566_v12 }
 0x3aa   :  { %4771 = vmatprep.mubr.f32.mxu0 %v13548_v22  ;;  %6807 = vmatprep.mubr.f32.mxu1 %v13548_v22 }
 0x3ad   :  { %4777 = vmatmul.mubr.f32.gmra.mrb[84].mxu0 %v13567_v53  ;;  %6813 = vmatmul.mubr.f32.gmra.mrb[84].mxu1 %v13567_v53 }
 0x3ae   :  { %4782 = vmatprep.mubr.f32.mxu0 %v13548_v22  ;;  %6818 = vmatprep.mubr.f32.mxu1 %v13548_v22 }
 0x3b1   :  { %4788 = vmatmul.mubr.f32.gmra.mrb[86].mxu0 %v13568_v30  ;;  %6824 = vmatmul.mubr.f32.gmra.mrb[86].mxu1 %v13568_v30 }
 0x3b2   :  { %4793 = vmatprep.mubr.f32.mxu0 %v13548_v22  ;;  %6829 = vmatprep.mubr.f32.mxu1 %v13548_v22 }
 0x3b5   :  { %4799 = vmatmul.mubr.f32.gmra.mrb[88].mxu0 %v13569_v31  ;;  %6835 = vmatmul.mubr.f32.gmra.mrb[88].mxu1 %v13569_v31  ;;  %v13578_v31 = vld [vmem:[#allocation75_spill] sm:$0xff] }
 0x3b6   :  { %4804 = vmatprep.mubr.f32.mxu0 %v13548_v22  ;;  %6840 = vmatprep.mubr.f32.mxu1 %v13548_v22 }
 0x3b9   :  { %4810 = vmatmul.mubr.f32.gmra.mrb[90].mxu0 %v13570_v57  ;;  %6846 = vmatmul.mubr.f32.gmra.mrb[90].mxu1 %v13570_v57 }
 0x3ba   :  { %4815 = vmatprep.mubr.f32.mxu0 %v13548_v22  ;;  %6851 = vmatprep.mubr.f32.mxu1 %v13548_v22 }
 0x3bd   :  { %4821 = vmatmul.mubr.f32.gmra.mrb[92].mxu0 %v13571_v24  ;;  %6857 = vmatmul.mubr.f32.gmra.mrb[92].mxu1 %v13571_v24 }
 0x3be   :  { %4826 = vmatprep.mubr.f32.mxu0 %v13548_v22  ;;  %6862 = vmatprep.mubr.f32.mxu1 %v13548_v22 }
 0x3c1   :  { %4832 = vmatmul.mubr.f32.gmra.mrb[94].mxu0 %v13572_v52  ;;  %6868 = vmatmul.mubr.f32.gmra.mrb[94].mxu1 %v13572_v52 }
 0x3c2   :  { %4837 = vmatprep.mubr.f32.mxu0 %v13548_v22  ;;  %6873 = vmatprep.mubr.f32.mxu1 %v13548_v22 }
 0x3c5   :  { %4843 = vmatmul.mubr.f32.gmra.mrb[96].mxu0 %v13573_v23  ;;  %6879 = vmatmul.mubr.f32.gmra.mrb[96].mxu1 %v13573_v23 }
 0x3c6   :  { %4848 = vmatprep.mubr.f32.mxu0 %v13548_v22  ;;  %6884 = vmatprep.mubr.f32.mxu1 %v13548_v22 }
 0x3c9   :  { %4854 = vmatmul.mubr.f32.gmra.mrb[98].mxu0 %v13574_v32  ;;  %6890 = vmatmul.mubr.f32.gmra.mrb[98].mxu1 %v13574_v32 }
 0x3ca   :  { %4859 = vmatprep.mubr.f32.mxu0 %v13548_v22  ;;  %6895 = vmatprep.mubr.f32.mxu1 %v13548_v22 }
 0x3cd   :  { %4865 = vmatmul.mubr.f32.gmra.mrb[100].mxu0 %v13575_v45  ;;  %6901 = vmatmul.mubr.f32.gmra.mrb[100].mxu1 %v13575_v45 }
 0x3ce   :  { %4870 = vmatprep.mubr.f32.mxu0 %v13548_v22  ;;  %6906 = vmatprep.mubr.f32.mxu1 %v13548_v22 }
 0x3d1   :  { %4876 = vmatmul.mubr.f32.gmra.mrb[102].mxu0 %v13576_v49  ;;  %6912 = vmatmul.mubr.f32.gmra.mrb[102].mxu1 %v13576_v49 }
 0x3d2   :  { %4881 = vmatprep.mubr.f32.mxu0 %v13548_v22  ;;  %6917 = vmatprep.mubr.f32.mxu1 %v13548_v22 }
 0x3d5   :  { %4887 = vmatmul.mubr.f32.gmra.mrb[104].mxu0 %v13577_v34  ;;  %6923 = vmatmul.mubr.f32.gmra.mrb[104].mxu1 %v13577_v34  ;;  %v13580_v34 = vld [vmem:[#allocation78_spill] sm:$0xff] }
 0x3d6   :  { %4892 = vmatprep.mubr.f32.mxu0 %v13548_v22  ;;  %6928 = vmatprep.mubr.f32.mxu1 %v13548_v22 }
 0x3d8   :  { %v2333_v63 = vpop.f32.mrb[0].mxu0  ;;  %v4369_v12 = vpop.f32.mrb[0].mxu1 }
 0x3d9   :  { %v2335_v53 = vpop.f32.mrb[1].mxu0  ;;  %v4371_v30 = vpop.f32.mrb[1].mxu1  ;;  %4898 = vmatmul.mubr.f32.gmra.mrb[106].mxu0 %v13578_v31  ;;  %6934 = vmatmul.mubr.f32.gmra.mrb[106].mxu1 %v13578_v31 }
 0x3da   :  { %v8663_v57 = vmul.f32 %v2335_v53, %v2333_v63  ;;  %v8695_v24 = vmul.f32 %v4371_v30, %v4369_v12  ;;  %4903 = vmatprep.mubr.f32.mxu0 %v13548_v22  ;;  %6939 = vmatprep.mubr.f32.mxu1 %v13548_v22 }
 0x3dc   :  { %v12250_v52 = vmul.f32 %v8695_v24, %v8663_v57  ;;  %v2340_v23 = vpop.f32.mrb[2].mxu0  ;;  %v4376_v32 = vpop.f32.mrb[2].mxu1  ;;  %v13582_v57 = vld [vmem:[#allocation81_spill] sm:$0xff] }
 0x3dd   :  { %v2342_v45 = vpop.f32.mrb[3].mxu0  ;;  %v4378_v49 = vpop.f32.mrb[3].mxu1  ;;  %4909 = vmatmul.mubr.f32.gmra.mrb[108].mxu0 %v13580_v34  ;;  %6945 = vmatmul.mubr.f32.gmra.mrb[108].mxu1 %v13580_v34 }
 0x3de   :  { %13579 = vst [vmem:[#allocation12_spill] sm:$0xff] %v12250_v52  ;;  %v8664_v39 = vmul.f32 %v2342_v45, %v2340_v23  ;;  %v8696_v19 = vmul.f32 %v4378_v49, %v4376_v32  ;;  %4914 = vmatprep.mubr.f32.mxu0 %v13548_v22  ;;  %6950 = vmatprep.mubr.f32.mxu1 %v13548_v22  ;;  %v13584_v49 = vld [vmem:[#allocation84_spill] sm:$0xff] }
 0x3e0   :  { %v12256_v63 = vmul.f32 %v8696_v19, %v8664_v39  ;;  %v2347_v12 = vpop.f32.mrb[4].mxu0  ;;  %v4383_v53 = vpop.f32.mrb[4].mxu1 }
 0x3e1   :  { %v2349_v30 = vpop.f32.mrb[5].mxu0  ;;  %v4385_v31 = vpop.f32.mrb[5].mxu1  ;;  %4920 = vmatmul.mubr.f32.gmra.mrb[110].mxu0 %v13582_v57  ;;  %6956 = vmatmul.mubr.f32.gmra.mrb[110].mxu1 %v13582_v57  ;;  %v13586_v57 = vld [vmem:[#allocation87_spill] sm:$0xff] }
 0x3e2   :  { %13581 = vst [vmem:[#allocation15_spill] sm:$0xff] %v12256_v63  ;;  %v8665_v24 = vmul.f32 %v2349_v30, %v2347_v12  ;;  %v8697_v52 = vmul.f32 %v4385_v31, %v4383_v53  ;;  %4925 = vmatprep.mubr.f32.mxu0 %v13548_v22  ;;  %6961 = vmatprep.mubr.f32.mxu1 %v13548_v22 }
 0x3e4   :  { %v12262_v23 = vmul.f32 %v8697_v52, %v8665_v24  ;;  %v2354_v32 = vpop.f32.mrb[6].mxu0  ;;  %v4390_v45 = vpop.f32.mrb[6].mxu1 }
 0x3e5   :  { %v2356_v19 = vpop.f32.mrb[7].mxu0  ;;  %v4392_v39 = vpop.f32.mrb[7].mxu1  ;;  %4931 = vmatmul.mubr.f32.gmra.mrb[112].mxu0 %v13584_v49  ;;  %6967 = vmatmul.mubr.f32.gmra.mrb[112].mxu1 %v13584_v49  ;;  %v13588_v49 = vld [vmem:[#allocation90_spill] sm:$0xff] }
 0x3e6   :  { %13583 = vst [vmem:[#allocation18_spill] sm:$0xff] %v12262_v23  ;;  %v8666_v34 = vmul.f32 %v2356_v19, %v2354_v32  ;;  %v8698_v63 = vmul.f32 %v4392_v39, %v4390_v45  ;;  %4936 = vmatprep.mubr.f32.mxu0 %v13548_v22  ;;  %6972 = vmatprep.mubr.f32.mxu1 %v13548_v22 }
 0x3e8   :  { %v12268_v12 = vmul.f32 %v8698_v63, %v8666_v34  ;;  %v2361_v53 = vpop.f32.mrb[8].mxu0  ;;  %v4397_v30 = vpop.f32.mrb[8].mxu1 }
 0x3e9   :  { %v2363_v52 = vpop.f32.mrb[9].mxu0  ;;  %v4399_v31 = vpop.f32.mrb[9].mxu1  ;;  %4942 = vmatmul.mubr.f32.gmra.mrb[114].mxu0 %v13586_v57  ;;  %6978 = vmatmul.mubr.f32.gmra.mrb[114].mxu1 %v13586_v57  ;;  %v13590_v57 = vld [vmem:[#allocation93_spill] sm:$0xff] }
 0x3ea   :  { %13585 = vst [vmem:[#allocation21_spill] sm:$0xff] %v12268_v12  ;;  %v8667_v24 = vmul.f32 %v2363_v52, %v2361_v53  ;;  %v8699_v23 = vmul.f32 %v4399_v31, %v4397_v30  ;;  %4947 = vmatprep.mubr.f32.mxu0 %v13548_v22  ;;  %6983 = vmatprep.mubr.f32.mxu1 %v13548_v22 }
 0x3ec   :  { %v12274_v32 = vmul.f32 %v8699_v23, %v8667_v24  ;;  %v2368_v45 = vpop.f32.mrb[10].mxu0  ;;  %v4404_v19 = vpop.f32.mrb[10].mxu1 }
 0x3ed   :  { %v2370_v63 = vpop.f32.mrb[11].mxu0  ;;  %v4406_v39 = vpop.f32.mrb[11].mxu1  ;;  %4953 = vmatmul.mubr.f32.gmra.mrb[116].mxu0 %v13588_v49  ;;  %6989 = vmatmul.mubr.f32.gmra.mrb[116].mxu1 %v13588_v49  ;;  %v13592_v49 = vld [vmem:[#allocation97_spill] sm:$0xff] }
 0x3ee   :  { %13587 = vst [vmem:[#allocation24_spill] sm:$0xff] %v12274_v32  ;;  %v8668_v34 = vmul.f32 %v2370_v63, %v2368_v45  ;;  %v8700_v12 = vmul.f32 %v4406_v39, %v4404_v19  ;;  %4958 = vmatprep.mubr.f32.mxu0 %v13548_v22  ;;  %6994 = vmatprep.mubr.f32.mxu1 %v13548_v22 }
 0x3f0   :  { %v12280_v53 = vmul.f32 %v8700_v12, %v8668_v34  ;;  %v2375_v30 = vpop.f32.mrb[12].mxu0  ;;  %v4411_v52 = vpop.f32.mrb[12].mxu1 }
 0x3f1   :  { %v2377_v23 = vpop.f32.mrb[13].mxu0  ;;  %v4413_v31 = vpop.f32.mrb[13].mxu1  ;;  %4964 = vmatmul.mubr.f32.gmra.mrb[118].mxu0 %v13590_v57  ;;  %7000 = vmatmul.mubr.f32.gmra.mrb[118].mxu1 %v13590_v57  ;;  %v13594_v57 = vld [vmem:[#allocation101_spill] sm:$0xff] }
 0x3f2   :  { %13589 = vst [vmem:[#allocation27_spill] sm:$0xff] %v12280_v53  ;;  %v8669_v24 = vmul.f32 %v2377_v23, %v2375_v30  ;;  %v8701_v32 = vmul.f32 %v4413_v31, %v4411_v52  ;;  %4969 = vmatprep.mubr.f32.mxu0 %v13548_v22  ;;  %7005 = vmatprep.mubr.f32.mxu1 %v13548_v22 }
 0x3f4   :  { %v12286_v45 = vmul.f32 %v8701_v32, %v8669_v24  ;;  %v2382_v19 = vpop.f32.mrb[14].mxu0  ;;  %v4418_v63 = vpop.f32.mrb[14].mxu1 }
 0x3f5   :  { %v2384_v12 = vpop.f32.mrb[15].mxu0  ;;  %v4420_v39 = vpop.f32.mrb[15].mxu1  ;;  %4975 = vmatmul.mubr.f32.gmra.mrb[120].mxu0 %v13592_v49  ;;  %7011 = vmatmul.mubr.f32.gmra.mrb[120].mxu1 %v13592_v49  ;;  %v13595_v49 = vld [vmem:[#allocation103_spill] sm:$0xff] }
 0x3f6   :  { %13591 = vst [vmem:[#allocation30_spill] sm:$0xff] %v12286_v45  ;;  %v8670_v34 = vmul.f32 %v2384_v12, %v2382_v19  ;;  %v8702_v53 = vmul.f32 %v4420_v39, %v4418_v63  ;;  %4980 = vmatprep.mubr.f32.mxu0 %v13548_v22  ;;  %7016 = vmatprep.mubr.f32.mxu1 %v13548_v22 }
 0x3f8   :  { %v12292_v30 = vmul.f32 %v8702_v53, %v8670_v34  ;;  %v2389_v52 = vpop.f32.mrb[16].mxu0  ;;  %v4425_v23 = vpop.f32.mrb[16].mxu1 }
 0x3f9   :  { %v2391_v32 = vpop.f32.mrb[17].mxu0  ;;  %v4427_v31 = vpop.f32.mrb[17].mxu1  ;;  %4986 = vmatmul.mubr.f32.gmra.mrb[122].mxu0 %v13594_v57  ;;  %7022 = vmatmul.mubr.f32.gmra.mrb[122].mxu1 %v13594_v57  ;;  %v13597_v57 = vld [vmem:[#allocation104_spill] sm:$0xff] }
 0x3fa   :  { %13593 = vst [vmem:[#allocation33_spill] sm:$0xff] %v12292_v30  ;;  %v8671_v24 = vmul.f32 %v2391_v32, %v2389_v52  ;;  %v8703_v45 = vmul.f32 %v4427_v31, %v4425_v23  ;;  %4991 = vmatprep.mubr.f32.mxu0 %v13548_v22  ;;  %7027 = vmatprep.mubr.f32.mxu1 %v13548_v22 }
 0x3fc   :  { %v12298_v19 = vmul.f32 %v8703_v45, %v8671_v24  ;;  %v2396_v63 = vpop.f32.mrb[18].mxu0  ;;  %v4432_v12 = vpop.f32.mrb[18].mxu1  ;;  %v8993_v24 = vpack.c.bf16 %v11778_v37, %v11769_v13 }
 0x3fd   :  { %v2398_v53 = vpop.f32.mrb[19].mxu0  ;;  %v4434_v39 = vpop.f32.mrb[19].mxu1  ;;  %4997 = vmatmul.mubr.f32.gmra.mrb[124].mxu0 %v13595_v49  ;;  %7033 = vmatmul.mubr.f32.gmra.mrb[124].mxu1 %v13595_v49 }
 0x3fe   :  { %v8672_v34 = vmul.f32 %v2398_v53, %v2396_v63  ;;  %v8704_v30 = vmul.f32 %v4434_v39, %v4432_v12  ;;  %5002 = vmatprep.mubr.f32.mxu0 %v13548_v22  ;;  %7038 = vmatprep.mubr.f32.mxu1 %v13548_v22 }
 0x400   :  { %v12304_v52 = vmul.f32 %v8704_v30, %v8672_v34  ;;  %v2403_v23 = vpop.f32.mrb[20].mxu0  ;;  %v4439_v32 = vpop.f32.mrb[20].mxu1  ;;  %v9017_v30 = vpack.c.bf16 %v11790_v47, %v11785_v5 }
 0x401   :  { %v2405_v45 = vpop.f32.mrb[21].mxu0  ;;  %v4441_v31 = vpop.f32.mrb[21].mxu1  ;;  %5008 = vmatmul.mubr.f32.gmra.mrb[126].mxu0 %v13597_v57  ;;  %7044 = vmatmul.mubr.f32.gmra.mrb[126].mxu1 %v13597_v57 }
 0x402   :  { %13596 = vst [vmem:[#allocation36_spill] sm:$0xff] %v12304_v52  ;;  %v8673_v49 = vmul.f32 %v2405_v45, %v2403_v23  ;;  %v8705_v63 = vmul.f32 %v4441_v31, %v4439_v32  ;;  %5108 = vmatprep.mubr.f32.mxu0 %v13548_v22  ;;  %7144 = vmatprep.mubr.f32.mxu1 %v13548_v22 }
 0x404   :  { %v12314_v12 = vmul.f32 %v8705_v63, %v8673_v49  ;;  %v2410_v53 = vpop.f32.mrb[22].mxu0  ;;  %v4446_v39 = vpop.f32.mrb[22].mxu1 }
 0x405   :  { %v2412_v34 = vpop.f32.mrb[23].mxu0  ;;  %v4448_v52 = vpop.f32.mrb[23].mxu1  ;;  %5110 = vmatmul.mubr.f32.vlgmr.msra.gmra.mrb[64].mxu0 %v10660_v56  ;;  %7146 = vmatmul.mubr.f32.vlgmr.msra.gmra.mrb[64].mxu1 %v10660_v56 }
 0x406   :  { %v8674_v57 = vmul.f32 %v2412_v34, %v2410_v53  ;;  %v8706_v23 = vmul.f32 %v4448_v52, %v4446_v39  ;;  %8994 = vmatpush1.bf16.msra.mxu0 %v8993_v24  ;;  %9018 = vmatpush1.bf16.msra.mxu1 %v9017_v30 }
 0x407   :  { %5115 = vmatprep.mubr.f32.mxu0 %v13548_v22  ;;  %7151 = vmatprep.mubr.f32.mxu1 %v13548_v22 }
 0x408   :  { %v12320_v32 = vmul.f32 %v8706_v23, %v8674_v57  ;;  %v2417_v45 = vpop.f32.mrb[24].mxu0  ;;  %v4453_v31 = vpop.f32.mrb[24].mxu1  ;;  %5347 = vmatprep.subr.mxu0 %v12104_v0  ;;  %7383 = vmatprep.subr.mxu1 %v12108_v4 }
 0x409   :  { %v2419_v49 = vpop.f32.mrb[25].mxu0  ;;  %v4455_v63 = vpop.f32.mrb[25].mxu1  ;;  %5117 = vmatmul.mubr.f32.gmra.mrb[66].mxu0 %v10658_v55  ;;  %7153 = vmatmul.mubr.f32.gmra.mrb[66].mxu1 %v10658_v55 }
 0x40a   :  { %13598 = vst [vmem:[#allocation39_spill] sm:$0xff] %v12320_v32  ;;  %v8675_v52 = vmul.f32 %v2419_v49, %v2417_v45  ;;  %v8707_v24 = vmul.f32 %v4455_v63, %v4453_v31  ;;  %5122 = vmatprep.mubr.f32.mxu0 %v13548_v22  ;;  %7158 = vmatprep.mubr.f32.mxu1 %v13548_v22 }
 0x40b   :  { %5350 = vmatpush1.msra.mxu0 %v12128_v29  ;;  %7386 = vmatpush1.msra.mxu1 %v12132_v44 }
 0x40c   :  { %v12330_v30 = vmul.f32 %v8707_v24, %v8675_v52  ;;  %v2424_v53 = vpop.f32.mrb[26].mxu0  ;;  %v4460_v39 = vpop.f32.mrb[26].mxu1  ;;  %8996 = vmatprep.subr.bf16.mxu0 %v11759_v41  ;;  %9020 = vmatprep.subr.bf16.mxu1 %v11764_v7 }
 0x40d   :  { %v2426_v34 = vpop.f32.mrb[27].mxu0  ;;  %v4462_v57 = vpop.f32.mrb[27].mxu1  ;;  %5124 = vmatmul.mubr.f32.gmra.mrb[68].mxu0 %v10687_v11  ;;  %7160 = vmatmul.mubr.f32.gmra.mrb[68].mxu1 %v10687_v11 }
 0x40e   :  { %13599 = vst [vmem:[#allocation42_spill] sm:$0xff] %v12330_v30  ;;  %v8676_v23 = vmul.f32 %v2426_v34, %v2424_v53  ;;  %v8708_v45 = vmul.f32 %v4462_v57, %v4460_v39  ;;  %5129 = vmatprep.mubr.f32.mxu0 %v13548_v22  ;;  %7165 = vmatprep.mubr.f32.mxu1 %v13548_v22 }
 0x410   :  { %v12338_v31 = vmul.f32 %v8708_v45, %v8676_v23  ;;  %v2431_v49 = vpop.f32.mrb[28].mxu0  ;;  %v4467_v63 = vpop.f32.mrb[28].mxu1 }
 0x411   :  { %v2433_v52 = vpop.f32.mrb[29].mxu0  ;;  %v4469_v24 = vpop.f32.mrb[29].mxu1  ;;  %5131 = vmatmul.mubr.f32.gmra.mrb[70].mxu0 %v10713_v58  ;;  %7167 = vmatmul.mubr.f32.gmra.mrb[70].mxu1 %v10713_v58 }
 0x412   :  { %13600 = vst [vmem:[#allocation45_spill] sm:$0xff] %v12338_v31  ;;  %v8677_v30 = vmul.f32 %v2433_v52, %v2431_v49  ;;  %v8709_v32 = vmul.f32 %v4469_v24, %v4467_v63  ;;  %5136 = vmatprep.mubr.f32.mxu0 %v13548_v22  ;;  %7172 = vmatprep.mubr.f32.mxu1 %v13548_v22 }
 0x414   :  { %v12344_v53 = vmul.f32 %v8709_v32, %v8677_v30  ;;  %v2438_v39 = vpop.f32.mrb[30].mxu0  ;;  %v4474_v34 = vpop.f32.mrb[30].mxu1 }
 0x415   :  { %v2440_v57 = vpop.f32.mrb[31].mxu0  ;;  %v4476_v23 = vpop.f32.mrb[31].mxu1  ;;  %5138 = vmatmul.mubr.f32.gmra.mrb[72].mxu0 %v10732_v21  ;;  %7174 = vmatmul.mubr.f32.gmra.mrb[72].mxu1 %v10732_v21 }
 0x416   :  { %13601 = vst [vmem:[#allocation48_spill] sm:$0xff] %v12344_v53  ;;  %v8678_v45 = vmul.f32 %v2440_v57, %v2438_v39  ;;  %v8710_v31 = vmul.f32 %v4476_v23, %v4474_v34  ;;  %5143 = vmatprep.mubr.f32.mxu0 %v13548_v22  ;;  %7179 = vmatprep.mubr.f32.mxu1 %v13548_v22 }
 0x418   :  { %v12350_v49 = vmul.f32 %v8710_v31, %v8678_v45  ;;  %v2445_v63 = vpop.f32.mrb[32].mxu0  ;;  %v4481_v52 = vpop.f32.mrb[32].mxu1 }
 0x419   :  { %v2447_v32 = vpop.f32.mrb[33].mxu0  ;;  %v4483_v30 = vpop.f32.mrb[33].mxu1  ;;  %5145 = vmatmul.mubr.f32.gmra.mrb[74].mxu0 %v10755_v43  ;;  %7181 = vmatmul.mubr.f32.gmra.mrb[74].mxu1 %v10755_v43 }
 0x41a   :  { %13602 = vst [vmem:[#allocation51_spill] sm:$0xff] %v12350_v49  ;;  %v8679_v24 = vmul.f32 %v2447_v32, %v2445_v63  ;;  %v8711_v53 = vmul.f32 %v4483_v30, %v4481_v52  ;;  %5150 = vmatprep.mubr.f32.mxu0 %v13548_v22  ;;  %7186 = vmatprep.mubr.f32.mxu1 %v13548_v22 }
 0x41c   :  { %v12356_v39 = vmul.f32 %v8711_v53, %v8679_v24  ;;  %v2452_v34 = vpop.f32.mrb[34].mxu0  ;;  %v4488_v57 = vpop.f32.mrb[34].mxu1 }
 0x41d   :  { %v2454_v31 = vpop.f32.mrb[35].mxu0  ;;  %v4490_v23 = vpop.f32.mrb[35].mxu1  ;;  %5152 = vmatmul.mubr.f32.gmra.mrb[76].mxu0 %v10774_v40  ;;  %7188 = vmatmul.mubr.f32.gmra.mrb[76].mxu1 %v10774_v40 }
 0x41e   :  { %13603 = vst [vmem:[#allocation54_spill] sm:$0xff] %v12356_v39  ;;  %v8680_v45 = vmul.f32 %v2454_v31, %v2452_v34  ;;  %v8712_v49 = vmul.f32 %v4490_v23, %v4488_v57  ;;  %5157 = vmatprep.mubr.f32.mxu0 %v13548_v22  ;;  %7193 = vmatprep.mubr.f32.mxu1 %v13548_v22 }
 0x420   :  { %v12362_v63 = vmul.f32 %v8712_v49, %v8680_v45  ;;  %v2459_v52 = vpop.f32.mrb[36].mxu0  ;;  %v4495_v32 = vpop.f32.mrb[36].mxu1 }
 0x421   :  { %v2461_v53 = vpop.f32.mrb[37].mxu0  ;;  %v4497_v30 = vpop.f32.mrb[37].mxu1  ;;  %5159 = vmatmul.mubr.f32.gmra.mrb[78].mxu0 %v10793_v6  ;;  %7195 = vmatmul.mubr.f32.gmra.mrb[78].mxu1 %v10793_v6 }
 0x422   :  { %13604 = vst [vmem:[#allocation57_spill] sm:$0xff] %v12362_v63  ;;  %v8681_v24 = vmul.f32 %v2461_v53, %v2459_v52  ;;  %v8713_v39 = vmul.f32 %v4497_v30, %v4495_v32  ;;  %5164 = vmatprep.mubr.f32.mxu0 %v13548_v22  ;;  %7200 = vmatprep.mubr.f32.mxu1 %v13548_v22 }
 0x424   :  { %v12368_v34 = vmul.f32 %v8713_v39, %v8681_v24  ;;  %v2466_v57 = vpop.f32.mrb[38].mxu0  ;;  %v4502_v31 = vpop.f32.mrb[38].mxu1 }
 0x425   :  { %v2468_v49 = vpop.f32.mrb[39].mxu0  ;;  %v4504_v23 = vpop.f32.mrb[39].mxu1  ;;  %5166 = vmatmul.mubr.f32.gmra.mrb[80].mxu0 %v10812_v17  ;;  %7202 = vmatmul.mubr.f32.gmra.mrb[80].mxu1 %v10812_v17 }
 0x426   :  { %13605 = vst [vmem:[#allocation60_spill] sm:$0xff] %v12368_v34  ;;  %v8682_v45 = vmul.f32 %v2468_v49, %v2466_v57  ;;  %v8714_v63 = vmul.f32 %v4504_v23, %v4502_v31  ;;  %5171 = vmatprep.mubr.f32.mxu0 %v13548_v22  ;;  %7207 = vmatprep.mubr.f32.mxu1 %v13548_v22 }
 0x428   :  { %v12374_v52 = vmul.f32 %v8714_v63, %v8682_v45  ;;  %v2473_v32 = vpop.f32.mrb[40].mxu0  ;;  %v4509_v53 = vpop.f32.mrb[40].mxu1 }
 0x429   :  { %v2475_v39 = vpop.f32.mrb[41].mxu0  ;;  %v4511_v30 = vpop.f32.mrb[41].mxu1  ;;  %5173 = vmatmul.mubr.f32.gmra.mrb[82].mxu0 %v10831_v51  ;;  %7209 = vmatmul.mubr.f32.gmra.mrb[82].mxu1 %v10831_v51 }
 0x42a   :  { %13606 = vst [vmem:[#allocation63_spill] sm:$0xff] %v12374_v52  ;;  %v8683_v24 = vmul.f32 %v2475_v39, %v2473_v32  ;;  %v8715_v34 = vmul.f32 %v4511_v30, %v4509_v53  ;;  %5178 = vmatprep.mubr.f32.mxu0 %v13548_v22  ;;  %7214 = vmatprep.mubr.f32.mxu1 %v13548_v22 }
 0x42c   :  { %v12380_v57 = vmul.f32 %v8715_v34, %v8683_v24  ;;  %v2480_v31 = vpop.f32.mrb[42].mxu0  ;;  %v4516_v49 = vpop.f32.mrb[42].mxu1 }
 0x42d   :  { %v2482_v63 = vpop.f32.mrb[43].mxu0  ;;  %v4518_v23 = vpop.f32.mrb[43].mxu1  ;;  %5180 = vmatmul.mubr.f32.gmra.mrb[84].mxu0 %v10850_v10  ;;  %7216 = vmatmul.mubr.f32.gmra.mrb[84].mxu1 %v10850_v10 }
 0x42e   :  { %13607 = vst [vmem:[#allocation66_spill] sm:$0xff] %v12380_v57  ;;  %v8684_v45 = vmul.f32 %v2482_v63, %v2480_v31  ;;  %v8716_v52 = vmul.f32 %v4518_v23, %v4516_v49  ;;  %5185 = vmatprep.mubr.f32.mxu0 %v13548_v22  ;;  %7221 = vmatprep.mubr.f32.mxu1 %v13548_v22 }
 0x430   :  { %v12386_v32 = vmul.f32 %v8716_v52, %v8684_v45  ;;  %v2487_v53 = vpop.f32.mrb[44].mxu0  ;;  %v4523_v39 = vpop.f32.mrb[44].mxu1 }
 0x431   :  { %v2489_v34 = vpop.f32.mrb[45].mxu0  ;;  %v4525_v30 = vpop.f32.mrb[45].mxu1  ;;  %5187 = vmatmul.mubr.f32.gmra.mrb[86].mxu0 %v10869_v16  ;;  %7223 = vmatmul.mubr.f32.gmra.mrb[86].mxu1 %v10869_v16 }
 0x432   :  { %13608 = vst [vmem:[#allocation69_spill] sm:$0xff] %v12386_v32  ;;  %v8685_v24 = vmul.f32 %v2489_v34, %v2487_v53  ;;  %v8717_v57 = vmul.f32 %v4525_v30, %v4523_v39  ;;  %5192 = vmatprep.mubr.f32.mxu0 %v13548_v22  ;;  %7228 = vmatprep.mubr.f32.mxu1 %v13548_v22 }
 0x434   :  { %v12392_v31 = vmul.f32 %v8717_v57, %v8685_v24  ;;  %v2494_v49 = vpop.f32.mrb[46].mxu0  ;;  %v4530_v63 = vpop.f32.mrb[46].mxu1 }
 0x435   :  { %v2496_v52 = vpop.f32.mrb[47].mxu0  ;;  %v4532_v23 = vpop.f32.mrb[47].mxu1  ;;  %5194 = vmatmul.mubr.f32.gmra.mrb[88].mxu0 %v10888_v3  ;;  %7230 = vmatmul.mubr.f32.gmra.mrb[88].mxu1 %v10888_v3 }
 0x436   :  { %13609 = vst [vmem:[#allocation72_spill] sm:$0xff] %v12392_v31  ;;  %v8686_v45 = vmul.f32 %v2496_v52, %v2494_v49  ;;  %v8718_v32 = vmul.f32 %v4532_v23, %v4530_v63  ;;  %5199 = vmatprep.mubr.f32.mxu0 %v13548_v22  ;;  %7235 = vmatprep.mubr.f32.mxu1 %v13548_v22 }
 0x438   :  { %v12398_v53 = vmul.f32 %v8718_v32, %v8686_v45  ;;  %v2501_v39 = vpop.f32.mrb[48].mxu0  ;;  %v4537_v34 = vpop.f32.mrb[48].mxu1 }
 0x439   :  { %v2503_v57 = vpop.f32.mrb[49].mxu0  ;;  %v4539_v30 = vpop.f32.mrb[49].mxu1  ;;  %5201 = vmatmul.mubr.f32.gmra.mrb[90].mxu0 %v10907_v20  ;;  %7237 = vmatmul.mubr.f32.gmra.mrb[90].mxu1 %v10907_v20 }
 0x43a   :  { %13610 = vst [vmem:[#allocation75_spill] sm:$0xff] %v12398_v53  ;;  %v8687_v24 = vmul.f32 %v2503_v57, %v2501_v39  ;;  %v8719_v31 = vmul.f32 %v4539_v30, %v4537_v34  ;;  %5206 = vmatprep.mubr.f32.mxu0 %v13548_v22  ;;  %7242 = vmatprep.mubr.f32.mxu1 %v13548_v22 }
 0x43c   :  { %v12404_v49 = vmul.f32 %v8719_v31, %v8687_v24  ;;  %v2508_v63 = vpop.f32.mrb[50].mxu0  ;;  %v4544_v52 = vpop.f32.mrb[50].mxu1 }
 0x43d   :  { %v2510_v32 = vpop.f32.mrb[51].mxu0  ;;  %v4546_v23 = vpop.f32.mrb[51].mxu1  ;;  %5208 = vmatmul.mubr.f32.gmra.mrb[92].mxu0 %v10926_v35  ;;  %7244 = vmatmul.mubr.f32.gmra.mrb[92].mxu1 %v10926_v35 }
 0x43e   :  { %13611 = vst [vmem:[#allocation78_spill] sm:$0xff] %v12404_v49  ;;  %v8688_v45 = vmul.f32 %v2510_v32, %v2508_v63  ;;  %v8720_v53 = vmul.f32 %v4546_v23, %v4544_v52  ;;  %5213 = vmatprep.mubr.f32.mxu0 %v13548_v22  ;;  %7249 = vmatprep.mubr.f32.mxu1 %v13548_v22 }
 0x440   :  { %v12410_v39 = vmul.f32 %v8720_v53, %v8688_v45  ;;  %v2515_v34 = vpop.f32.mrb[52].mxu0  ;;  %v4551_v57 = vpop.f32.mrb[52].mxu1 }
 0x441   :  { %v2517_v31 = vpop.f32.mrb[53].mxu0  ;;  %v4553_v30 = vpop.f32.mrb[53].mxu1  ;;  %5215 = vmatmul.mubr.f32.gmra.mrb[94].mxu0 %v10945_v1  ;;  %7251 = vmatmul.mubr.f32.gmra.mrb[94].mxu1 %v10945_v1 }
 0x442   :  { %13612 = vst [vmem:[#allocation81_spill] sm:$0xff] %v12410_v39  ;;  %v8689_v24 = vmul.f32 %v2517_v31, %v2515_v34  ;;  %v8721_v49 = vmul.f32 %v4553_v30, %v4551_v57  ;;  %5220 = vmatprep.mubr.f32.mxu0 %v13548_v22  ;;  %7256 = vmatprep.mubr.f32.mxu1 %v13548_v22 }
 0x444   :  { %v12416_v63 = vmul.f32 %v8721_v49, %v8689_v24  ;;  %v2522_v52 = vpop.f32.mrb[54].mxu0  ;;  %v4558_v32 = vpop.f32.mrb[54].mxu1 }
 0x445   :  { %v2524_v53 = vpop.f32.mrb[55].mxu0  ;;  %v4560_v23 = vpop.f32.mrb[55].mxu1  ;;  %5222 = vmatmul.mubr.f32.gmra.mrb[96].mxu0 %v10964_v8  ;;  %7258 = vmatmul.mubr.f32.gmra.mrb[96].mxu1 %v10964_v8 }
 0x446   :  { %13613 = vst [vmem:[#allocation84_spill] sm:$0xff] %v12416_v63  ;;  %v8690_v45 = vmul.f32 %v2524_v53, %v2522_v52  ;;  %v8722_v39 = vmul.f32 %v4560_v23, %v4558_v32  ;;  %5227 = vmatprep.mubr.f32.mxu0 %v13548_v22  ;;  %7263 = vmatprep.mubr.f32.mxu1 %v13548_v22 }
 0x448   :  { %v12422_v34 = vmul.f32 %v8722_v39, %v8690_v45  ;;  %v2529_v57 = vpop.f32.mrb[56].mxu0  ;;  %v4565_v31 = vpop.f32.mrb[56].mxu1 }
 0x449   :  { %v2531_v49 = vpop.f32.mrb[57].mxu0  ;;  %v4567_v30 = vpop.f32.mrb[57].mxu1  ;;  %5229 = vmatmul.mubr.f32.gmra.mrb[98].mxu0 %v10983_v2  ;;  %7265 = vmatmul.mubr.f32.gmra.mrb[98].mxu1 %v10983_v2 }
 0x44a   :  { %13614 = vst [vmem:[#allocation87_spill] sm:$0xff] %v12422_v34  ;;  %v8691_v24 = vmul.f32 %v2531_v49, %v2529_v57  ;;  %v8723_v63 = vmul.f32 %v4567_v30, %v4565_v31  ;;  %5234 = vmatprep.mubr.f32.mxu0 %v13548_v22  ;;  %7270 = vmatprep.mubr.f32.mxu1 %v13548_v22 }
 0x44c   :  { %v12428_v52 = vmul.f32 %v8723_v63, %v8691_v24  ;;  %v2536_v32 = vpop.f32.mrb[58].mxu0  ;;  %v4572_v53 = vpop.f32.mrb[58].mxu1 }
 0x44d   :  { %v2538_v39 = vpop.f32.mrb[59].mxu0  ;;  %v4574_v23 = vpop.f32.mrb[59].mxu1  ;;  %5236 = vmatmul.mubr.f32.gmra.mrb[100].mxu0 %v11002_v36  ;;  %7272 = vmatmul.mubr.f32.gmra.mrb[100].mxu1 %v11002_v36 }
 0x44e   :  { %13615 = vst [vmem:[#allocation90_spill] sm:$0xff] %v12428_v52  ;;  %v8692_v45 = vmul.f32 %v2538_v39, %v2536_v32  ;;  %v8724_v34 = vmul.f32 %v4574_v23, %v4572_v53  ;;  %5241 = vmatprep.mubr.f32.mxu0 %v13548_v22  ;;  %7277 = vmatprep.mubr.f32.mxu1 %v13548_v22 }
 0x450   :  { %v12434_v57 = vmul.f32 %v8724_v34, %v8692_v45  ;;  %v2543_v31 = vpop.f32.mrb[60].mxu0  ;;  %v4579_v49 = vpop.f32.mrb[60].mxu1 }
 0x451   :  { %v2545_v63 = vpop.f32.mrb[61].mxu0  ;;  %v4581_v30 = vpop.f32.mrb[61].mxu1  ;;  %5243 = vmatmul.mubr.f32.gmra.mrb[102].mxu0 %v11021_v59  ;;  %7279 = vmatmul.mubr.f32.gmra.mrb[102].mxu1 %v11021_v59 }
 0x452   :  { %13616 = vst [vmem:[#allocation93_spill] sm:$0xff] %v12434_v57  ;;  %v8693_v24 = vmul.f32 %v2545_v63, %v2543_v31  ;;  %v8725_v52 = vmul.f32 %v4581_v30, %v4579_v49  ;;  %5248 = vmatprep.mubr.f32.mxu0 %v13548_v22  ;;  %7284 = vmatprep.mubr.f32.mxu1 %v13548_v22  ;;  %v13619_v49 = vld [vmem:[#allocation6_spill] sm:$0xff]  ;;  %v13620_v63 = vand.u32 4294901760, %v11726_v48  ;;  %v13621_v30 = vand.u32 4294901760, %v11728_v26  ;;  %v13627_v26 = vld [vmem:[#allocation11_spill] sm:$0xff]  ;;  %v13629_v48 = vld [vmem:[#allocation17_spill] sm:$0xff] }
 0x454   :  { %v12440_v32 = vmul.f32 %v8725_v52, %v8693_v24  ;;  %v2550_v53 = vpop.f32.mrb[62].mxu0  ;;  %v4586_v39 = vpop.f32.mrb[62].mxu1  ;;  %v13617_v52 = vld [vmem:[#allocation8_spill] sm:$0xff]  ;;  %v8999_v24 = vpack.c.bf16 %v13621_v30, %v13620_v63  ;;  %v13631_v63 = vld [vmem:[#allocation23_spill] sm:$0xff]  ;;  %v13632_v30 = vld [vmem:[#allocation26_spill] sm:$0xff] }
 0x455   :  { %v2552_v34 = vpop.f32.mrb[63].mxu0  ;;  %v4588_v23 = vpop.f32.mrb[63].mxu1  ;;  %5250 = vmatmul.mubr.f32.gmra.mrb[104].mxu0 %v11040_v62  ;;  %7286 = vmatmul.mubr.f32.gmra.mrb[104].mxu1 %v11040_v62 }
 0x456   :  { %v8694_v45 = vmul.f32 %v2552_v34, %v2550_v53  ;;  %v8726_v57 = vmul.f32 %v4588_v23, %v4586_v39  ;;  %5255 = vmatprep.mubr.f32.mxu0 %v13548_v22  ;;  %7291 = vmatprep.mubr.f32.mxu1 %v13548_v22  ;;  %v13622_v53 = vand.u32 4294901760, %v11742_v61  ;;  %v13623_v39 = vand.u32 4294901760, %v11744_v38  ;;  %v13624_v23 = vld [vmem:[#allocation7_spill] sm:$0xff]  ;;  %v13628_v61 = vld [vmem:[#allocation14_spill] sm:$0xff]  ;;  %v13630_v38 = vld [vmem:[#allocation20_spill] sm:$0xff] }
 0x458   :  { %v12446_v31 = vmul.f32 %v8726_v57, %v8694_v45  ;;  %v13618_v57 = vld [vmem:[#allocation5_spill] sm:$0xff]  ;;  %v9023_v34 = vpack.c.bf16 %v13623_v39, %v13622_v53  ;;  %v13625_v45 = vld [vmem:[#allocation94_spill] sm:$0xff]  ;;  %v13634_v53 = vld [vmem:[#allocation32_spill] sm:$0xff] }
 0x459   :  { %5257 = vmatmul.mubr.f32.gmra.mrb[106].mxu0 %v11059_v14  ;;  %7293 = vmatmul.mubr.f32.gmra.mrb[106].mxu1 %v11059_v14  ;;  %v13635_v39 = vld [vmem:[#allocation35_spill] sm:$0xff] }
 0x45a   :  { %5262 = vmatprep.mubr.f32.mxu0 %v13548_v22  ;;  %7298 = vmatprep.mubr.f32.mxu1 %v13548_v22 }
 0x45d   :  { %5264 = vmatmul.mubr.f32.gmra.mrb[108].mxu0 %v11078_v50  ;;  %7300 = vmatmul.mubr.f32.gmra.mrb[108].mxu1 %v11078_v50 }
 0x45e   :  { %5269 = vmatprep.mubr.f32.mxu0 %v13548_v22  ;;  %7305 = vmatprep.mubr.f32.mxu1 %v13548_v22 }
 0x461   :  { %5271 = vmatmul.mubr.f32.gmra.mrb[110].mxu0 %v11097_v33  ;;  %7307 = vmatmul.mubr.f32.gmra.mrb[110].mxu1 %v11097_v33 }
 0x462   :  { %5276 = vmatprep.mubr.f32.mxu0 %v13548_v22  ;;  %7312 = vmatprep.mubr.f32.mxu1 %v13548_v22 }
 0x465   :  { %5278 = vmatmul.mubr.f32.gmra.mrb[112].mxu0 %v11116_v28  ;;  %7314 = vmatmul.mubr.f32.gmra.mrb[112].mxu1 %v11116_v28 }
 0x466   :  { %5283 = vmatprep.mubr.f32.mxu0 %v13548_v22  ;;  %7319 = vmatprep.mubr.f32.mxu1 %v13548_v22 }
 0x469   :  { %5285 = vmatmul.mubr.f32.gmra.mrb[114].mxu0 %v11135_v15  ;;  %7321 = vmatmul.mubr.f32.gmra.mrb[114].mxu1 %v11135_v15 }
 0x46a   :  { %5290 = vmatprep.mubr.f32.mxu0 %v13548_v22  ;;  %7326 = vmatprep.mubr.f32.mxu1 %v13548_v22 }
 0x46d   :  { %5292 = vmatmul.mubr.f32.gmra.mrb[116].mxu0 %v11154_v60  ;;  %7328 = vmatmul.mubr.f32.gmra.mrb[116].mxu1 %v11154_v60 }
 0x46e   :  { %5297 = vmatprep.mubr.f32.mxu0 %v13548_v22  ;;  %7333 = vmatprep.mubr.f32.mxu1 %v13548_v22 }
 0x471   :  { %5299 = vmatmul.mubr.f32.gmra.mrb[118].mxu0 %v11173_v25  ;;  %7335 = vmatmul.mubr.f32.gmra.mrb[118].mxu1 %v11173_v25 }
 0x472   :  { %5304 = vmatprep.mubr.f32.mxu0 %v13548_v22  ;;  %7340 = vmatprep.mubr.f32.mxu1 %v13548_v22 }
 0x475   :  { %5306 = vmatmul.mubr.f32.gmra.mrb[120].mxu0 %v11192_v9  ;;  %7342 = vmatmul.mubr.f32.gmra.mrb[120].mxu1 %v11192_v9 }
 0x476   :  { %5311 = vmatprep.mubr.f32.mxu0 %v13548_v22  ;;  %7347 = vmatprep.mubr.f32.mxu1 %v13548_v22 }
 0x479   :  { %5313 = vmatmul.mubr.f32.gmra.mrb[122].mxu0 %v11211_v18  ;;  %7349 = vmatmul.mubr.f32.gmra.mrb[122].mxu1 %v11211_v18 }
 0x47a   :  { %5318 = vmatprep.mubr.f32.mxu0 %v13548_v22  ;;  %7354 = vmatprep.mubr.f32.mxu1 %v13548_v22 }
 0x47d   :  { %5320 = vmatmul.mubr.f32.gmra.mrb[124].mxu0 %v13549_v54  ;;  %7356 = vmatmul.mubr.f32.gmra.mrb[124].mxu1 %v13549_v54 }
 0x47e   :  { %5325 = vmatprep.mubr.f32.mxu0 %v13548_v22  ;;  %7361 = vmatprep.mubr.f32.mxu1 %v13548_v22 }
 0x481   :  { %5327 = vmatmul.mubr.f32.gmra.mrb[126].mxu0 %v13550_v42  ;;  %7363 = vmatmul.mubr.f32.gmra.mrb[126].mxu1 %v13550_v42 }
 0x482   :  { %5409 = vmatprep.mubr.f32.mxu0 %v13548_v22  ;;  %7445 = vmatprep.mubr.f32.mxu1 %v13548_v22 }
 0x485   :  { %5412 = vmatmul.mubr.f32.vlgmr.msra.gmra.mrb[64].mxu0 %v13617_v52  ;;  %7448 = vmatmul.mubr.f32.vlgmr.msra.gmra.mrb[64].mxu1 %v13617_v52  ;;  %v13626_v52 = vld [vmem:[#allocation98_spill] sm:$0xff] }
 0x486   :  { %8998 = vmatpush1.bf16.msra.mxu0 %v11928_v46  ;;  %9022 = vmatpush1.bf16.msra.mxu1 %v11934_v27 }
 0x487   :  { %5417 = vmatprep.mubr.f32.mxu0 %v13548_v22  ;;  %7453 = vmatprep.mubr.f32.mxu1 %v13548_v22 }
 0x488   :  { %5675 = vmatprep.subr.mxu0 %v13618_v57  ;;  %7711 = vmatprep.subr.mxu1 %v13619_v49 }
 0x489   :  { %5420 = vmatmul.mubr.f32.gmra.mrb[66].mxu0 %v13624_v23  ;;  %7456 = vmatmul.mubr.f32.gmra.mrb[66].mxu1 %v13624_v23  ;;  %v13637_v23 = vld [vmem:[#allocation41_spill] sm:$0xff] }
 0x48a   :  { %5425 = vmatprep.mubr.f32.mxu0 %v13548_v22  ;;  %7461 = vmatprep.mubr.f32.mxu1 %v13548_v22 }
 0x48b   :  { %5677 = vmatpush1.msra.mxu0 %v13625_v45  ;;  %7713 = vmatpush1.msra.mxu1 %v13626_v52 }
 0x48c   :  { %9000 = vmatprep.subr.bf16.mxu0 %v8999_v24  ;;  %9024 = vmatprep.subr.bf16.mxu1 %v9023_v34  ;;  %v13633_v24 = vld [vmem:[#allocation29_spill] sm:$0xff]  ;;  %v13636_v34 = vld [vmem:[#allocation38_spill] sm:$0xff] }
 0x48d   :  { %5428 = vmatmul.mubr.f32.gmra.mrb[68].mxu0 %v13627_v26  ;;  %7464 = vmatmul.mubr.f32.gmra.mrb[68].mxu1 %v13627_v26  ;;  %v13638_v26 = vld [vmem:[#allocation44_spill] sm:$0xff] }
 0x48e   :  { %5433 = vmatprep.mubr.f32.mxu0 %v13548_v22  ;;  %7469 = vmatprep.mubr.f32.mxu1 %v13548_v22 }
 0x491   :  { %5436 = vmatmul.mubr.f32.gmra.mrb[70].mxu0 %v13628_v61  ;;  %7472 = vmatmul.mubr.f32.gmra.mrb[70].mxu1 %v13628_v61  ;;  %v13639_v61 = vld [vmem:[#allocation47_spill] sm:$0xff] }
 0x492   :  { %5441 = vmatprep.mubr.f32.mxu0 %v13548_v22  ;;  %7477 = vmatprep.mubr.f32.mxu1 %v13548_v22 }
 0x495   :  { %5444 = vmatmul.mubr.f32.gmra.mrb[72].mxu0 %v13629_v48  ;;  %7480 = vmatmul.mubr.f32.gmra.mrb[72].mxu1 %v13629_v48  ;;  %v13640_v48 = vld [vmem:[#allocation50_spill] sm:$0xff] }
 0x496   :  { %5449 = vmatprep.mubr.f32.mxu0 %v13548_v22  ;;  %7485 = vmatprep.mubr.f32.mxu1 %v13548_v22 }
 0x499   :  { %5452 = vmatmul.mubr.f32.gmra.mrb[74].mxu0 %v13630_v38  ;;  %7488 = vmatmul.mubr.f32.gmra.mrb[74].mxu1 %v13630_v38  ;;  %v13641_v38 = vld [vmem:[#allocation53_spill] sm:$0xff] }
 0x49a   :  { %5457 = vmatprep.mubr.f32.mxu0 %v13548_v22  ;;  %7493 = vmatprep.mubr.f32.mxu1 %v13548_v22 }
 0x49d   :  { %5460 = vmatmul.mubr.f32.gmra.mrb[76].mxu0 %v13631_v63  ;;  %7496 = vmatmul.mubr.f32.gmra.mrb[76].mxu1 %v13631_v63  ;;  %v13642_v63 = vld [vmem:[#allocation56_spill] sm:$0xff] }
 0x49e   :  { %5465 = vmatprep.mubr.f32.mxu0 %v13548_v22  ;;  %7501 = vmatprep.mubr.f32.mxu1 %v13548_v22 }
 0x4a1   :  { %5468 = vmatmul.mubr.f32.gmra.mrb[78].mxu0 %v13632_v30  ;;  %7504 = vmatmul.mubr.f32.gmra.mrb[78].mxu1 %v13632_v30  ;;  %v13643_v30 = vld [vmem:[#allocation59_spill] sm:$0xff] }
 0x4a2   :  { %5473 = vmatprep.mubr.f32.mxu0 %v13548_v22  ;;  %7509 = vmatprep.mubr.f32.mxu1 %v13548_v22 }
 0x4a5   :  { %5476 = vmatmul.mubr.f32.gmra.mrb[80].mxu0 %v13633_v24  ;;  %7512 = vmatmul.mubr.f32.gmra.mrb[80].mxu1 %v13633_v24  ;;  %v13644_v24 = vld [vmem:[#allocation62_spill] sm:$0xff] }
 0x4a6   :  { %5481 = vmatprep.mubr.f32.mxu0 %v13548_v22  ;;  %7517 = vmatprep.mubr.f32.mxu1 %v13548_v22 }
 0x4a9   :  { %5484 = vmatmul.mubr.f32.gmra.mrb[82].mxu0 %v13634_v53  ;;  %7520 = vmatmul.mubr.f32.gmra.mrb[82].mxu1 %v13634_v53  ;;  %v13645_v53 = vld [vmem:[#allocation65_spill] sm:$0xff] }
 0x4aa   :  { %5489 = vmatprep.mubr.f32.mxu0 %v13548_v22  ;;  %7525 = vmatprep.mubr.f32.mxu1 %v13548_v22 }
 0x4ad   :  { %5492 = vmatmul.mubr.f32.gmra.mrb[84].mxu0 %v13635_v39  ;;  %7528 = vmatmul.mubr.f32.gmra.mrb[84].mxu1 %v13635_v39  ;;  %v13646_v39 = vld [vmem:[#allocation68_spill] sm:$0xff] }
 0x4ae   :  { %5497 = vmatprep.mubr.f32.mxu0 %v13548_v22  ;;  %7533 = vmatprep.mubr.f32.mxu1 %v13548_v22 }
 0x4b1   :  { %5500 = vmatmul.mubr.f32.gmra.mrb[86].mxu0 %v13636_v34  ;;  %7536 = vmatmul.mubr.f32.gmra.mrb[86].mxu1 %v13636_v34  ;;  %v13647_v34 = vld [vmem:[#allocation71_spill] sm:$0xff] }
 0x4b2   :  { %5505 = vmatprep.mubr.f32.mxu0 %v13548_v22  ;;  %7541 = vmatprep.mubr.f32.mxu1 %v13548_v22 }
 0x4b5   :  { %5508 = vmatmul.mubr.f32.gmra.mrb[88].mxu0 %v13637_v23  ;;  %7544 = vmatmul.mubr.f32.gmra.mrb[88].mxu1 %v13637_v23  ;;  %v13648_v23 = vld [vmem:[#allocation74_spill] sm:$0xff] }
 0x4b6   :  { %5513 = vmatprep.mubr.f32.mxu0 %v13548_v22  ;;  %7549 = vmatprep.mubr.f32.mxu1 %v13548_v22 }
 0x4b9   :  { %5516 = vmatmul.mubr.f32.gmra.mrb[90].mxu0 %v13638_v26  ;;  %7552 = vmatmul.mubr.f32.gmra.mrb[90].mxu1 %v13638_v26  ;;  %v13649_v26 = vld [vmem:[#allocation77_spill] sm:$0xff] }
 0x4ba   :  { %5521 = vmatprep.mubr.f32.mxu0 %v13548_v22  ;;  %7557 = vmatprep.mubr.f32.mxu1 %v13548_v22 }
 0x4bd   :  { %5524 = vmatmul.mubr.f32.gmra.mrb[92].mxu0 %v13639_v61  ;;  %7560 = vmatmul.mubr.f32.gmra.mrb[92].mxu1 %v13639_v61  ;;  %v13650_v61 = vld [vmem:[#allocation80_spill] sm:$0xff] }
 0x4be   :  { %5529 = vmatprep.mubr.f32.mxu0 %v13548_v22  ;;  %7565 = vmatprep.mubr.f32.mxu1 %v13548_v22 }
 0x4c1   :  { %5532 = vmatmul.mubr.f32.gmra.mrb[94].mxu0 %v13640_v48  ;;  %7568 = vmatmul.mubr.f32.gmra.mrb[94].mxu1 %v13640_v48  ;;  %v13651_v48 = vld [vmem:[#allocation83_spill] sm:$0xff] }
 0x4c2   :  { %5537 = vmatprep.mubr.f32.mxu0 %v13548_v22  ;;  %7573 = vmatprep.mubr.f32.mxu1 %v13548_v22 }
 0x4c5   :  { %5540 = vmatmul.mubr.f32.gmra.mrb[96].mxu0 %v13641_v38  ;;  %7576 = vmatmul.mubr.f32.gmra.mrb[96].mxu1 %v13641_v38  ;;  %v13652_v38 = vld [vmem:[#allocation86_spill] sm:$0xff] }
 0x4c6   :  { %5545 = vmatprep.mubr.f32.mxu0 %v13548_v22  ;;  %7581 = vmatprep.mubr.f32.mxu1 %v13548_v22 }
 0x4c9   :  { %5548 = vmatmul.mubr.f32.gmra.mrb[98].mxu0 %v13642_v63  ;;  %7584 = vmatmul.mubr.f32.gmra.mrb[98].mxu1 %v13642_v63  ;;  %v13653_v63 = vld [vmem:[#allocation89_spill] sm:$0xff] }
 0x4ca   :  { %5553 = vmatprep.mubr.f32.mxu0 %v13548_v22  ;;  %7589 = vmatprep.mubr.f32.mxu1 %v13548_v22 }
 0x4cd   :  { %5556 = vmatmul.mubr.f32.gmra.mrb[100].mxu0 %v13643_v30  ;;  %7592 = vmatmul.mubr.f32.gmra.mrb[100].mxu1 %v13643_v30  ;;  %v13654_v30 = vld [vmem:[#allocation92_spill] sm:$0xff] }
 0x4ce   :  { %5561 = vmatprep.mubr.f32.mxu0 %v13548_v22  ;;  %7597 = vmatprep.mubr.f32.mxu1 %v13548_v22 }
 0x4d1   :  { %5564 = vmatmul.mubr.f32.gmra.mrb[102].mxu0 %v13644_v24  ;;  %7600 = vmatmul.mubr.f32.gmra.mrb[102].mxu1 %v13644_v24  ;;  %v13655_v24 = vld [vmem:[#allocation96_spill] sm:$0xff] }
 0x4d2   :  { %5569 = vmatprep.mubr.f32.mxu0 %v13548_v22  ;;  %7605 = vmatprep.mubr.f32.mxu1 %v13548_v22 }
 0x4d5   :  { %5572 = vmatmul.mubr.f32.gmra.mrb[104].mxu0 %v13645_v53  ;;  %7608 = vmatmul.mubr.f32.gmra.mrb[104].mxu1 %v13645_v53  ;;  %v13656_v53 = vld [vmem:[#allocation100_spill] sm:$0xff] }
 0x4d6   :  { %5577 = vmatprep.mubr.f32.mxu0 %v13548_v22  ;;  %7613 = vmatprep.mubr.f32.mxu1 %v13548_v22 }
 0x4d9   :  { %5580 = vmatmul.mubr.f32.gmra.mrb[106].mxu0 %v13646_v39  ;;  %7616 = vmatmul.mubr.f32.gmra.mrb[106].mxu1 %v13646_v39  ;;  %v13657_v39 = vand.u32 4294901760, %v11769_v13  ;;  %v13662_v13 = vand.u32 4294901760, %v12104_v0  ;;  %v13667_v0 = vld [vmem:[#allocation13_spill] sm:$0xff] }
 0x4da   :  { %5585 = vmatprep.mubr.f32.mxu0 %v13548_v22  ;;  %7621 = vmatprep.mubr.f32.mxu1 %v13548_v22 }
 0x4dd   :  { %5588 = vmatmul.mubr.f32.gmra.mrb[108].mxu0 %v13647_v34  ;;  %7624 = vmatmul.mubr.f32.gmra.mrb[108].mxu1 %v13647_v34  ;;  %v13658_v34 = vand.u32 4294901760, %v11778_v37  ;;  %v13663_v37 = vand.u32 4294901760, %v12108_v4  ;;  %v13668_v4 = vld [vmem:[#allocation16_spill] sm:$0xff] }
 0x4de   :  { %5593 = vmatprep.mubr.f32.mxu0 %v13548_v22  ;;  %7629 = vmatprep.mubr.f32.mxu1 %v13548_v22 }
 0x4e1   :  { %5596 = vmatmul.mubr.f32.gmra.mrb[110].mxu0 %v13648_v23  ;;  %7632 = vmatmul.mubr.f32.gmra.mrb[110].mxu1 %v13648_v23  ;;  %v9001_v23 = vpack.c.bf16 %v13658_v34, %v13657_v39  ;;  %v13676_v39 = vld [vmem:[#allocation40_spill] sm:$0xff]  ;;  %v13677_v34 = vld [vmem:[#allocation43_spill] sm:$0xff] }
 0x4e2   :  { %5601 = vmatprep.mubr.f32.mxu0 %v13548_v22  ;;  %7637 = vmatprep.mubr.f32.mxu1 %v13548_v22 }
 0x4e5   :  { %5604 = vmatmul.mubr.f32.gmra.mrb[112].mxu0 %v13649_v26  ;;  %7640 = vmatmul.mubr.f32.gmra.mrb[112].mxu1 %v13649_v26  ;;  %v13659_v26 = vand.u32 4294901760, %v11785_v5  ;;  %v13664_v5 = vld [vmem:[#allocation10_spill] sm:$0xff] }
 0x4e6   :  { %5609 = vmatprep.mubr.f32.mxu0 %v13548_v22  ;;  %7645 = vmatprep.mubr.f32.mxu1 %v13548_v22 }
 0x4e9   :  { %5612 = vmatmul.mubr.f32.gmra.mrb[114].mxu0 %v13650_v61  ;;  %7648 = vmatmul.mubr.f32.gmra.mrb[114].mxu1 %v13650_v61  ;;  %v13660_v61 = vand.u32 4294901760, %v11790_v47  ;;  %v13665_v47 = vand.u32 4294901760, %v12128_v29  ;;  %v13669_v29 = vld [vmem:[#allocation19_spill] sm:$0xff] }
 0x4ea   :  { %5617 = vmatprep.mubr.f32.mxu0 %v13548_v22  ;;  %7653 = vmatprep.mubr.f32.mxu1 %v13548_v22 }
 0x4ed   :  { %5620 = vmatmul.mubr.f32.gmra.mrb[116].mxu0 %v13651_v48  ;;  %7656 = vmatmul.mubr.f32.gmra.mrb[116].mxu1 %v13651_v48  ;;  %v9025_v48 = vpack.c.bf16 %v13660_v61, %v13659_v26  ;;  %v13679_v26 = vld [vmem:[#allocation49_spill] sm:$0xff]  ;;  %v13680_v61 = vld [vmem:[#allocation52_spill] sm:$0xff] }
 0x4ee   :  { %5625 = vmatprep.mubr.f32.mxu0 %v13548_v22  ;;  %7661 = vmatprep.mubr.f32.mxu1 %v13548_v22 }
 0x4f1   :  { %5628 = vmatmul.mubr.f32.gmra.mrb[118].mxu0 %v13652_v38  ;;  %7664 = vmatmul.mubr.f32.gmra.mrb[118].mxu1 %v13652_v38  ;;  %v13661_v38 = vld [vmem:[#allocation9_spill] sm:$0xff] }
 0x4f2   :  { %5633 = vmatprep.mubr.f32.mxu0 %v13548_v22  ;;  %7669 = vmatprep.mubr.f32.mxu1 %v13548_v22 }
 0x4f5   :  { %5636 = vmatmul.mubr.f32.gmra.mrb[120].mxu0 %v13653_v63  ;;  %7672 = vmatmul.mubr.f32.gmra.mrb[120].mxu1 %v13653_v63  ;;  %v13666_v63 = vand.u32 4294901760, %v12132_v44  ;;  %v13672_v44 = vld [vmem:[#allocation28_spill] sm:$0xff] }
 0x4f6   :  { %5641 = vmatprep.mubr.f32.mxu0 %v13548_v22  ;;  %7677 = vmatprep.mubr.f32.mxu1 %v13548_v22 }
 0x4f9   :  { %5644 = vmatmul.mubr.f32.gmra.mrb[122].mxu0 %v13654_v30  ;;  %7680 = vmatmul.mubr.f32.gmra.mrb[122].mxu1 %v13654_v30  ;;  %v13673_v30 = vld [vmem:[#allocation31_spill] sm:$0xff] }
 0x4fa   :  { %5649 = vmatprep.mubr.f32.mxu0 %v13548_v22  ;;  %7685 = vmatprep.mubr.f32.mxu1 %v13548_v22 }
 0x4fd   :  { %5652 = vmatmul.mubr.f32.gmra.mrb[124].mxu0 %v13655_v24  ;;  %7688 = vmatmul.mubr.f32.gmra.mrb[124].mxu1 %v13655_v24  ;;  %v13674_v24 = vld [vmem:[#allocation34_spill] sm:$0xff] }
 0x4fe   :  { %5657 = vmatprep.mubr.f32.mxu0 %v13548_v22  ;;  %7693 = vmatprep.mubr.f32.mxu1 %v13548_v22 }
 0x501   :  { %5660 = vmatmul.mubr.f32.gmra.mrb[126].mxu0 %v13656_v53  ;;  %7696 = vmatmul.mubr.f32.gmra.mrb[126].mxu1 %v13656_v53  ;;  %v13675_v53 = vld [vmem:[#allocation37_spill] sm:$0xff] }
 0x502   :  { %5736 = vmatprep.mubr.f32.mxu0 %v13548_v22  ;;  %7772 = vmatprep.mubr.f32.mxu1 %v13548_v22 }
 0x505   :  { %5740 = vmatmul.mubr.f32.vlgmr.msra.gmra.mrb[64].mxu0 %v13661_v38  ;;  %7776 = vmatmul.mubr.f32.vlgmr.msra.gmra.mrb[64].mxu1 %v13661_v38  ;;  %v13682_v38 = vld [vmem:[#allocation58_spill] sm:$0xff] }
 0x506   :  { %9002 = vmatpush1.bf16.msra.mxu0 %v9001_v23  ;;  %9026 = vmatpush1.bf16.msra.mxu1 %v9025_v48  ;;  %v13678_v23 = vld [vmem:[#allocation46_spill] sm:$0xff]  ;;  %v13681_v48 = vld [vmem:[#allocation55_spill] sm:$0xff] }
 0x507   :  { %5745 = vmatprep.mubr.f32.mxu0 %v13548_v22  ;;  %7781 = vmatprep.mubr.f32.mxu1 %v13548_v22 }
 0x508   :  { %6044 = vmatprep.subr.mxu0 %v13662_v13  ;;  %8080 = vmatprep.subr.mxu1 %v13663_v37  ;;  %v13683_v13 = vld [vmem:[#allocation61_spill] sm:$0xff]  ;;  %v13684_v37 = vld [vmem:[#allocation64_spill] sm:$0xff] }
 0x509   :  { %5749 = vmatmul.mubr.f32.gmra.mrb[66].mxu0 %v13664_v5  ;;  %7785 = vmatmul.mubr.f32.gmra.mrb[66].mxu1 %v13664_v5  ;;  %v13685_v5 = vld [vmem:[#allocation67_spill] sm:$0xff] }
 0x50a   :  { %5754 = vmatprep.mubr.f32.mxu0 %v13548_v22  ;;  %7790 = vmatprep.mubr.f32.mxu1 %v13548_v22 }
 0x50b   :  { %6048 = vmatpush1.msra.mxu0 %v13665_v47  ;;  %8084 = vmatpush1.msra.mxu1 %v13666_v63  ;;  %v13686_v47 = vld [vmem:[#allocation70_spill] sm:$0xff]  ;;  %v13687_v63 = vld [vmem:[#allocation73_spill] sm:$0xff] }
 0x50c   :  { %9004 = vmatprep.subr.bf16.mxu0 %v11759_v41  ;;  %9028 = vmatprep.subr.bf16.mxu1 %v11764_v7  ;;  %v13670_v41 = vld [vmem:[#allocation22_spill] sm:$0xff]  ;;  %v13671_v7 = vld [vmem:[#allocation25_spill] sm:$0xff] }
 0x50d   :  { %5758 = vmatmul.mubr.f32.gmra.mrb[68].mxu0 %v13667_v0  ;;  %7794 = vmatmul.mubr.f32.gmra.mrb[68].mxu1 %v13667_v0  ;;  %v13688_v0 = vld [vmem:[#allocation76_spill] sm:$0xff] }
 0x50e   :  { %5763 = vmatprep.mubr.f32.mxu0 %v13548_v22  ;;  %7799 = vmatprep.mubr.f32.mxu1 %v13548_v22 }
 0x511   :  { %5767 = vmatmul.mubr.f32.gmra.mrb[70].mxu0 %v13668_v4  ;;  %7803 = vmatmul.mubr.f32.gmra.mrb[70].mxu1 %v13668_v4  ;;  %v13689_v4 = vld [vmem:[#allocation79_spill] sm:$0xff] }
 0x512   :  { %5772 = vmatprep.mubr.f32.mxu0 %v13548_v22  ;;  %7808 = vmatprep.mubr.f32.mxu1 %v13548_v22 }
 0x515   :  { %5776 = vmatmul.mubr.f32.gmra.mrb[72].mxu0 %v13669_v29  ;;  %7812 = vmatmul.mubr.f32.gmra.mrb[72].mxu1 %v13669_v29  ;;  %v13690_v29 = vld [vmem:[#allocation82_spill] sm:$0xff] }
 0x516   :  { %5781 = vmatprep.mubr.f32.mxu0 %v13548_v22  ;;  %7817 = vmatprep.mubr.f32.mxu1 %v13548_v22 }
 0x519   :  { %5785 = vmatmul.mubr.f32.gmra.mrb[74].mxu0 %v13670_v41  ;;  %7821 = vmatmul.mubr.f32.gmra.mrb[74].mxu1 %v13670_v41  ;;  %v13691_v41 = vld [vmem:[#allocation85_spill] sm:$0xff] }
 0x51a   :  { %5790 = vmatprep.mubr.f32.mxu0 %v13548_v22  ;;  %7826 = vmatprep.mubr.f32.mxu1 %v13548_v22 }
 0x51d   :  { %5794 = vmatmul.mubr.f32.gmra.mrb[76].mxu0 %v13671_v7  ;;  %7830 = vmatmul.mubr.f32.gmra.mrb[76].mxu1 %v13671_v7  ;;  %v13692_v7 = vld [vmem:[#allocation88_spill] sm:$0xff] }
 0x51e   :  { %5799 = vmatprep.mubr.f32.mxu0 %v13548_v22  ;;  %7835 = vmatprep.mubr.f32.mxu1 %v13548_v22 }
 0x521   :  { %5803 = vmatmul.mubr.f32.gmra.mrb[78].mxu0 %v13672_v44  ;;  %7839 = vmatmul.mubr.f32.gmra.mrb[78].mxu1 %v13672_v44  ;;  %v13693_v44 = vld [vmem:[#allocation91_spill] sm:$0xff] }
 0x522   :  { %5808 = vmatprep.mubr.f32.mxu0 %v13548_v22  ;;  %7844 = vmatprep.mubr.f32.mxu1 %v13548_v22 }
 0x525   :  { %5812 = vmatmul.mubr.f32.gmra.mrb[80].mxu0 %v13673_v30  ;;  %7848 = vmatmul.mubr.f32.gmra.mrb[80].mxu1 %v13673_v30  ;;  %v13694_v30 = vld [vmem:[#allocation95_spill] sm:$0xff] }
 0x526   :  { %5817 = vmatprep.mubr.f32.mxu0 %v13548_v22  ;;  %7853 = vmatprep.mubr.f32.mxu1 %v13548_v22 }
 0x529   :  { %5821 = vmatmul.mubr.f32.gmra.mrb[82].mxu0 %v13674_v24  ;;  %7857 = vmatmul.mubr.f32.gmra.mrb[82].mxu1 %v13674_v24  ;;  %v13695_v24 = vld [vmem:[#allocation99_spill] sm:$0xff] }
 0x52a   :  { %5826 = vmatprep.mubr.f32.mxu0 %v13548_v22  ;;  %7862 = vmatprep.mubr.f32.mxu1 %v13548_v22 }
 0x52d   :  { %5830 = vmatmul.mubr.f32.gmra.mrb[84].mxu0 %v13675_v53  ;;  %7866 = vmatmul.mubr.f32.gmra.mrb[84].mxu1 %v13675_v53  ;;  %v13696_v53 = vld [vmem:[#allocation102_spill] sm:$0xff] }
 0x52e   :  { %5835 = vmatprep.mubr.f32.mxu0 %v13548_v22  ;;  %7871 = vmatprep.mubr.f32.mxu1 %v13548_v22 }
 0x531   :  { %5839 = vmatmul.mubr.f32.gmra.mrb[86].mxu0 %v13676_v39  ;;  %7875 = vmatmul.mubr.f32.gmra.mrb[86].mxu1 %v13676_v39 }
 0x532   :  { %5844 = vmatprep.mubr.f32.mxu0 %v13548_v22  ;;  %7880 = vmatprep.mubr.f32.mxu1 %v13548_v22 }
 0x535   :  { %5848 = vmatmul.mubr.f32.gmra.mrb[88].mxu0 %v13677_v34  ;;  %7884 = vmatmul.mubr.f32.gmra.mrb[88].mxu1 %v13677_v34 }
 0x536   :  { %5853 = vmatprep.mubr.f32.mxu0 %v13548_v22  ;;  %7889 = vmatprep.mubr.f32.mxu1 %v13548_v22 }
 0x539   :  { %5857 = vmatmul.mubr.f32.gmra.mrb[90].mxu0 %v13678_v23  ;;  %7893 = vmatmul.mubr.f32.gmra.mrb[90].mxu1 %v13678_v23 }
 0x53a   :  { %5862 = vmatprep.mubr.f32.mxu0 %v13548_v22  ;;  %7898 = vmatprep.mubr.f32.mxu1 %v13548_v22 }
 0x53d   :  { %5866 = vmatmul.mubr.f32.gmra.mrb[92].mxu0 %v13679_v26  ;;  %7902 = vmatmul.mubr.f32.gmra.mrb[92].mxu1 %v13679_v26 }
 0x53e   :  { %5871 = vmatprep.mubr.f32.mxu0 %v13548_v22  ;;  %7907 = vmatprep.mubr.f32.mxu1 %v13548_v22 }
 0x541   :  { %5875 = vmatmul.mubr.f32.gmra.mrb[94].mxu0 %v13680_v61  ;;  %7911 = vmatmul.mubr.f32.gmra.mrb[94].mxu1 %v13680_v61 }
 0x542   :  { %5880 = vmatprep.mubr.f32.mxu0 %v13548_v22  ;;  %7916 = vmatprep.mubr.f32.mxu1 %v13548_v22 }
 0x545   :  { %5884 = vmatmul.mubr.f32.gmra.mrb[96].mxu0 %v13681_v48  ;;  %7920 = vmatmul.mubr.f32.gmra.mrb[96].mxu1 %v13681_v48 }
 0x546   :  { %5889 = vmatprep.mubr.f32.mxu0 %v13548_v22  ;;  %7925 = vmatprep.mubr.f32.mxu1 %v13548_v22 }
 0x549   :  { %5893 = vmatmul.mubr.f32.gmra.mrb[98].mxu0 %v13682_v38  ;;  %7929 = vmatmul.mubr.f32.gmra.mrb[98].mxu1 %v13682_v38 }
 0x54a   :  { %5898 = vmatprep.mubr.f32.mxu0 %v13548_v22  ;;  %7934 = vmatprep.mubr.f32.mxu1 %v13548_v22 }
 0x54d   :  { %5902 = vmatmul.mubr.f32.gmra.mrb[100].mxu0 %v13683_v13  ;;  %7938 = vmatmul.mubr.f32.gmra.mrb[100].mxu1 %v13683_v13 }
 0x54e   :  { %5907 = vmatprep.mubr.f32.mxu0 %v13548_v22  ;;  %7943 = vmatprep.mubr.f32.mxu1 %v13548_v22 }
 0x551   :  { %5911 = vmatmul.mubr.f32.gmra.mrb[102].mxu0 %v13684_v37  ;;  %7947 = vmatmul.mubr.f32.gmra.mrb[102].mxu1 %v13684_v37  ;;  %v13701_v37 = vld [vmem:[#allocation24_spill] sm:$0xff] }
 0x552   :  { %5916 = vmatprep.mubr.f32.mxu0 %v13548_v22  ;;  %7952 = vmatprep.mubr.f32.mxu1 %v13548_v22 }
 0x555   :  { %5920 = vmatmul.mubr.f32.gmra.mrb[104].mxu0 %v13685_v5  ;;  %7956 = vmatmul.mubr.f32.gmra.mrb[104].mxu1 %v13685_v5 }
 0x556   :  { %5925 = vmatprep.mubr.f32.mxu0 %v13548_v22  ;;  %7961 = vmatprep.mubr.f32.mxu1 %v13548_v22 }
 0x559   :  { %5929 = vmatmul.mubr.f32.gmra.mrb[106].mxu0 %v13686_v47  ;;  %7965 = vmatmul.mubr.f32.gmra.mrb[106].mxu1 %v13686_v47 }
 0x55a   :  { %5934 = vmatprep.mubr.f32.mxu0 %v13548_v22  ;;  %7970 = vmatprep.mubr.f32.mxu1 %v13548_v22 }
 0x55d   :  { %5938 = vmatmul.mubr.f32.gmra.mrb[108].mxu0 %v13687_v63  ;;  %7974 = vmatmul.mubr.f32.gmra.mrb[108].mxu1 %v13687_v63 }
 0x55e   :  { %5943 = vmatprep.mubr.f32.mxu0 %v13548_v22  ;;  %7979 = vmatprep.mubr.f32.mxu1 %v13548_v22 }
 0x561   :  { %5947 = vmatmul.mubr.f32.gmra.mrb[110].mxu0 %v13688_v0  ;;  %7983 = vmatmul.mubr.f32.gmra.mrb[110].mxu1 %v13688_v0 }
 0x562   :  { %5952 = vmatprep.mubr.f32.mxu0 %v13548_v22  ;;  %7988 = vmatprep.mubr.f32.mxu1 %v13548_v22 }
 0x565   :  { %5956 = vmatmul.mubr.f32.gmra.mrb[112].mxu0 %v13689_v4  ;;  %7992 = vmatmul.mubr.f32.gmra.mrb[112].mxu1 %v13689_v4 }
 0x566   :  { %5961 = vmatprep.mubr.f32.mxu0 %v13548_v22  ;;  %7997 = vmatprep.mubr.f32.mxu1 %v13548_v22 }
 0x569   :  { %5965 = vmatmul.mubr.f32.gmra.mrb[114].mxu0 %v13690_v29  ;;  %8001 = vmatmul.mubr.f32.gmra.mrb[114].mxu1 %v13690_v29 }
 0x56a   :  { %5970 = vmatprep.mubr.f32.mxu0 %v13548_v22  ;;  %8006 = vmatprep.mubr.f32.mxu1 %v13548_v22 }
 0x56d   :  { %5974 = vmatmul.mubr.f32.gmra.mrb[116].mxu0 %v13691_v41  ;;  %8010 = vmatmul.mubr.f32.gmra.mrb[116].mxu1 %v13691_v41 }
 0x56e   :  { %5979 = vmatprep.mubr.f32.mxu0 %v13548_v22  ;;  %8015 = vmatprep.mubr.f32.mxu1 %v13548_v22 }
 0x571   :  { %5983 = vmatmul.mubr.f32.gmra.mrb[118].mxu0 %v13692_v7  ;;  %8019 = vmatmul.mubr.f32.gmra.mrb[118].mxu1 %v13692_v7 }
 0x572   :  { %5988 = vmatprep.mubr.f32.mxu0 %v13548_v22  ;;  %8024 = vmatprep.mubr.f32.mxu1 %v13548_v22 }
 0x575   :  { %5992 = vmatmul.mubr.f32.gmra.mrb[120].mxu0 %v13693_v44  ;;  %8028 = vmatmul.mubr.f32.gmra.mrb[120].mxu1 %v13693_v44  ;;  %v13702_v44 = vld [vmem:[#allocation27_spill] sm:$0xff] }
 0x576   :  { %5997 = vmatprep.mubr.f32.mxu0 %v13548_v22  ;;  %8033 = vmatprep.mubr.f32.mxu1 %v13548_v22 }
 0x579   :  { %6001 = vmatmul.mubr.f32.gmra.mrb[122].mxu0 %v13694_v30  ;;  %8037 = vmatmul.mubr.f32.gmra.mrb[122].mxu1 %v13694_v30 }
 0x57a   :  { %6006 = vmatprep.mubr.f32.mxu0 %v13548_v22  ;;  %8042 = vmatprep.mubr.f32.mxu1 %v13548_v22 }
 0x57d   :  { %6010 = vmatmul.mubr.f32.gmra.mrb[124].mxu0 %v13695_v24  ;;  %8046 = vmatmul.mubr.f32.gmra.mrb[124].mxu1 %v13695_v24 }
 0x57e   :  { %6015 = vmatprep.mubr.f32.mxu0 %v13548_v22  ;;  %8051 = vmatprep.mubr.f32.mxu1 %v13548_v22 }
 0x581   :  { %6019 = vmatmul.mubr.f32.gmra.mrb[126].mxu0 %v13696_v53  ;;  %8055 = vmatmul.mubr.f32.gmra.mrb[126].mxu1 %v13696_v53 }
 0x582   :  { %6107 = vmatprep.mubr.f32.mxu0 %v13548_v22  ;;  %8143 = vmatprep.mubr.f32.mxu1 %v13548_v22 }
 0x585   :  { %6109 = vmatmul.mubr.f32.vlgmr.msra.gmra.mrb[64].mxu0 %v10660_v56  ;;  %8145 = vmatmul.mubr.f32.vlgmr.msra.gmra.mrb[64].mxu1 %v10660_v56 }
 0x586   :  { %9006 = vmatpush1.bf16.msra.mxu0 %v11928_v46  ;;  %9030 = vmatpush1.bf16.msra.mxu1 %v11934_v27 }
 0x587   :  { %6114 = vmatprep.mubr.f32.mxu0 %v13548_v22  ;;  %8150 = vmatprep.mubr.f32.mxu1 %v13548_v22 }
 0x588   :  { %6341 = vmatprep.subr.mxu0 %v13618_v57  ;;  %8377 = vmatprep.subr.mxu1 %v13619_v49 }
 0x589   :  { %6116 = vmatmul.mubr.f32.gmra.mrb[66].mxu0 %v10658_v55  ;;  %8152 = vmatmul.mubr.f32.gmra.mrb[66].mxu1 %v10658_v55 }
 0x58a   :  { %6121 = vmatprep.mubr.f32.mxu0 %v13548_v22  ;;  %8157 = vmatprep.mubr.f32.mxu1 %v13548_v22 }
 0x58b   :  { %6343 = vmatpush1.msra.mxu0 %v13625_v45  ;;  %8379 = vmatpush1.msra.mxu1 %v13626_v52  ;;  %v13700_v52 = vld [vmem:[#allocation21_spill] sm:$0xff] }
 0x58d   :  { %6123 = vmatmul.mubr.f32.gmra.mrb[68].mxu0 %v10687_v11  ;;  %8159 = vmatmul.mubr.f32.gmra.mrb[68].mxu1 %v10687_v11 }
 0x58e   :  { %6128 = vmatprep.mubr.f32.mxu0 %v13548_v22  ;;  %8164 = vmatprep.mubr.f32.mxu1 %v13548_v22 }
 0x591   :  { %6130 = vmatmul.mubr.f32.gmra.mrb[70].mxu0 %v10713_v58  ;;  %8166 = vmatmul.mubr.f32.gmra.mrb[70].mxu1 %v10713_v58 }
 0x592   :  { %6135 = vmatprep.mubr.f32.mxu0 %v13548_v22  ;;  %8171 = vmatprep.mubr.f32.mxu1 %v13548_v22 }
 0x595   :  { %6137 = vmatmul.mubr.f32.gmra.mrb[72].mxu0 %v10732_v21  ;;  %8173 = vmatmul.mubr.f32.gmra.mrb[72].mxu1 %v10732_v21 }
 0x596   :  { %6142 = vmatprep.mubr.f32.mxu0 %v13548_v22  ;;  %8178 = vmatprep.mubr.f32.mxu1 %v13548_v22 }
 0x599   :  { %6144 = vmatmul.mubr.f32.gmra.mrb[74].mxu0 %v10755_v43  ;;  %8180 = vmatmul.mubr.f32.gmra.mrb[74].mxu1 %v10755_v43 }
 0x59a   :  { %6149 = vmatprep.mubr.f32.mxu0 %v13548_v22  ;;  %8185 = vmatprep.mubr.f32.mxu1 %v13548_v22 }
 0x59d   :  { %6151 = vmatmul.mubr.f32.gmra.mrb[76].mxu0 %v10774_v40  ;;  %8187 = vmatmul.mubr.f32.gmra.mrb[76].mxu1 %v10774_v40 }
 0x59e   :  { %6156 = vmatprep.mubr.f32.mxu0 %v13548_v22  ;;  %8192 = vmatprep.mubr.f32.mxu1 %v13548_v22 }
 0x5a1   :  { %6158 = vmatmul.mubr.f32.gmra.mrb[78].mxu0 %v10793_v6  ;;  %8194 = vmatmul.mubr.f32.gmra.mrb[78].mxu1 %v10793_v6 }
 0x5a2   :  { %6163 = vmatprep.mubr.f32.mxu0 %v13548_v22  ;;  %8199 = vmatprep.mubr.f32.mxu1 %v13548_v22 }
 0x5a5   :  { %6165 = vmatmul.mubr.f32.gmra.mrb[80].mxu0 %v10812_v17  ;;  %8201 = vmatmul.mubr.f32.gmra.mrb[80].mxu1 %v10812_v17 }
 0x5a6   :  { %6170 = vmatprep.mubr.f32.mxu0 %v13548_v22  ;;  %8206 = vmatprep.mubr.f32.mxu1 %v13548_v22 }
 0x5a9   :  { %6172 = vmatmul.mubr.f32.gmra.mrb[82].mxu0 %v10831_v51  ;;  %8208 = vmatmul.mubr.f32.gmra.mrb[82].mxu1 %v10831_v51 }
 0x5aa   :  { %6177 = vmatprep.mubr.f32.mxu0 %v13548_v22  ;;  %8213 = vmatprep.mubr.f32.mxu1 %v13548_v22 }
 0x5ad   :  { %6179 = vmatmul.mubr.f32.gmra.mrb[84].mxu0 %v10850_v10  ;;  %8215 = vmatmul.mubr.f32.gmra.mrb[84].mxu1 %v10850_v10 }
 0x5ae   :  { %6184 = vmatprep.mubr.f32.mxu0 %v13548_v22  ;;  %8220 = vmatprep.mubr.f32.mxu1 %v13548_v22 }
 0x5b1   :  { %6186 = vmatmul.mubr.f32.gmra.mrb[86].mxu0 %v10869_v16  ;;  %8222 = vmatmul.mubr.f32.gmra.mrb[86].mxu1 %v10869_v16 }
 0x5b2   :  { %6191 = vmatprep.mubr.f32.mxu0 %v13548_v22  ;;  %8227 = vmatprep.mubr.f32.mxu1 %v13548_v22 }
 0x5b5   :  { %6193 = vmatmul.mubr.f32.gmra.mrb[88].mxu0 %v10888_v3  ;;  %8229 = vmatmul.mubr.f32.gmra.mrb[88].mxu1 %v10888_v3 }
 0x5b6   :  { %6198 = vmatprep.mubr.f32.mxu0 %v13548_v22  ;;  %8234 = vmatprep.mubr.f32.mxu1 %v13548_v22 }
 0x5b9   :  { %6200 = vmatmul.mubr.f32.gmra.mrb[90].mxu0 %v10907_v20  ;;  %8236 = vmatmul.mubr.f32.gmra.mrb[90].mxu1 %v10907_v20 }
 0x5ba   :  { %6205 = vmatprep.mubr.f32.mxu0 %v13548_v22  ;;  %8241 = vmatprep.mubr.f32.mxu1 %v13548_v22 }
 0x5bd   :  { %6207 = vmatmul.mubr.f32.gmra.mrb[92].mxu0 %v10926_v35  ;;  %8243 = vmatmul.mubr.f32.gmra.mrb[92].mxu1 %v10926_v35 }
 0x5be   :  { %6212 = vmatprep.mubr.f32.mxu0 %v13548_v22  ;;  %8248 = vmatprep.mubr.f32.mxu1 %v13548_v22 }
 0x5c1   :  { %6214 = vmatmul.mubr.f32.gmra.mrb[94].mxu0 %v10945_v1  ;;  %8250 = vmatmul.mubr.f32.gmra.mrb[94].mxu1 %v10945_v1 }
 0x5c2   :  { %6219 = vmatprep.mubr.f32.mxu0 %v13548_v22  ;;  %8255 = vmatprep.mubr.f32.mxu1 %v13548_v22 }
 0x5c5   :  { %6221 = vmatmul.mubr.f32.gmra.mrb[96].mxu0 %v10964_v8  ;;  %8257 = vmatmul.mubr.f32.gmra.mrb[96].mxu1 %v10964_v8 }
 0x5c6   :  { %6226 = vmatprep.mubr.f32.mxu0 %v13548_v22  ;;  %8262 = vmatprep.mubr.f32.mxu1 %v13548_v22 }
 0x5c9   :  { %6228 = vmatmul.mubr.f32.gmra.mrb[98].mxu0 %v10983_v2  ;;  %8264 = vmatmul.mubr.f32.gmra.mrb[98].mxu1 %v10983_v2 }
 0x5ca   :  { %6233 = vmatprep.mubr.f32.mxu0 %v13548_v22  ;;  %8269 = vmatprep.mubr.f32.mxu1 %v13548_v22 }
 0x5cd   :  { %6235 = vmatmul.mubr.f32.gmra.mrb[100].mxu0 %v11002_v36  ;;  %8271 = vmatmul.mubr.f32.gmra.mrb[100].mxu1 %v11002_v36 }
 0x5ce   :  { %6240 = vmatprep.mubr.f32.mxu0 %v13548_v22  ;;  %8276 = vmatprep.mubr.f32.mxu1 %v13548_v22 }
 0x5d1   :  { %6242 = vmatmul.mubr.f32.gmra.mrb[102].mxu0 %v11021_v59  ;;  %8278 = vmatmul.mubr.f32.gmra.mrb[102].mxu1 %v11021_v59 }
 0x5d2   :  { %6247 = vmatprep.mubr.f32.mxu0 %v13548_v22  ;;  %8283 = vmatprep.mubr.f32.mxu1 %v13548_v22 }
 0x5d5   :  { %6249 = vmatmul.mubr.f32.gmra.mrb[104].mxu0 %v11040_v62  ;;  %8285 = vmatmul.mubr.f32.gmra.mrb[104].mxu1 %v11040_v62 }
 0x5d6   :  { %6254 = vmatprep.mubr.f32.mxu0 %v13548_v22  ;;  %8290 = vmatprep.mubr.f32.mxu1 %v13548_v22 }
 0x5d9   :  { %6256 = vmatmul.mubr.f32.gmra.mrb[106].mxu0 %v11059_v14  ;;  %8292 = vmatmul.mubr.f32.gmra.mrb[106].mxu1 %v11059_v14 }
 0x5da   :  { %6261 = vmatprep.mubr.f32.mxu0 %v13548_v22  ;;  %8297 = vmatprep.mubr.f32.mxu1 %v13548_v22 }
 0x5dd   :  { %6263 = vmatmul.mubr.f32.gmra.mrb[108].mxu0 %v11078_v50  ;;  %8299 = vmatmul.mubr.f32.gmra.mrb[108].mxu1 %v11078_v50 }
 0x5de   :  { %6268 = vmatprep.mubr.f32.mxu0 %v13548_v22  ;;  %8304 = vmatprep.mubr.f32.mxu1 %v13548_v22 }
 0x5e1   :  { %6270 = vmatmul.mubr.f32.gmra.mrb[110].mxu0 %v11097_v33  ;;  %8306 = vmatmul.mubr.f32.gmra.mrb[110].mxu1 %v11097_v33 }
 0x5e2   :  { %6275 = vmatprep.mubr.f32.mxu0 %v13548_v22  ;;  %8311 = vmatprep.mubr.f32.mxu1 %v13548_v22 }
 0x5e5   :  { %6277 = vmatmul.mubr.f32.gmra.mrb[112].mxu0 %v11116_v28  ;;  %8313 = vmatmul.mubr.f32.gmra.mrb[112].mxu1 %v11116_v28 }
 0x5e6   :  { %6282 = vmatprep.mubr.f32.mxu0 %v13548_v22  ;;  %8318 = vmatprep.mubr.f32.mxu1 %v13548_v22 }
 0x5e9   :  { %6284 = vmatmul.mubr.f32.gmra.mrb[114].mxu0 %v11135_v15  ;;  %8320 = vmatmul.mubr.f32.gmra.mrb[114].mxu1 %v11135_v15 }
 0x5ea   :  { %6289 = vmatprep.mubr.f32.mxu0 %v13548_v22  ;;  %8325 = vmatprep.mubr.f32.mxu1 %v13548_v22 }
 0x5ed   :  { %6291 = vmatmul.mubr.f32.gmra.mrb[116].mxu0 %v11154_v60  ;;  %8327 = vmatmul.mubr.f32.gmra.mrb[116].mxu1 %v11154_v60 }
 0x5ee   :  { %6296 = vmatprep.mubr.f32.mxu0 %v13548_v22  ;;  %8332 = vmatprep.mubr.f32.mxu1 %v13548_v22 }
 0x5f1   :  { %6298 = vmatmul.mubr.f32.gmra.mrb[118].mxu0 %v11173_v25  ;;  %8334 = vmatmul.mubr.f32.gmra.mrb[118].mxu1 %v11173_v25 }
 0x5f2   :  { %6303 = vmatprep.mubr.f32.mxu0 %v13548_v22  ;;  %8339 = vmatprep.mubr.f32.mxu1 %v13548_v22 }
 0x5f5   :  { %6305 = vmatmul.mubr.f32.gmra.mrb[120].mxu0 %v11192_v9  ;;  %8341 = vmatmul.mubr.f32.gmra.mrb[120].mxu1 %v11192_v9 }
 0x5f6   :  { %6310 = vmatprep.mubr.f32.mxu0 %v13548_v22  ;;  %8346 = vmatprep.mubr.f32.mxu1 %v13548_v22 }
 0x5f9   :  { %6312 = vmatmul.mubr.f32.gmra.mrb[122].mxu0 %v11211_v18  ;;  %8348 = vmatmul.mubr.f32.gmra.mrb[122].mxu1 %v11211_v18 }
 0x5fa   :  { %6317 = vmatprep.mubr.f32.mxu0 %v13548_v22  ;;  %8353 = vmatprep.mubr.f32.mxu1 %v13548_v22 }
 0x5fd   :  { %6319 = vmatmul.mubr.f32.gmra.mrb[124].mxu0 %v13549_v54  ;;  %8355 = vmatmul.mubr.f32.gmra.mrb[124].mxu1 %v13549_v54 }
 0x5fe   :  { %6324 = vmatprep.mubr.f32.mxu0 %v13548_v22  ;;  %8360 = vmatprep.mubr.f32.mxu1 %v13548_v22 }
 0x601   :  { %6326 = vmatmul.mubr.f32.gmra.mrb[126].mxu0 %v13550_v42  ;;  %8362 = vmatmul.mubr.f32.gmra.mrb[126].mxu1 %v13550_v42 }
 0x602   :  { %6402 = vmatprep.mubr.f32.mxu0 %v13548_v22  ;;  %8438 = vmatprep.mubr.f32.mxu1 %v13548_v22 }
 0x605   :  { %6404 = vmatmul.mubr.f32.vlgmr.msra.gmra.mrb[64].mxu0 %v10660_v56  ;;  %8440 = vmatmul.mubr.f32.vlgmr.msra.gmra.mrb[64].mxu1 %v10660_v56 }
 0x606   :  { %6409 = vmatprep.mubr.f32.mxu0 %v13548_v22  ;;  %8445 = vmatprep.mubr.f32.mxu1 %v13548_v22 }
 0x609   :  { %6411 = vmatmul.mubr.f32.gmra.mrb[66].mxu0 %v10658_v55  ;;  %8447 = vmatmul.mubr.f32.gmra.mrb[66].mxu1 %v10658_v55 }
 0x60a   :  { %6416 = vmatprep.mubr.f32.mxu0 %v13548_v22  ;;  %8452 = vmatprep.mubr.f32.mxu1 %v13548_v22 }
 0x60d   :  { %6418 = vmatmul.mubr.f32.gmra.mrb[68].mxu0 %v10687_v11  ;;  %8454 = vmatmul.mubr.f32.gmra.mrb[68].mxu1 %v10687_v11 }
 0x60e   :  { %6423 = vmatprep.mubr.f32.mxu0 %v13548_v22  ;;  %8459 = vmatprep.mubr.f32.mxu1 %v13548_v22 }
 0x611   :  { %6425 = vmatmul.mubr.f32.gmra.mrb[70].mxu0 %v10713_v58  ;;  %8461 = vmatmul.mubr.f32.gmra.mrb[70].mxu1 %v10713_v58 }
 0x612   :  { %6430 = vmatprep.mubr.f32.mxu0 %v13548_v22  ;;  %8466 = vmatprep.mubr.f32.mxu1 %v13548_v22 }
 0x615   :  { %6432 = vmatmul.mubr.f32.gmra.mrb[72].mxu0 %v10732_v21  ;;  %8468 = vmatmul.mubr.f32.gmra.mrb[72].mxu1 %v10732_v21  ;;  %v13697_v21 = vld [vmem:[#allocation12_spill] sm:$0xff] }
 0x616   :  { %6437 = vmatprep.mubr.f32.mxu0 %v13548_v22  ;;  %8473 = vmatprep.mubr.f32.mxu1 %v13548_v22 }
 0x619   :  { %6439 = vmatmul.mubr.f32.gmra.mrb[74].mxu0 %v10755_v43  ;;  %8475 = vmatmul.mubr.f32.gmra.mrb[74].mxu1 %v10755_v43 }
 0x61a   :  { %6444 = vmatprep.mubr.f32.mxu0 %v13548_v22  ;;  %8480 = vmatprep.mubr.f32.mxu1 %v13548_v22 }
 0x61d   :  { %6446 = vmatmul.mubr.f32.gmra.mrb[76].mxu0 %v10774_v40  ;;  %8482 = vmatmul.mubr.f32.gmra.mrb[76].mxu1 %v10774_v40 }
 0x61e   :  { %6451 = vmatprep.mubr.f32.mxu0 %v13548_v22  ;;  %8487 = vmatprep.mubr.f32.mxu1 %v13548_v22 }
 0x621   :  { %6453 = vmatmul.mubr.f32.gmra.mrb[78].mxu0 %v10793_v6  ;;  %8489 = vmatmul.mubr.f32.gmra.mrb[78].mxu1 %v10793_v6 }
 0x622   :  { %6458 = vmatprep.mubr.f32.mxu0 %v13548_v22  ;;  %8494 = vmatprep.mubr.f32.mxu1 %v13548_v22 }
 0x625   :  { %6460 = vmatmul.mubr.f32.gmra.mrb[80].mxu0 %v10812_v17  ;;  %8496 = vmatmul.mubr.f32.gmra.mrb[80].mxu1 %v10812_v17 }
 0x626   :  { %6465 = vmatprep.mubr.f32.mxu0 %v13548_v22  ;;  %8501 = vmatprep.mubr.f32.mxu1 %v13548_v22 }
 0x629   :  { %6467 = vmatmul.mubr.f32.gmra.mrb[82].mxu0 %v10831_v51  ;;  %8503 = vmatmul.mubr.f32.gmra.mrb[82].mxu1 %v10831_v51 }
 0x62a   :  { %6472 = vmatprep.mubr.f32.mxu0 %v13548_v22  ;;  %8508 = vmatprep.mubr.f32.mxu1 %v13548_v22 }
 0x62d   :  { %6474 = vmatmul.mubr.f32.gmra.mrb[84].mxu0 %v10850_v10  ;;  %8510 = vmatmul.mubr.f32.gmra.mrb[84].mxu1 %v10850_v10 }
 0x62e   :  { %6479 = vmatprep.mubr.f32.mxu0 %v13548_v22  ;;  %8515 = vmatprep.mubr.f32.mxu1 %v13548_v22 }
 0x631   :  { %6481 = vmatmul.mubr.f32.gmra.mrb[86].mxu0 %v10869_v16  ;;  %8517 = vmatmul.mubr.f32.gmra.mrb[86].mxu1 %v10869_v16 }
 0x632   :  { %6486 = vmatprep.mubr.f32.mxu0 %v13548_v22  ;;  %8522 = vmatprep.mubr.f32.mxu1 %v13548_v22 }
 0x635   :  { %6488 = vmatmul.mubr.f32.gmra.mrb[88].mxu0 %v10888_v3  ;;  %8524 = vmatmul.mubr.f32.gmra.mrb[88].mxu1 %v10888_v3 }
 0x636   :  { %6493 = vmatprep.mubr.f32.mxu0 %v13548_v22  ;;  %8529 = vmatprep.mubr.f32.mxu1 %v13548_v22 }
 0x639   :  { %6495 = vmatmul.mubr.f32.gmra.mrb[90].mxu0 %v10907_v20  ;;  %8531 = vmatmul.mubr.f32.gmra.mrb[90].mxu1 %v10907_v20 }
 0x63a   :  { %6500 = vmatprep.mubr.f32.mxu0 %v13548_v22  ;;  %8536 = vmatprep.mubr.f32.mxu1 %v13548_v22 }
 0x63d   :  { %6502 = vmatmul.mubr.f32.gmra.mrb[92].mxu0 %v10926_v35  ;;  %8538 = vmatmul.mubr.f32.gmra.mrb[92].mxu1 %v10926_v35 }
 0x63e   :  { %6507 = vmatprep.mubr.f32.mxu0 %v13548_v22  ;;  %8543 = vmatprep.mubr.f32.mxu1 %v13548_v22 }
 0x641   :  { %6509 = vmatmul.mubr.f32.gmra.mrb[94].mxu0 %v10945_v1  ;;  %8545 = vmatmul.mubr.f32.gmra.mrb[94].mxu1 %v10945_v1 }
 0x642   :  { %6514 = vmatprep.mubr.f32.mxu0 %v13548_v22  ;;  %8550 = vmatprep.mubr.f32.mxu1 %v13548_v22 }
 0x645   :  { %6516 = vmatmul.mubr.f32.gmra.mrb[96].mxu0 %v10964_v8  ;;  %8552 = vmatmul.mubr.f32.gmra.mrb[96].mxu1 %v10964_v8 }
 0x646   :  { %6521 = vmatprep.mubr.f32.mxu0 %v13548_v22  ;;  %8557 = vmatprep.mubr.f32.mxu1 %v13548_v22 }
 0x649   :  { %6523 = vmatmul.mubr.f32.gmra.mrb[98].mxu0 %v10983_v2  ;;  %8559 = vmatmul.mubr.f32.gmra.mrb[98].mxu1 %v10983_v2 }
 0x64a   :  { %6528 = vmatprep.mubr.f32.mxu0 %v13548_v22  ;;  %8564 = vmatprep.mubr.f32.mxu1 %v13548_v22 }
 0x64d   :  { %6530 = vmatmul.mubr.f32.gmra.mrb[100].mxu0 %v11002_v36  ;;  %8566 = vmatmul.mubr.f32.gmra.mrb[100].mxu1 %v11002_v36 }
 0x64e   :  { %6535 = vmatprep.mubr.f32.mxu0 %v13548_v22  ;;  %8571 = vmatprep.mubr.f32.mxu1 %v13548_v22 }
 0x651   :  { %6537 = vmatmul.mubr.f32.gmra.mrb[102].mxu0 %v11021_v59  ;;  %8573 = vmatmul.mubr.f32.gmra.mrb[102].mxu1 %v11021_v59 }
 0x652   :  { %6542 = vmatprep.mubr.f32.mxu0 %v13548_v22  ;;  %8578 = vmatprep.mubr.f32.mxu1 %v13548_v22 }
 0x655   :  { %6544 = vmatmul.mubr.f32.gmra.mrb[104].mxu0 %v11040_v62  ;;  %8580 = vmatmul.mubr.f32.gmra.mrb[104].mxu1 %v11040_v62  ;;  %v13698_v62 = vld [vmem:[#allocation15_spill] sm:$0xff] }
 0x656   :  { %6549 = vmatprep.mubr.f32.mxu0 %v13548_v22  ;;  %8585 = vmatprep.mubr.f32.mxu1 %v13548_v22 }
 0x659   :  { %6551 = vmatmul.mubr.f32.gmra.mrb[106].mxu0 %v11059_v14  ;;  %8587 = vmatmul.mubr.f32.gmra.mrb[106].mxu1 %v11059_v14 }
 0x65a   :  { %6556 = vmatprep.mubr.f32.mxu0 %v13548_v22  ;;  %8592 = vmatprep.mubr.f32.mxu1 %v13548_v22 }
 0x65d   :  { %6558 = vmatmul.mubr.f32.gmra.mrb[108].mxu0 %v11078_v50  ;;  %8594 = vmatmul.mubr.f32.gmra.mrb[108].mxu1 %v11078_v50 }
 0x65e   :  { %6563 = vmatprep.mubr.f32.mxu0 %v13548_v22  ;;  %8599 = vmatprep.mubr.f32.mxu1 %v13548_v22 }
 0x661   :  { %6565 = vmatmul.mubr.f32.gmra.mrb[110].mxu0 %v11097_v33  ;;  %8601 = vmatmul.mubr.f32.gmra.mrb[110].mxu1 %v11097_v33 }
 0x662   :  { %6570 = vmatprep.mubr.f32.mxu0 %v13548_v22  ;;  %8606 = vmatprep.mubr.f32.mxu1 %v13548_v22 }
 0x665   :  { %6572 = vmatmul.mubr.f32.gmra.mrb[112].mxu0 %v11116_v28  ;;  %8608 = vmatmul.mubr.f32.gmra.mrb[112].mxu1 %v11116_v28 }
 0x666   :  { %6577 = vmatprep.mubr.f32.mxu0 %v13548_v22  ;;  %8613 = vmatprep.mubr.f32.mxu1 %v13548_v22 }
 0x669   :  { %6579 = vmatmul.mubr.f32.gmra.mrb[114].mxu0 %v11135_v15  ;;  %8615 = vmatmul.mubr.f32.gmra.mrb[114].mxu1 %v11135_v15 }
 0x66a   :  { %6584 = vmatprep.mubr.f32.mxu0 %v13548_v22  ;;  %8620 = vmatprep.mubr.f32.mxu1 %v13548_v22 }
 0x66d   :  { %6586 = vmatmul.mubr.f32.gmra.mrb[116].mxu0 %v11154_v60  ;;  %8622 = vmatmul.mubr.f32.gmra.mrb[116].mxu1 %v11154_v60 }
 0x66e   :  { %6591 = vmatprep.mubr.f32.mxu0 %v13548_v22  ;;  %8627 = vmatprep.mubr.f32.mxu1 %v13548_v22 }
 0x671   :  { %6593 = vmatmul.mubr.f32.gmra.mrb[118].mxu0 %v11173_v25  ;;  %8629 = vmatmul.mubr.f32.gmra.mrb[118].mxu1 %v11173_v25 }
 0x672   :  { %6598 = vmatprep.mubr.f32.mxu0 %v13548_v22  ;;  %8634 = vmatprep.mubr.f32.mxu1 %v13548_v22 }
 0x675   :  { %6600 = vmatmul.mubr.f32.gmra.mrb[120].mxu0 %v11192_v9  ;;  %8636 = vmatmul.mubr.f32.gmra.mrb[120].mxu1 %v11192_v9 }
 0x676   :  { %6605 = vmatprep.mubr.f32.mxu0 %v13548_v22  ;;  %8641 = vmatprep.mubr.f32.mxu1 %v13548_v22 }
 0x679   :  { %6607 = vmatmul.mubr.f32.gmra.mrb[122].mxu0 %v11211_v18  ;;  %8643 = vmatmul.mubr.f32.gmra.mrb[122].mxu1 %v11211_v18  ;;  %v13699_v18 = vld [vmem:[#allocation18_spill] sm:$0xff] }
 0x67a   :  { %6612 = vmatprep.mubr.f32.mxu0 %v13548_v22  ;;  %8648 = vmatprep.mubr.f32.mxu1 %v13548_v22 }
 0x67d   :  { %6614 = vmatmul.mubr.f32.gmra.mrb[124].mxu0 %v13549_v54  ;;  %8650 = vmatmul.mubr.f32.gmra.mrb[124].mxu1 %v13549_v54 }
 0x67e   :  { %6619 = vmatprep.mubr.f32.mxu0 %v13548_v22  ;;  %8655 = vmatprep.mubr.f32.mxu1 %v13548_v22 }
 0x681   :  { %6621 = vmatmul.mubr.f32.gmra.mrb[126].mxu0 %v13550_v42  ;;  %8657 = vmatmul.mubr.f32.gmra.mrb[126].mxu1 %v13550_v42 }
 0x6d8   :  { %v6405_v51 = vpop.f32.mrb[64].mxu0  ;;  %v8441_v17 = vpop.f32.mrb[64].mxu1 }
 0x6d9   :  { %v6407_v55 = vpop.f32.mrb[65].mxu0  ;;  %v8443_v56 = vpop.f32.mrb[65].mxu1 }
 0x6da   :  { %v8727_v6 = vmul.f32 %v6407_v55, %v6405_v51  ;;  %v8759_v8 = vmul.f32 %v8443_v56, %v8441_v17 }
 0x6dc   :  { %v8823_v10 = vmul.f32 %v8759_v8, %v8727_v6  ;;  %v6412_v11 = vpop.f32.mrb[66].mxu0  ;;  %v8448_v58 = vpop.f32.mrb[66].mxu1  ;;  %v13703_v8 = vld [vmem:[#allocation30_spill] sm:$0xff] }
 0x6dd   :  { %v6414_v1 = vpop.f32.mrb[67].mxu0  ;;  %v8450_v16 = vpop.f32.mrb[67].mxu1 }
 0x6de   :  { %v8855_v43 = vmul.f32 %v8823_v10, %v13697_v21  ;;  %v8728_v35 = vmul.f32 %v6414_v1, %v6412_v11  ;;  %v8760_v40 = vmul.f32 %v8450_v16, %v8448_v58 }
 0x6e0   :  { %8887 = vst [vmem:[#allocation2] sm:$0xff] %v8855_v43  ;;  %v8824_v20 = vmul.f32 %v8760_v40, %v8728_v35  ;;  %v6419_v3 = vpop.f32.mrb[68].mxu0  ;;  %v8455_v2 = vpop.f32.mrb[68].mxu1  ;;  %v13704_v40 = vld [vmem:[#allocation33_spill] sm:$0xff] }
 0x6e1   :  { %v6421_v36 = vpop.f32.mrb[69].mxu0  ;;  %v8457_v59 = vpop.f32.mrb[69].mxu1 }
 0x6e2   :  { %v8856_v14 = vmul.f32 %v8824_v20, %v13698_v62  ;;  %v8729_v50 = vmul.f32 %v6421_v36, %v6419_v3  ;;  %v8761_v33 = vmul.f32 %v8457_v59, %v8455_v2 }
 0x6e4   :  { %8888 = vst [vmem:[#allocation2 + $0x8] sm:$0xff] %v8856_v14  ;;  %v8825_v28 = vmul.f32 %v8761_v33, %v8729_v50  ;;  %v6426_v15 = vpop.f32.mrb[70].mxu0  ;;  %v8462_v60 = vpop.f32.mrb[70].mxu1 }
 0x6e5   :  { %v6428_v25 = vpop.f32.mrb[71].mxu0  ;;  %v8464_v9 = vpop.f32.mrb[71].mxu1 }
 0x6e6   :  { %v8857_v27 = vmul.f32 %v8825_v28, %v13699_v18  ;;  %v8730_v22 = vmul.f32 %v6428_v25, %v6426_v15  ;;  %v8762_v54 = vmul.f32 %v8464_v9, %v8462_v60 }
 0x6e8   :  { %8889 = vst [vmem:[#allocation2 + $0x10] sm:$0xff] %v8857_v27  ;;  %v8826_v42 = vmul.f32 %v8762_v54, %v8730_v22  ;;  %v6433_v46 = vpop.f32.mrb[72].mxu0  ;;  %v8469_v57 = vpop.f32.mrb[72].mxu1  ;;  %v13705_v22 = vld [vmem:[#allocation36_spill] sm:$0xff] }
 0x6e9   :  { %v6435_v49 = vpop.f32.mrb[73].mxu0  ;;  %v8471_v45 = vpop.f32.mrb[73].mxu1 }
 0x6ea   :  { %v8858_v39 = vmul.f32 %v8826_v42, %v13700_v52  ;;  %v8731_v34 = vmul.f32 %v6435_v49, %v6433_v46  ;;  %v8763_v23 = vmul.f32 %v8471_v45, %v8469_v57 }
 0x6ec   :  { %8890 = vst [vmem:[#allocation2 + $0x18] sm:$0xff] %v8858_v39  ;;  %v8827_v26 = vmul.f32 %v8763_v23, %v8731_v34  ;;  %v6440_v61 = vpop.f32.mrb[74].mxu0  ;;  %v8476_v48 = vpop.f32.mrb[74].mxu1 }
 0x6ed   :  { %v6442_v38 = vpop.f32.mrb[75].mxu0  ;;  %v8478_v13 = vpop.f32.mrb[75].mxu1 }
 0x6ee   :  { %v8859_v5 = vmul.f32 %v8827_v26, %v13701_v37  ;;  %v8732_v47 = vmul.f32 %v6442_v38, %v6440_v61  ;;  %v8764_v63 = vmul.f32 %v8478_v13, %v8476_v48  ;;  %v13706_v37 = vld [vmem:[#allocation39_spill] sm:$0xff] }
 0x6f0   :  { %8891 = vst [vmem:[#allocation2 + $0x20] sm:$0xff] %v8859_v5  ;;  %v8828_v0 = vmul.f32 %v8764_v63, %v8732_v47  ;;  %v6447_v4 = vpop.f32.mrb[76].mxu0  ;;  %v8483_v29 = vpop.f32.mrb[76].mxu1 }
 0x6f1   :  { %v6449_v41 = vpop.f32.mrb[77].mxu0  ;;  %v8485_v7 = vpop.f32.mrb[77].mxu1 }
 0x6f2   :  { %v8860_v30 = vmul.f32 %v8828_v0, %v13702_v44  ;;  %v8733_v24 = vmul.f32 %v6449_v41, %v6447_v4  ;;  %v8765_v53 = vmul.f32 %v8485_v7, %v8483_v29  ;;  %v13707_v44 = vld [vmem:[#allocation42_spill] sm:$0xff] }
 0x6f4   :  { %8892 = vst [vmem:[#allocation2 + $0x28] sm:$0xff] %v8860_v30  ;;  %v8829_v51 = vmul.f32 %v8765_v53, %v8733_v24  ;;  %v6454_v17 = vpop.f32.mrb[78].mxu0  ;;  %v8490_v55 = vpop.f32.mrb[78].mxu1 }
 0x6f5   :  { %v6456_v56 = vpop.f32.mrb[79].mxu0  ;;  %v8492_v6 = vpop.f32.mrb[79].mxu1 }
 0x6f6   :  { %v8861_v10 = vmul.f32 %v8829_v51, %v13703_v8  ;;  %v8734_v11 = vmul.f32 %v6456_v56, %v6454_v17  ;;  %v8766_v58 = vmul.f32 %v8492_v6, %v8490_v55  ;;  %v13708_v6 = vld [vmem:[#allocation45_spill] sm:$0xff] }
 0x6f8   :  { %8893 = vst [vmem:[#allocation2 + $0x30] sm:$0xff] %v8861_v10  ;;  %v8830_v1 = vmul.f32 %v8766_v58, %v8734_v11  ;;  %v6461_v16 = vpop.f32.mrb[80].mxu0  ;;  %v8497_v21 = vpop.f32.mrb[80].mxu1 }
 0x6f9   :  { %v6463_v43 = vpop.f32.mrb[81].mxu0  ;;  %v8499_v35 = vpop.f32.mrb[81].mxu1 }
 0x6fa   :  { %v8862_v20 = vmul.f32 %v8830_v1, %v13704_v40  ;;  %v8735_v3 = vmul.f32 %v6463_v43, %v6461_v16  ;;  %v8767_v2 = vmul.f32 %v8499_v35, %v8497_v21  ;;  %v13709_v35 = vld [vmem:[#allocation48_spill] sm:$0xff] }
 0x6fc   :  { %8894 = vst [vmem:[#allocation2 + $0x38] sm:$0xff] %v8862_v20  ;;  %v8831_v36 = vmul.f32 %v8767_v2, %v8735_v3  ;;  %v6468_v59 = vpop.f32.mrb[82].mxu0  ;;  %v8504_v62 = vpop.f32.mrb[82].mxu1 }
 0x6fd   :  { %v6470_v14 = vpop.f32.mrb[83].mxu0  ;;  %v8506_v50 = vpop.f32.mrb[83].mxu1 }
 0x6fe   :  { %v8863_v33 = vmul.f32 %v8831_v36, %v12298_v19  ;;  %v8736_v28 = vmul.f32 %v6470_v14, %v6468_v59  ;;  %v8768_v15 = vmul.f32 %v8506_v50, %v8504_v62  ;;  %v13710_v50 = vld [vmem:[#allocation51_spill] sm:$0xff] }
 0x700   :  { %8895 = vst [vmem:[#allocation2 + $0x40] sm:$0xff] %v8863_v33  ;;  %v8832_v60 = vmul.f32 %v8768_v15, %v8736_v28  ;;  %v6475_v25 = vpop.f32.mrb[84].mxu0  ;;  %v8511_v9 = vpop.f32.mrb[84].mxu1 }
 0x701   :  { %v6477_v18 = vpop.f32.mrb[85].mxu0  ;;  %v8513_v27 = vpop.f32.mrb[85].mxu1 }
 0x702   :  { %v8864_v54 = vmul.f32 %v8832_v60, %v13705_v22  ;;  %v8737_v42 = vmul.f32 %v6477_v18, %v6475_v25  ;;  %v8769_v46 = vmul.f32 %v8513_v27, %v8511_v9  ;;  %v13711_v22 = vld [vmem:[#allocation54_spill] sm:$0xff] }
 0x704   :  { %8896 = vst [vmem:[#allocation2 + $0x48] sm:$0xff] %v8864_v54  ;;  %v8833_v57 = vmul.f32 %v8769_v46, %v8737_v42  ;;  %v6482_v49 = vpop.f32.mrb[86].mxu0  ;;  %v8518_v45 = vpop.f32.mrb[86].mxu1 }
 0x705   :  { %v6484_v52 = vpop.f32.mrb[87].mxu0  ;;  %v8520_v39 = vpop.f32.mrb[87].mxu1 }
 0x706   :  { %v8865_v19 = vmul.f32 %v8833_v57, %v12314_v12  ;;  %v8738_v34 = vmul.f32 %v6484_v52, %v6482_v49  ;;  %v8770_v23 = vmul.f32 %v8520_v39, %v8518_v45 }
 0x708   :  { %8897 = vst [vmem:[#allocation2 + $0x50] sm:$0xff] %v8865_v19  ;;  %v8834_v26 = vmul.f32 %v8770_v23, %v8738_v34  ;;  %v6489_v61 = vpop.f32.mrb[88].mxu0  ;;  %v8525_v48 = vpop.f32.mrb[88].mxu1  ;;  %v13712_v19 = vld [vmem:[#allocation57_spill] sm:$0xff] }
 0x709   :  { %v6491_v38 = vpop.f32.mrb[89].mxu0  ;;  %v8527_v13 = vpop.f32.mrb[89].mxu1 }
 0x70a   :  { %v8866_v5 = vmul.f32 %v8834_v26, %v13706_v37  ;;  %v8739_v47 = vmul.f32 %v6491_v38, %v6489_v61  ;;  %v8771_v63 = vmul.f32 %v8527_v13, %v8525_v48 }
 0x70c   :  { %8898 = vst [vmem:[#allocation2 + $0x58] sm:$0xff] %v8866_v5  ;;  %v8835_v0 = vmul.f32 %v8771_v63, %v8739_v47  ;;  %v6496_v4 = vpop.f32.mrb[90].mxu0  ;;  %v8532_v29 = vpop.f32.mrb[90].mxu1  ;;  %v13713_v5 = vld [vmem:[#allocation60_spill] sm:$0xff] }
 0x70d   :  { %v6498_v41 = vpop.f32.mrb[91].mxu0  ;;  %v8534_v7 = vpop.f32.mrb[91].mxu1 }
 0x70e   :  { %v8867_v12 = vmul.f32 %v8835_v0, %v13707_v44  ;;  %v8740_v30 = vmul.f32 %v6498_v41, %v6496_v4  ;;  %v8772_v24 = vmul.f32 %v8534_v7, %v8532_v29 }
 0x710   :  { %8899 = vst [vmem:[#allocation2 + $0x60] sm:$0xff] %v8867_v12  ;;  %v8836_v53 = vmul.f32 %v8772_v24, %v8740_v30  ;;  %v6503_v51 = vpop.f32.mrb[92].mxu0  ;;  %v8539_v17 = vpop.f32.mrb[92].mxu1  ;;  %v13714_v12 = vld [vmem:[#allocation63_spill] sm:$0xff] }
 0x711   :  { %v6505_v55 = vpop.f32.mrb[93].mxu0  ;;  %v8541_v56 = vpop.f32.mrb[93].mxu1 }
 0x712   :  { %v8868_v8 = vmul.f32 %v8836_v53, %v13708_v6  ;;  %v8741_v10 = vmul.f32 %v6505_v55, %v6503_v51  ;;  %v8773_v11 = vmul.f32 %v8541_v56, %v8539_v17 }
 0x714   :  { %8900 = vst [vmem:[#allocation2 + $0x68] sm:$0xff] %v8868_v8  ;;  %v8837_v58 = vmul.f32 %v8773_v11, %v8741_v10  ;;  %v6510_v1 = vpop.f32.mrb[94].mxu0  ;;  %v8546_v16 = vpop.f32.mrb[94].mxu1  ;;  %v13715_v8 = vld [vmem:[#allocation66_spill] sm:$0xff] }
 0x715   :  { %v6512_v21 = vpop.f32.mrb[95].mxu0  ;;  %v8548_v43 = vpop.f32.mrb[95].mxu1 }
 0x716   :  { %v8869_v40 = vmul.f32 %v8837_v58, %v13709_v35  ;;  %v8742_v20 = vmul.f32 %v6512_v21, %v6510_v1  ;;  %v8774_v3 = vmul.f32 %v8548_v43, %v8546_v16 }
 0x718   :  { %8901 = vst [vmem:[#allocation2 + $0x70] sm:$0xff] %v8869_v40  ;;  %v8838_v2 = vmul.f32 %v8774_v3, %v8742_v20  ;;  %v6517_v36 = vpop.f32.mrb[96].mxu0  ;;  %v8553_v59 = vpop.f32.mrb[96].mxu1  ;;  %v13716_v40 = vld [vmem:[#allocation69_spill] sm:$0xff] }
 0x719   :  { %v6519_v62 = vpop.f32.mrb[97].mxu0  ;;  %v8555_v14 = vpop.f32.mrb[97].mxu1 }
 0x71a   :  { %v8870_v33 = vmul.f32 %v8838_v2, %v13710_v50  ;;  %v8743_v28 = vmul.f32 %v6519_v62, %v6517_v36  ;;  %v8775_v15 = vmul.f32 %v8555_v14, %v8553_v59 }
 0x71c   :  { %8902 = vst [vmem:[#allocation2 + $0x78] sm:$0xff] %v8870_v33  ;;  %v8839_v60 = vmul.f32 %v8775_v15, %v8743_v28  ;;  %v6524_v25 = vpop.f32.mrb[98].mxu0  ;;  %v8560_v9 = vpop.f32.mrb[98].mxu1  ;;  %v13717_v33 = vld [vmem:[#allocation72_spill] sm:$0xff] }
 0x71d   :  { %v6526_v18 = vpop.f32.mrb[99].mxu0  ;;  %v8562_v27 = vpop.f32.mrb[99].mxu1 }
 0x71e   :  { %v8871_v54 = vmul.f32 %v8839_v60, %v13711_v22  ;;  %v8744_v42 = vmul.f32 %v6526_v18, %v6524_v25  ;;  %v8776_v46 = vmul.f32 %v8562_v27, %v8560_v9 }
 0x720   :  { %8903 = vst [vmem:[#allocation2 + $0x80] sm:$0xff] %v8871_v54  ;;  %v8840_v57 = vmul.f32 %v8776_v46, %v8744_v42  ;;  %v6531_v49 = vpop.f32.mrb[100].mxu0  ;;  %v8567_v45 = vpop.f32.mrb[100].mxu1  ;;  %v13718_v54 = vld [vmem:[#allocation75_spill] sm:$0xff] }
 0x721   :  { %v6533_v52 = vpop.f32.mrb[101].mxu0  ;;  %v8569_v39 = vpop.f32.mrb[101].mxu1 }
 0x722   :  { %v8872_v34 = vmul.f32 %v8840_v57, %v13712_v19  ;;  %v8745_v23 = vmul.f32 %v6533_v52, %v6531_v49  ;;  %v8777_v26 = vmul.f32 %v8569_v39, %v8567_v45 }
 0x724   :  { %8904 = vst [vmem:[#allocation2 + $0x88] sm:$0xff] %v8872_v34  ;;  %v8841_v61 = vmul.f32 %v8777_v26, %v8745_v23  ;;  %v6538_v48 = vpop.f32.mrb[102].mxu0  ;;  %v8574_v38 = vpop.f32.mrb[102].mxu1  ;;  %v13719_v34 = vld [vmem:[#allocation78_spill] sm:$0xff] }
 0x725   :  { %v6540_v13 = vpop.f32.mrb[103].mxu0  ;;  %v8576_v37 = vpop.f32.mrb[103].mxu1 }
 0x726   :  { %v8873_v47 = vmul.f32 %v8841_v61, %v13713_v5  ;;  %v8746_v63 = vmul.f32 %v6540_v13, %v6538_v48  ;;  %v8778_v0 = vmul.f32 %v8576_v37, %v8574_v38 }
 0x728   :  { %8905 = vst [vmem:[#allocation2 + $0x90] sm:$0xff] %v8873_v47  ;;  %v8842_v4 = vmul.f32 %v8778_v0, %v8746_v63  ;;  %v6545_v29 = vpop.f32.mrb[104].mxu0  ;;  %v8581_v41 = vpop.f32.mrb[104].mxu1  ;;  %v13720_v47 = vld [vmem:[#allocation81_spill] sm:$0xff] }
 0x729   :  { %v6547_v7 = vpop.f32.mrb[105].mxu0  ;;  %v8583_v44 = vpop.f32.mrb[105].mxu1 }
 0x72a   :  { %v8874_v30 = vmul.f32 %v8842_v4, %v13714_v12  ;;  %v8747_v24 = vmul.f32 %v6547_v7, %v6545_v29  ;;  %v8779_v53 = vmul.f32 %v8583_v44, %v8581_v41 }
 0x72c   :  { %8906 = vst [vmem:[#allocation2 + $0x98] sm:$0xff] %v8874_v30  ;;  %v8843_v51 = vmul.f32 %v8779_v53, %v8747_v24  ;;  %v6552_v17 = vpop.f32.mrb[106].mxu0  ;;  %v8588_v55 = vpop.f32.mrb[106].mxu1  ;;  %v13721_v30 = vld [vmem:[#allocation84_spill] sm:$0xff] }
 0x72d   :  { %v6554_v56 = vpop.f32.mrb[107].mxu0  ;;  %v8590_v6 = vpop.f32.mrb[107].mxu1 }
 0x72e   :  { %v8875_v10 = vmul.f32 %v8843_v51, %v13715_v8  ;;  %v8748_v11 = vmul.f32 %v6554_v56, %v6552_v17  ;;  %v8780_v58 = vmul.f32 %v8590_v6, %v8588_v55 }
 0x730   :  { %8907 = vst [vmem:[#allocation2 + $0xa0] sm:$0xff] %v8875_v10  ;;  %v8844_v1 = vmul.f32 %v8780_v58, %v8748_v11  ;;  %v6559_v16 = vpop.f32.mrb[108].mxu0  ;;  %v8595_v21 = vpop.f32.mrb[108].mxu1  ;;  %v13722_v10 = vld [vmem:[#allocation87_spill] sm:$0xff] }
 0x731   :  { %v6561_v43 = vpop.f32.mrb[109].mxu0  ;;  %v8597_v35 = vpop.f32.mrb[109].mxu1 }
 0x732   :  { %v8876_v20 = vmul.f32 %v8844_v1, %v13716_v40  ;;  %v8749_v3 = vmul.f32 %v6561_v43, %v6559_v16  ;;  %v8781_v2 = vmul.f32 %v8597_v35, %v8595_v21 }
 0x734   :  { %8908 = vst [vmem:[#allocation2 + $0xa8] sm:$0xff] %v8876_v20  ;;  %v8845_v36 = vmul.f32 %v8781_v2, %v8749_v3  ;;  %v6566_v59 = vpop.f32.mrb[110].mxu0  ;;  %v8602_v62 = vpop.f32.mrb[110].mxu1  ;;  %v13723_v20 = vld [vmem:[#allocation90_spill] sm:$0xff] }
 0x735   :  { %v6568_v14 = vpop.f32.mrb[111].mxu0  ;;  %v8604_v50 = vpop.f32.mrb[111].mxu1 }
 0x736   :  { %v8877_v28 = vmul.f32 %v8845_v36, %v13717_v33  ;;  %v8750_v15 = vmul.f32 %v6568_v14, %v6566_v59  ;;  %v8782_v60 = vmul.f32 %v8604_v50, %v8602_v62 }
 0x738   :  { %8909 = vst [vmem:[#allocation2 + $0xb0] sm:$0xff] %v8877_v28  ;;  %v8846_v25 = vmul.f32 %v8782_v60, %v8750_v15  ;;  %v6573_v9 = vpop.f32.mrb[112].mxu0  ;;  %v8609_v18 = vpop.f32.mrb[112].mxu1  ;;  %v13724_v28 = vld [vmem:[#allocation93_spill] sm:$0xff] }
 0x739   :  { %v6575_v27 = vpop.f32.mrb[113].mxu0  ;;  %v8611_v22 = vpop.f32.mrb[113].mxu1 }
 0x73a   :  { %v8878_v42 = vmul.f32 %v8846_v25, %v13718_v54  ;;  %v8751_v46 = vmul.f32 %v6575_v27, %v6573_v9  ;;  %v8783_v57 = vmul.f32 %v8611_v22, %v8609_v18 }
 0x73c   :  { %8910 = vst [vmem:[#allocation2 + $0xb8] sm:$0xff] %v8878_v42  ;;  %v8847_v49 = vmul.f32 %v8783_v57, %v8751_v46  ;;  %v6580_v45 = vpop.f32.mrb[114].mxu0  ;;  %v8616_v52 = vpop.f32.mrb[114].mxu1 }
 0x73d   :  { %v6582_v39 = vpop.f32.mrb[115].mxu0  ;;  %v8618_v19 = vpop.f32.mrb[115].mxu1 }
 0x73e   :  { %v8879_v23 = vmul.f32 %v8847_v49, %v13719_v34  ;;  %v8752_v26 = vmul.f32 %v6582_v39, %v6580_v45  ;;  %v8784_v61 = vmul.f32 %v8618_v19, %v8616_v52 }
 0x740   :  { %8911 = vst [vmem:[#allocation2 + $0xc0] sm:$0xff] %v8879_v23  ;;  %v8848_v48 = vmul.f32 %v8784_v61, %v8752_v26  ;;  %v6587_v38 = vpop.f32.mrb[116].mxu0  ;;  %v8623_v13 = vpop.f32.mrb[116].mxu1 }
 0x741   :  { %v6589_v37 = vpop.f32.mrb[117].mxu0  ;;  %v8625_v5 = vpop.f32.mrb[117].mxu1 }
 0x742   :  { %v8880_v63 = vmul.f32 %v8848_v48, %v13720_v47  ;;  %v8753_v0 = vmul.f32 %v6589_v37, %v6587_v38  ;;  %v8785_v4 = vmul.f32 %v8625_v5, %v8623_v13 }
 0x744   :  { %8912 = vst [vmem:[#allocation2 + $0xc8] sm:$0xff] %v8880_v63  ;;  %v8849_v29 = vmul.f32 %v8785_v4, %v8753_v0  ;;  %v6594_v41 = vpop.f32.mrb[118].mxu0  ;;  %v8630_v7 = vpop.f32.mrb[118].mxu1 }
 0x745   :  { %v6596_v44 = vpop.f32.mrb[119].mxu0  ;;  %v8632_v12 = vpop.f32.mrb[119].mxu1 }
 0x746   :  { %v8881_v24 = vmul.f32 %v8849_v29, %v13721_v30  ;;  %v8754_v53 = vmul.f32 %v6596_v44, %v6594_v41  ;;  %v8786_v51 = vmul.f32 %v8632_v12, %v8630_v7 }
 0x748   :  { %8913 = vst [vmem:[#allocation2 + $0xd0] sm:$0xff] %v8881_v24  ;;  %v8850_v17 = vmul.f32 %v8786_v51, %v8754_v53  ;;  %v6601_v55 = vpop.f32.mrb[120].mxu0  ;;  %v8637_v56 = vpop.f32.mrb[120].mxu1 }
 0x749   :  { %v6603_v6 = vpop.f32.mrb[121].mxu0  ;;  %v8639_v8 = vpop.f32.mrb[121].mxu1 }
 0x74a   :  { %v8882_v11 = vmul.f32 %v8850_v17, %v13722_v10  ;;  %v8755_v58 = vmul.f32 %v6603_v6, %v6601_v55  ;;  %v8787_v1 = vmul.f32 %v8639_v8, %v8637_v56 }
 0x74c   :  { %8914 = vst [vmem:[#allocation2 + $0xd8] sm:$0xff] %v8882_v11  ;;  %v8851_v16 = vmul.f32 %v8787_v1, %v8755_v58  ;;  %v6608_v21 = vpop.f32.mrb[122].mxu0  ;;  %v8644_v43 = vpop.f32.mrb[122].mxu1 }
 0x74d   :  { %v6610_v35 = vpop.f32.mrb[123].mxu0  ;;  %v8646_v40 = vpop.f32.mrb[123].mxu1 }
 0x74e   :  { %v8883_v3 = vmul.f32 %v8851_v16, %v13723_v20  ;;  %v8756_v2 = vmul.f32 %v6610_v35, %v6608_v21  ;;  %v8788_v36 = vmul.f32 %v8646_v40, %v8644_v43 }
 0x750   :  { %8915 = vst [vmem:[#allocation2 + $0xe0] sm:$0xff] %v8883_v3  ;;  %v8852_v59 = vmul.f32 %v8788_v36, %v8756_v2  ;;  %v6615_v62 = vpop.f32.mrb[124].mxu0  ;;  %v8651_v14 = vpop.f32.mrb[124].mxu1 }
 0x751   :  { %v6617_v50 = vpop.f32.mrb[125].mxu0  ;;  %v8653_v33 = vpop.f32.mrb[125].mxu1 }
 0x752   :  { %v8884_v15 = vmul.f32 %v8852_v59, %v13724_v28  ;;  %v8757_v60 = vmul.f32 %v6617_v50, %v6615_v62  ;;  %v8789_v25 = vmul.f32 %v8653_v33, %v8651_v14 }
 0x754   :  { %8916 = vst [vmem:[#allocation2 + $0xe8] sm:$0xff] %v8884_v15  ;;  %v8853_v9 = vmul.f32 %v8789_v25, %v8757_v60  ;;  %v6622_v18 = vpop.f32.mrb[126].mxu0  ;;  %v8658_v27 = vpop.f32.mrb[126].mxu1 }
 0x755   :  { %v6624_v22 = vpop.f32.mrb[127].mxu0  ;;  %v8660_v54 = vpop.f32.mrb[127].mxu1 }
 0x756   :  { %v8885_v42 = vmul.f32 %v8853_v9, %v12440_v32  ;;  %v8758_v46 = vmul.f32 %v6624_v22, %v6622_v18  ;;  %v8790_v57 = vmul.f32 %v8660_v54, %v8658_v27 }
 0x758   :  { %8917 = vst [vmem:[#allocation2 + $0xf0] sm:$0xff] %v8885_v42  ;;  %v8854_v49 = vmul.f32 %v8790_v57, %v8758_v46 }
 0x75a   :  { %v8886_v45 = vmul.f32 %v8854_v49, %v12446_v31 }
 0x75c   :  { %8918 = vst [vmem:[#allocation2 + $0xf8] sm:$0xff] %v8886_v45 }
 0x75d   :  { %10327 = shalt.err (!%p10324_p4)
}
 0x75e   :  { %s10328_s0 = scalar_lea.hbm %s13087_s2, 4096 }
 0x75f   :  { %p10329_p5 = scmp.ne.s32.totalorder %s13087_s2, %s10328_s0  ;;  %p10332_p6 = scmp.lt.u32.totalorder %s10328_s0, %s13087_s2 }
 0x761   :  { %p10334_p7 = pnand %p10332_p6, %p10329_p5 }
 0x763   :  { %10337 = shalt.err (!%p10334_p7)
}
 0x764   :  { %s10344_s24 = smov 128  }
 0x765   :  { %8930 = dma.vmem_to_hbm [thread:$0]  %s8925_s17, 4096, %s13087_s2, [#allocation3], %s10344_s24, %s10344_s24, %s10340_s13  }
 0x766   :  { %10338 = dma.done.wait [#allocation3], 4096  }
 0x767   :  { %10339 = vsyncadd [#allocation3], 4294963200 }
 0x768   :  { %8934 = vsyncpa [#allocation3], 1 }

</bundles_post_ra>
